<compile_context>
chip_gen: v7x
topology: tpu7x:2x2x1
jax: 0.10.0
libtpu: 0.0.40
codegen_flags: <defaults>
</compile_context>

<pallas_src>
import functools

import jax
import jax.numpy as jnp
from jax.experimental import pallas as pl
from jax.experimental.pallas import tpu as pltpu


LANE = 128


def _ru(c, m=LANE):
    return ((c + m - 1) // m) * m


def _pad_lanes(x, target):
    pad = target - x.shape[-1]
    if pad == 0:
        return x
    return jnp.pad(x, [(0, 0)] * (x.ndim - 1) + [(0, pad)])


def _to_xf(x_nhwc):
    """NHWC -> flattened zero-bordered slab (N, (H+3)*(W+2), ru(C))."""
    N, H, W, C = x_nhwc.shape
    xp = jnp.pad(x_nhwc, ((0, 0), (1, 2), (1, 1), (0, 0)))
    xf = xp.reshape(N, (H + 3) * (W + 2), C)
    return _pad_lanes(xf, _ru(C))


# ---------------------------------------------------------------------------
# Kernel 1: (M, K) @ (K, N) + bias   (ConvTranspose2d k=2 s=2 == pure matmul)
# ---------------------------------------------------------------------------
def _matmul_bias_kernel(x_ref, w_ref, b_ref, o_ref):
    acc = jnp.dot(x_ref[0], w_ref[...], preferred_element_type=jnp.float32)
    acc = acc + b_ref[...]
    o_ref[0] = acc.astype(o_ref.dtype)


def conv_transpose_matmul(x_flat, w_mat, b_row, *, out_dtype=jnp.float32):
    """x_flat: (N, M, K) bf16, w_mat: (K, CP) bf16, b_row: (1, CP) f32."""
    N, M, K = x_flat.shape
    CP = w_mat.shape[-1]
    return pl.pallas_call(
        _matmul_bias_kernel,
        out_shape=jax.ShapeDtypeStruct((N, M, CP), out_dtype),
        grid_spec=pltpu.PrefetchScalarGridSpec(
            num_scalar_prefetch=0,
            grid=(N,),
            in_specs=[pl.BlockSpec((1, M, K), lambda n: (n, 0, 0)),
                      pl.BlockSpec((K, CP), lambda n: (0, 0)),
                      pl.BlockSpec((1, CP), lambda n: (0, 0))],
            out_specs=pl.BlockSpec((1, M, CP), lambda n: (n, 0, 0)),
        ),
        compiler_params=pltpu.CompilerParams(
            dimension_semantics=("parallel",),
            vmem_limit_bytes=32 * 1024 * 1024),
        cost_estimate=pl.CostEstimate(
            flops=2 * N * M * K * CP, transcendentals=0,
            bytes_accessed=int(x_flat.size * 2 + w_mat.size * 2
                               + N * M * CP * 4)),
    )(x_flat, w_mat, b_row)


# ---------------------------------------------------------------------------
# Kernel 2: FUSED double 3x3 conv (pad=1) + bias + ReLU.
#   conv1:  up(x1)-slab * W1a  +  x2-slab * W1b  + b1  -> ReLU
#           written into a VMEM scratch in Xf form (zero borders in-kernel).
#   conv2:  scratch-slab * W2 + b2 -> ReLU -> natural flat rows (M, CPo).
#   Each 3x3 tap is a contiguous row-slice of the slab at offset dy*(W+2)+dx.
# ---------------------------------------------------------------------------
def _double_conv_kernel(up_ref, x2_ref, w1a_ref, w1b_ref, b1_ref,
                        w2_ref, b2_ref, m_ref, o_ref, y1_ref, *, Wp):
    M = o_ref.shape[1]
    CPo = o_ref.shape[-1]
    R_in = y1_ref.shape[0]

    # ---- conv1: ReLU(up*W1a + x2*W1b + b1) -> y1 scratch (Xf form) ---------
    acc = jnp.zeros((M, CPo), jnp.float32)
    for t in range(9):                          # static unroll: 9 taps
        dy, dx = divmod(t, 3)
        off = dy * Wp + dx                      # contiguous row-slice per tap
        acc = acc + jnp.dot(up_ref[0, off:off + M, :].astype(jnp.bfloat16),
                            w1a_ref[t], preferred_element_type=jnp.float32)
        acc = acc + jnp.dot(x2_ref[0, off:off + M, :].astype(jnp.bfloat16),
                            w1b_ref[t], preferred_element_type=jnp.float32)
    acc = jnp.maximum(acc + b1_ref[...], 0.0)
    acc = acc * m_ref[...]                      # zero the wrap-around columns

    # zero only the border rows; the interior is fully overwritten below
    y1_ref[0:Wp + 1, :] = jnp.zeros((Wp + 1, CPo), jnp.float32)
    y1_ref[Wp + 1 + M:R_in, :] = jnp.zeros((R_in - (Wp + 1 + M), CPo),
                                           jnp.float32)
    y1_ref[Wp + 1:Wp + 1 + M, :] = acc          # data inside the zero border

    # ---- conv2: ReLU(y1*W2 + b2) -> natural flat rows ----------------------
    acc2 = jnp.zeros((M, CPo), jnp.float32)
    for t in range(9):
        dy, dx = divmod(t, 3)
        off = dy * Wp + dx
        acc2 = acc2 + jnp.dot(y1_ref[off:off + M, :].astype(jnp.bfloat16),
                              w2_ref[t], preferred_element_type=jnp.float32)
    acc2 = jnp.maximum(acc2 + b2_ref[...], 0.0)
    acc2 = acc2 * m_ref[...]
    o_ref[0] = acc2.astype(o_ref.dtype)


def double_conv(up_xf, x2_xf, w1a, w1b, b1, w2, b2, mask, *, H, W,
                out_dtype=jnp.float32):
    Wp = W + 2
    M = H * Wp
    R_in = (H + 3) * Wp
    N = up_xf.shape[0]
    CPa, CPb = up_xf.shape[-1], x2_xf.shape[-1]
    CPo = b1.shape[-1]
    assert up_xf.shape[:2] == (N, R_in) and x2_xf.shape[:2] == (N, R_in)

    kernel = functools.partial(_double_conv_kernel, Wp=Wp)
    flops = 2 * N * M * 9 * ((CPa + CPb) * CPo + CPo * CPo)
    bytes_accessed = int(
        (up_xf.size + x2_xf.size) * 4
        + (w1a.size + w1b.size + w2.size) * 2
        + (b1.size + b2.size + mask.size) * 4
        + N * M * CPo * 4)

    return pl.pallas_call(
        kernel,
        out_shape=jax.ShapeDtypeStruct((N, M, CPo), out_dtype),
        grid_spec=pltpu.PrefetchScalarGridSpec(
            num_scalar_prefetch=0,
            grid=(N,),
            in_specs=[
                pl.BlockSpec((1, R_in, CPa), lambda n: (n, 0, 0)),
                pl.BlockSpec((1, R_in, CPb), lambda n: (n, 0, 0)),
                pl.BlockSpec(w1a.shape, lambda n: (0, 0, 0)),
                pl.BlockSpec(w1b.shape, lambda n: (0, 0, 0)),
                pl.BlockSpec(b1.shape, lambda n: (0, 0)),
                pl.BlockSpec(w2.shape, lambda n: (0, 0, 0)),
                pl.BlockSpec(b2.shape, lambda n: (0, 0)),
                pl.BlockSpec(mask.shape, lambda n: (0, 0)),
            ],
            out_specs=pl.BlockSpec((1, M, CPo), lambda n: (n, 0, 0)),
            scratch_shapes=[pltpu.VMEM((R_in, CPo), jnp.float32)],
        ),
        compiler_params=pltpu.CompilerParams(
            dimension_semantics=("parallel",),
            vmem_limit_bytes=32 * 1024 * 1024),
        cost_estimate=pl.CostEstimate(flops=flops, transcendentals=0,
                                      bytes_accessed=bytes_accessed),
    )(up_xf, x2_xf, w1a, w1b, b1, w2, b2, mask)


# ---------------------------------------------------------------------------
# UpSample.forward
# ---------------------------------------------------------------------------
def upsample_forward(params, x1_nchw, x2_nchw):
    N, Cin, H, W = x1_nchw.shape
    Chalf = Cin // 2
    Cout = params["c1_w"].shape[0]
    H2, W2 = 2 * H, 2 * W
    Wp2 = W2 + 2
    M2 = H2 * Wp2

    # --- ConvTranspose2d(Cin, Cin//2, k=2, s=2): one matmul per image -------
    x1 = jnp.transpose(x1_nchw, (0, 2, 3, 1)).reshape(N, H * W, Cin)
    x1 = _pad_lanes(x1, _ru(Cin)).astype(jnp.bfloat16)
    # weight columns ordered (di, dj, co); pad K and N to 128 lanes
    w_up = jnp.transpose(params["up_w"], (0, 2, 3, 1)).reshape(Cin, 4 * Chalf)
    w_up = jnp.pad(w_up, ((0, _ru(Cin) - Cin),
                          (0, _ru(4 * Chalf) - 4 * Chalf))).astype(jnp.bfloat16)
    b_up = _pad_lanes(jnp.tile(params["up_b"], 4).reshape(1, 4 * Chalf),
                      _ru(4 * Chalf)).astype(jnp.float32)
    up_raw = conv_transpose_matmul(x1, w_up, b_up)          # (N, H*W, 128) f32

    # de-interleave the 2x2 phases into NHWC (glue; see TODO at top of file)
    up = up_raw[:, :, :4 * Chalf].reshape(N, H, W, 2, 2, Chalf)
    up = up.transpose(0, 1, 3, 2, 4, 5).reshape(N, H2, W2, Chalf)
    up_xf = _to_xf(up)                                       # (N, (H2+3)*Wp2, 128)

    x2_xf = _to_xf(jnp.transpose(x2_nchw, (0, 2, 3, 1)))     # skip connection

    # --- conv weights: per-tap (9, Ck, Cout) stacks, K split = no concat ----
    def pad_taps(w):
        _, ci, co = w.shape
        return jnp.pad(w, ((0, 0), (0, _ru(ci) - ci),
                           (0, _ru(co) - co))).astype(jnp.bfloat16)

    w1 = jnp.transpose(params["c1_w"], (2, 3, 1, 0)).reshape(9, Cin, Cout)
    w1a = pad_taps(w1[:, :Chalf, :])     # acts on up(x1) channels
    w1b = pad_taps(w1[:, Chalf:, :])     # acts on x2 channels
    b1 = _pad_lanes(params["c1_b"].reshape(1, Cout), _ru(Cout)).astype(jnp.float32)
    w2 = pad_taps(jnp.transpose(params["c2_w"], (2, 3, 1, 0)).reshape(9, Cout, Cout))
    b2 = _pad_lanes(params["c2_b"].reshape(1, Cout), _ru(Cout)).astype(jnp.float32)

    # validity mask for the wrap-around columns of the flattened row layout
    mask = ((jnp.arange(M2) % Wp2) < W2).astype(jnp.float32).reshape(M2, 1)

    # fused conv1 (two slabs, K-split weights) + conv2, intermediate in VMEM
    y2 = double_conv(up_xf, x2_xf, w1a, w1b, b1, w2, b2, mask,
                     H=H2, W=W2, out_dtype=jnp.float32)

    y = y2[:, :, :Cout].reshape(N, H2, Wp2, Cout)[:, :, :W2, :]
    return jnp.transpose(y, (0, 3, 1, 2))                    # NHWC -> NCHW


# ---------------------------------------------------------------------------
# Pure-JAX reference (NCHW, same math as the PyTorch module) for validation.
# ---------------------------------------------------------------------------
def upsample_reference(params, x1, x2):
    w, b = params["up_w"], params["up_b"]
    t = jnp.einsum("ncij,copq->noipjq", x1, w)
    N, Co, H, _, W, _ = t.shape
    up = t.reshape(N, Co, 2 * H, 2 * W) + b[None, :, None, None]
    x = jnp.concatenate([up, x2], axis=1)
    for wk, bk in ((params["c1_w"], params["c1_b"]),
                   (params["c2_w"], params["c2_b"])):
        x = jax.lax.conv_general_dilated(
            x, wk, window_strides=(1, 1), padding="SAME",
            dimension_numbers=("NCHW", "OIHW", "NCHW"))
        x = jnp.maximum(x + bk[None, :, None, None], 0.0)
    return x


if __name__ == "__main__":
    in_channels, out_channels = 4, 8
    N, H, W = 2, 8, 8                     # x1 spatial; x2 is 2x larger

    key = jax.random.PRNGKey(0)
    k = jax.random.split(key, 8)
    params = {
        "up_w": 0.1 * jax.random.normal(k[0], (in_channels, in_channels // 2, 2, 2), jnp.float32),
        "up_b": 0.1 * jax.random.normal(k[1], (in_channels // 2,), jnp.float32),
        "c1_w": 0.1 * jax.random.normal(k[2], (out_channels, in_channels, 3, 3), jnp.float32),
        "c1_b": 0.1 * jax.random.normal(k[3], (out_channels,), jnp.float32),
        "c2_w": 0.1 * jax.random.normal(k[4], (out_channels, out_channels, 3, 3), jnp.float32),
        "c2_b": 0.1 * jax.random.normal(k[5], (out_channels,), jnp.float32),
    }

    x1 = jax.random.normal(k[6], (N, in_channels, H, W), jnp.float32)
    x2 = jax.random.normal(k[7], (N, in_channels // 2, 2 * H, 2 * W), jnp.float32)

    fwd = jax.jit(upsample_forward)
    out = jax.block_until_ready(fwd(params, x1, x2))
    ref = jax.block_until_ready(upsample_reference(params, x1, x2))

    assert out.shape == (N, out_channels, 2 * H, 2 * W), out.shape
    max_err = float(jnp.max(jnp.abs(out - ref)))
    assert jnp.allclose(out, ref, atol=5e-2, rtol=5e-2), max_err
    print("KERNEL_OK")
</pallas_src>

<mosaic_0001>
module attributes {stable_mosaic.version = 11 : i64} {
  func.func @_matmul_bias_kernel(%arg0: i32, %arg1: memref<1x64x128xbf16, #tpu.memory_space<vmem>>, %arg2: memref<128x128xbf16, #tpu.memory_space<vmem>>, %arg3: memref<1x128xf32, #tpu.memory_space<vmem>>, %arg4: memref<1x64x128xf32, #tpu.memory_space<vmem>>) attributes {dimension_semantics = [#tpu.dimension_semantics<parallel>], iteration_bounds = array<i64: 2>, scalar_prefetch = 0 : i64, scratch_operands = 0 : i64, tpu.core_type = #tpu.core_type<tc>, window_params = [{transform_indices = @transform_0, window_bounds = array<i64: 1, 64, 128>}, {pipeline_mode = #tpu.pipeline_mode<synchronous>, transform_indices = @transform_1, window_bounds = array<i64: 128, 128>}, {pipeline_mode = #tpu.pipeline_mode<synchronous>, transform_indices = @transform_2, window_bounds = array<i64: 1, 128>}, {transform_indices = @transform_3, window_bounds = array<i64: 1, 64, 128>}]} {
    %c0 = arith.constant 0 : index
    %c0_0 = arith.constant 0 : index
    %c0_1 = arith.constant 0 : index
    %0 = vector.load %arg1[%c0, %c0_0, %c0_1] : memref<1x64x128xbf16, #tpu.memory_space<vmem>>, vector<1x64x128xbf16>
    %1 = vector.shape_cast %0 : vector<1x64x128xbf16> to vector<64x128xbf16>
    %c0_2 = arith.constant 0 : index
    %c0_3 = arith.constant 0 : index
    %2 = vector.load %arg2[%c0_2, %c0_3] : memref<128x128xbf16, #tpu.memory_space<vmem>>, vector<128x128xbf16>
    %cst = arith.constant dense<0.000000e+00> : vector<64x128xf32>
    %3 = tpu.matmul %1, %2, %cst {dimension_numbers = #tpu.dot_dimension_numbers<[1], [0], [0], [1], [0, 0, 1, 1], [], []>} : vector<64x128xbf16>, vector<128x128xbf16>, vector<64x128xf32> -> vector<64x128xf32>
    %c0_4 = arith.constant 0 : index
    %c0_5 = arith.constant 0 : index
    %4 = vector.load %arg3[%c0_4, %c0_5] : memref<1x128xf32, #tpu.memory_space<vmem>>, vector<1x128xf32>
    %5 = vector.broadcast %4 : vector<1x128xf32> to vector<64x128xf32>
    %6 = arith.addf %3, %5 : vector<64x128xf32>
    %c0_6 = arith.constant 0 : index
    %c0_7 = arith.constant 0 : index
    %c0_8 = arith.constant 0 : index
    %7 = vector.load %arg4[%c0_6, %c0_7, %c0_8] : memref<1x64x128xf32, #tpu.memory_space<vmem>>, vector<1x64x128xf32>
    %8 = vector.shape_cast %7 : vector<1x64x128xf32> to vector<64x128xf32>
    %9 = vector.shape_cast %6 : vector<64x128xf32> to vector<1x64x128xf32>
    tpu.vector_store %arg4[%c0_6, %c0_7, %c0_8], %9 {strides = array<i32>} : memref<1x64x128xf32, #tpu.memory_space<vmem>>, vector<1x64x128xf32>,
    return
  }
  func.func @transform_0(%arg0: i32) -> (i32, i32, i32) {
    %c0_i32 = arith.constant 0 : i32
    %c0_i32_0 = arith.constant 0 : i32
    %c0_i32_1 = arith.constant 0 : i32
    return %arg0, %c0_i32, %c0_i32_0 : i32, i32, i32
  }
  func.func @transform_1(%arg0: i32) -> (i32, i32) {
    %c0_i32 = arith.constant 0 : i32
    %c0_i32_0 = arith.constant 0 : i32
    %c0_i32_1 = arith.constant 0 : i32
    return %c0_i32, %c0_i32_0 : i32, i32
  }
  func.func @transform_2(%arg0: i32) -> (i32, i32) {
    %c0_i32 = arith.constant 0 : i32
    %c0_i32_0 = arith.constant 0 : i32
    %c0_i32_1 = arith.constant 0 : i32
    return %c0_i32, %c0_i32_0 : i32, i32
  }
  func.func @transform_3(%arg0: i32) -> (i32, i32, i32) {
    %c0_i32 = arith.constant 0 : i32
    %c0_i32_0 = arith.constant 0 : i32
    %c0_i32_1 = arith.constant 0 : i32
    return %arg0, %c0_i32, %c0_i32_0 : i32, i32, i32
  }
}

module attributes {stable_mosaic.version = 11 : i64} {
  func.func @_double_conv_kernel(%arg0: i32, %arg1: memref<1x342x128xf32, #tpu.memory_space<vmem>>, %arg2: memref<1x342x128xf32, #tpu.memory_space<vmem>>, %arg3: memref<9x128x128xbf16, #tpu.memory_space<vmem>>, %arg4: memref<9x128x128xbf16, #tpu.memory_space<vmem>>, %arg5: memref<1x128xf32, #tpu.memory_space<vmem>>, %arg6: memref<9x128x128xbf16, #tpu.memory_space<vmem>>, %arg7: memref<1x128xf32, #tpu.memory_space<vmem>>, %arg8: memref<288x1xf32, #tpu.memory_space<vmem>>, %arg9: memref<1x288x128xf32, #tpu.memory_space<vmem>>, %arg10: memref<342x128xf32, #tpu.memory_space<vmem>>) attributes {dimension_semantics = [#tpu.dimension_semantics<parallel>], iteration_bounds = array<i64: 2>, scalar_prefetch = 0 : i64, scratch_operands = 1 : i64, tpu.core_type = #tpu.core_type<tc>, window_params = [{transform_indices = @transform_0, window_bounds = array<i64: 1, 342, 128>}, {transform_indices = @transform_1, window_bounds = array<i64: 1, 342, 128>}, {pipeline_mode = #tpu.pipeline_mode<synchronous>, transform_indices = @transform_2, window_bounds = array<i64: 9, 128, 128>}, {pipeline_mode = #tpu.pipeline_mode<synchronous>, transform_indices = @transform_3, window_bounds = array<i64: 9, 128, 128>}, {pipeline_mode = #tpu.pipeline_mode<synchronous>, transform_indices = @transform_4, window_bounds = array<i64: 1, 128>}, {pipeline_mode = #tpu.pipeline_mode<synchronous>, transform_indices = @transform_5, window_bounds = array<i64: 9, 128, 128>}, {pipeline_mode = #tpu.pipeline_mode<synchronous>, transform_indices = @transform_6, window_bounds = array<i64: 1, 128>}, {pipeline_mode = #tpu.pipeline_mode<synchronous>, transform_indices = @transform_7, window_bounds = array<i64: 288, 1>}, {transform_indices = @transform_8, window_bounds = array<i64: 1, 288, 128>}]} {
    %cst = arith.constant 0.000000e+00 : f32
    %0 = vector.broadcast %cst : f32 to vector<288x128xf32>
    %c0 = arith.constant 0 : index
    %c0_0 = arith.constant 0 : index
    %c0_1 = arith.constant 0 : index
    %1 = vector.load %arg1[%c0, %c0_0, %c0_1] : memref<1x342x128xf32, #tpu.memory_space<vmem>>, vector<1x288x128xf32>
    %2 = vector.shape_cast %1 : vector<1x288x128xf32> to vector<288x128xf32>
    %3 = arith.truncf %2 : vector<288x128xf32> to vector<288x128xbf16>
    %c0_2 = arith.constant 0 : index
    %c0_3 = arith.constant 0 : index
    %c0_4 = arith.constant 0 : index
    %4 = vector.load %arg3[%c0_2, %c0_3, %c0_4] : memref<9x128x128xbf16, #tpu.memory_space<vmem>>, vector<1x128x128xbf16>
    %5 = vector.shape_cast %4 : vector<1x128x128xbf16> to vector<128x128xbf16>
    %cst_5 = arith.constant dense<0.000000e+00> : vector<288x128xf32>
    %6 = tpu.matmul %3, %5, %cst_5 {dimension_numbers = #tpu.dot_dimension_numbers<[1], [0], [0], [1], [0, 0, 1, 1], [], []>} : vector<288x128xbf16>, vector<128x128xbf16>, vector<288x128xf32> -> vector<288x128xf32>
    %7 = arith.addf %0, %6 : vector<288x128xf32>
    %c0_6 = arith.constant 0 : index
    %c0_7 = arith.constant 0 : index
    %c0_8 = arith.constant 0 : index
    %8 = vector.load %arg2[%c0_6, %c0_7, %c0_8] : memref<1x342x128xf32, #tpu.memory_space<vmem>>, vector<1x288x128xf32>
    %9 = vector.shape_cast %8 : vector<1x288x128xf32> to vector<288x128xf32>
    %10 = arith.truncf %9 : vector<288x128xf32> to vector<288x128xbf16>
    %c0_9 = arith.constant 0 : index
    %c0_10 = arith.constant 0 : index
    %c0_11 = arith.constant 0 : index
    %11 = vector.load %arg4[%c0_9, %c0_10, %c0_11] : memref<9x128x128xbf16, #tpu.memory_space<vmem>>, vector<1x128x128xbf16>
    %12 = vector.shape_cast %11 : vector<1x128x128xbf16> to vector<128x128xbf16>
    %cst_12 = arith.constant dense<0.000000e+00> : vector<288x128xf32>
    %13 = tpu.matmul %10, %12, %cst_12 {dimension_numbers = #tpu.dot_dimension_numbers<[1], [0], [0], [1], [0, 0, 1, 1], [], []>} : vector<288x128xbf16>, vector<128x128xbf16>, vector<288x128xf32> -> vector<288x128xf32>
    %14 = arith.addf %7, %13 : vector<288x128xf32>
    %c0_13 = arith.constant 0 : index
    %c1 = arith.constant 1 : index
    %c0_14 = arith.constant 0 : index
    %15 = vector.load %arg1[%c0_13, %c1, %c0_14] : memref<1x342x128xf32, #tpu.memory_space<vmem>>, vector<1x288x128xf32>
    %16 = vector.shape_cast %15 : vector<1x288x128xf32> to vector<288x128xf32>
    %17 = arith.truncf %16 : vector<288x128xf32> to vector<288x128xbf16>
    %c1_15 = arith.constant 1 : index
    %c0_16 = arith.constant 0 : index
    %c0_17 = arith.constant 0 : index
    %18 = vector.load %arg3[%c1_15, %c0_16, %c0_17] : memref<9x128x128xbf16, #tpu.memory_space<vmem>>, vector<1x128x128xbf16>
    %19 = vector.shape_cast %18 : vector<1x128x128xbf16> to vector<128x128xbf16>
    %cst_18 = arith.constant dense<0.000000e+00> : vector<288x128xf32>
    %20 = tpu.matmul %17, %19, %cst_18 {dimension_numbers = #tpu.dot_dimension_numbers<[1], [0], [0], [1], [0, 0, 1, 1], [], []>} : vector<288x128xbf16>, vector<128x128xbf16>, vector<288x128xf32> -> vector<288x128xf32>
    %21 = arith.addf %14, %20 : vector<288x128xf32>
    %c0_19 = arith.constant 0 : index
    %c1_20 = arith.constant 1 : index
    %c0_21 = arith.constant 0 : index
    %22 = vector.load %arg2[%c0_19, %c1_20, %c0_21] : memref<1x342x128xf32, #tpu.memory_space<vmem>>, vector<1x288x128xf32>
    %23 = vector.shape_cast %22 : vector<1x288x128xf32> to vector<288x128xf32>
    %24 = arith.truncf %23 : vector<288x128xf32> to vector<288x128xbf16>
    %c1_22 = arith.constant 1 : index
    %c0_23 = arith.constant 0 : index
    %c0_24 = arith.constant 0 : index
    %25 = vector.load %arg4[%c1_22, %c0_23, %c0_24] : memref<9x128x128xbf16, #tpu.memory_space<vmem>>, vector<1x128x128xbf16>
    %26 = vector.shape_cast %25 : vector<1x128x128xbf16> to vector<128x128xbf16>
    %cst_25 = arith.constant dense<0.000000e+00> : vector<288x128xf32>
    %27 = tpu.matmul %24, %26, %cst_25 {dimension_numbers = #tpu.dot_dimension_numbers<[1], [0], [0], [1], [0, 0, 1, 1], [], []>} : vector<288x128xbf16>, vector<128x128xbf16>, vector<288x128xf32> -> vector<288x128xf32>
    %28 = arith.addf %21, %27 : vector<288x128xf32>
    %c0_26 = arith.constant 0 : index
    %c2 = arith.constant 2 : index
    %c0_27 = arith.constant 0 : index
    %29 = vector.load %arg1[%c0_26, %c2, %c0_27] : memref<1x342x128xf32, #tpu.memory_space<vmem>>, vector<1x288x128xf32>
    %30 = vector.shape_cast %29 : vector<1x288x128xf32> to vector<288x128xf32>
    %31 = arith.truncf %30 : vector<288x128xf32> to vector<288x128xbf16>
    %c2_28 = arith.constant 2 : index
    %c0_29 = arith.constant 0 : index
    %c0_30 = arith.constant 0 : index
    %32 = vector.load %arg3[%c2_28, %c0_29, %c0_30] : memref<9x128x128xbf16, #tpu.memory_space<vmem>>, vector<1x128x128xbf16>
    %33 = vector.shape_cast %32 : vector<1x128x128xbf16> to vector<128x128xbf16>
    %cst_31 = arith.constant dense<0.000000e+00> : vector<288x128xf32>
    %34 = tpu.matmul %31, %33, %cst_31 {dimension_numbers = #tpu.dot_dimension_numbers<[1], [0], [0], [1], [0, 0, 1, 1], [], []>} : vector<288x128xbf16>, vector<128x128xbf16>, vector<288x128xf32> -> vector<288x128xf32>
    %35 = arith.addf %28, %34 : vector<288x128xf32>
    %c0_32 = arith.constant 0 : index
    %c2_33 = arith.constant 2 : index
    %c0_34 = arith.constant 0 : index
    %36 = vector.load %arg2[%c0_32, %c2_33, %c0_34] : memref<1x342x128xf32, #tpu.memory_space<vmem>>, vector<1x288x128xf32>
    %37 = vector.shape_cast %36 : vector<1x288x128xf32> to vector<288x128xf32>
    %38 = arith.truncf %37 : vector<288x128xf32> to vector<288x128xbf16>
    %c2_35 = arith.constant 2 : index
    %c0_36 = arith.constant 0 : index
    %c0_37 = arith.constant 0 : index
    %39 = vector.load %arg4[%c2_35, %c0_36, %c0_37] : memref<9x128x128xbf16, #tpu.memory_space<vmem>>, vector<1x128x128xbf16>
    %40 = vector.shape_cast %39 : vector<1x128x128xbf16> to vector<128x128xbf16>
    %cst_38 = arith.constant dense<0.000000e+00> : vector<288x128xf32>
    %41 = tpu.matmul %38, %40, %cst_38 {dimension_numbers = #tpu.dot_dimension_numbers<[1], [0], [0], [1], [0, 0, 1, 1], [], []>} : vector<288x128xbf16>, vector<128x128xbf16>, vector<288x128xf32> -> vector<288x128xf32>
    %42 = arith.addf %35, %41 : vector<288x128xf32>
    %c0_39 = arith.constant 0 : index
    %c18 = arith.constant 18 : index
    %c0_40 = arith.constant 0 : index
    %43 = vector.load %arg1[%c0_39, %c18, %c0_40] : memref<1x342x128xf32, #tpu.memory_space<vmem>>, vector<1x288x128xf32>
    %44 = vector.shape_cast %43 : vector<1x288x128xf32> to vector<288x128xf32>
    %45 = arith.truncf %44 : vector<288x128xf32> to vector<288x128xbf16>
    %c3 = arith.constant 3 : index
    %c0_41 = arith.constant 0 : index
    %c0_42 = arith.constant 0 : index
    %46 = vector.load %arg3[%c3, %c0_41, %c0_42] : memref<9x128x128xbf16, #tpu.memory_space<vmem>>, vector<1x128x128xbf16>
    %47 = vector.shape_cast %46 : vector<1x128x128xbf16> to vector<128x128xbf16>
    %cst_43 = arith.constant dense<0.000000e+00> : vector<288x128xf32>
    %48 = tpu.matmul %45, %47, %cst_43 {dimension_numbers = #tpu.dot_dimension_numbers<[1], [0], [0], [1], [0, 0, 1, 1], [], []>} : vector<288x128xbf16>, vector<128x128xbf16>, vector<288x128xf32> -> vector<288x128xf32>
    %49 = arith.addf %42, %48 : vector<288x128xf32>
    %c0_44 = arith.constant 0 : index
    %c18_45 = arith.constant 18 : index
    %c0_46 = arith.constant 0 : index
    %50 = vector.load %arg2[%c0_44, %c18_45, %c0_46] : memref<1x342x128xf32, #tpu.memory_space<vmem>>, vector<1x288x128xf32>
    %51 = vector.shape_cast %50 : vector<1x288x128xf32> to vector<288x128xf32>
    %52 = arith.truncf %51 : vector<288x128xf32> to vector<288x128xbf16>
    %c3_47 = arith.constant 3 : index
    %c0_48 = arith.constant 0 : index
    %c0_49 = arith.constant 0 : index
    %53 = vector.load %arg4[%c3_47, %c0_48, %c0_49] : memref<9x128x128xbf16, #tpu.memory_space<vmem>>, vector<1x128x128xbf16>
    %54 = vector.shape_cast %53 : vector<1x128x128xbf16> to vector<128x128xbf16>
    %cst_50 = arith.constant dense<0.000000e+00> : vector<288x128xf32>
    %55 = tpu.matmul %52, %54, %cst_50 {dimension_numbers = #tpu.dot_dimension_numbers<[1], [0], [0], [1], [0, 0, 1, 1], [], []>} : vector<288x128xbf16>, vector<128x128xbf16>, vector<288x128xf32> -> vector<288x128xf32>
    %56 = arith.addf %49, %55 : vector<288x128xf32>
    %c0_51 = arith.constant 0 : index
    %c19 = arith.constant 19 : index
    %c0_52 = arith.constant 0 : index
    %57 = vector.load %arg1[%c0_51, %c19, %c0_52] : memref<1x342x128xf32, #tpu.memory_space<vmem>>, vector<1x288x128xf32>
    %58 = vector.shape_cast %57 : vector<1x288x128xf32> to vector<288x128xf32>
    %59 = arith.truncf %58 : vector<288x128xf32> to vector<288x128xbf16>
    %c4 = arith.constant 4 : index
    %c0_53 = arith.constant 0 : index
    %c0_54 = arith.constant 0 : index
    %60 = vector.load %arg3[%c4, %c0_53, %c0_54] : memref<9x128x128xbf16, #tpu.memory_space<vmem>>, vector<1x128x128xbf16>
    %61 = vector.shape_cast %60 : vector<1x128x128xbf16> to vector<128x128xbf16>
    %cst_55 = arith.constant dense<0.000000e+00> : vector<288x128xf32>
    %62 = tpu.matmul %59, %61, %cst_55 {dimension_numbers = #tpu.dot_dimension_numbers<[1], [0], [0], [1], [0, 0, 1, 1], [], []>} : vector<288x128xbf16>, vector<128x128xbf16>, vector<288x128xf32> -> vector<288x128xf32>
    %63 = arith.addf %56, %62 : vector<288x128xf32>
    %c0_56 = arith.constant 0 : index
    %c19_57 = arith.constant 19 : index
    %c0_58 = arith.constant 0 : index
    %64 = vector.load %arg2[%c0_56, %c19_57, %c0_58] : memref<1x342x128xf32, #tpu.memory_space<vmem>>, vector<1x288x128xf32>
    %65 = vector.shape_cast %64 : vector<1x288x128xf32> to vector<288x128xf32>
    %66 = arith.truncf %65 : vector<288x128xf32> to vector<288x128xbf16>
    %c4_59 = arith.constant 4 : index
    %c0_60 = arith.constant 0 : index
    %c0_61 = arith.constant 0 : index
    %67 = vector.load %arg4[%c4_59, %c0_60, %c0_61] : memref<9x128x128xbf16, #tpu.memory_space<vmem>>, vector<1x128x128xbf16>
    %68 = vector.shape_cast %67 : vector<1x128x128xbf16> to vector<128x128xbf16>
    %cst_62 = arith.constant dense<0.000000e+00> : vector<288x128xf32>
    %69 = tpu.matmul %66, %68, %cst_62 {dimension_numbers = #tpu.dot_dimension_numbers<[1], [0], [0], [1], [0, 0, 1, 1], [], []>} : vector<288x128xbf16>, vector<128x128xbf16>, vector<288x128xf32> -> vector<288x128xf32>
    %70 = arith.addf %63, %69 : vector<288x128xf32>
    %c0_63 = arith.constant 0 : index
    %c20 = arith.constant 20 : index
    %c0_64 = arith.constant 0 : index
    %71 = vector.load %arg1[%c0_63, %c20, %c0_64] : memref<1x342x128xf32, #tpu.memory_space<vmem>>, vector<1x288x128xf32>
    %72 = vector.shape_cast %71 : vector<1x288x128xf32> to vector<288x128xf32>
    %73 = arith.truncf %72 : vector<288x128xf32> to vector<288x128xbf16>
    %c5 = arith.constant 5 : index
    %c0_65 = arith.constant 0 : index
    %c0_66 = arith.constant 0 : index
    %74 = vector.load %arg3[%c5, %c0_65, %c0_66] : memref<9x128x128xbf16, #tpu.memory_space<vmem>>, vector<1x128x128xbf16>
    %75 = vector.shape_cast %74 : vector<1x128x128xbf16> to vector<128x128xbf16>
    %cst_67 = arith.constant dense<0.000000e+00> : vector<288x128xf32>
    %76 = tpu.matmul %73, %75, %cst_67 {dimension_numbers = #tpu.dot_dimension_numbers<[1], [0], [0], [1], [0, 0, 1, 1], [], []>} : vector<288x128xbf16>, vector<128x128xbf16>, vector<288x128xf32> -> vector<288x128xf32>
    %77 = arith.addf %70, %76 : vector<288x128xf32>
    %c0_68 = arith.constant 0 : index
    %c20_69 = arith.constant 20 : index
    %c0_70 = arith.constant 0 : index
    %78 = vector.load %arg2[%c0_68, %c20_69, %c0_70] : memref<1x342x128xf32, #tpu.memory_space<vmem>>, vector<1x288x128xf32>
    %79 = vector.shape_cast %78 : vector<1x288x128xf32> to vector<288x128xf32>
    %80 = arith.truncf %79 : vector<288x128xf32> to vector<288x128xbf16>
    %c5_71 = arith.constant 5 : index
    %c0_72 = arith.constant 0 : index
    %c0_73 = arith.constant 0 : index
    %81 = vector.load %arg4[%c5_71, %c0_72, %c0_73] : memref<9x128x128xbf16, #tpu.memory_space<vmem>>, vector<1x128x128xbf16>
    %82 = vector.shape_cast %81 : vector<1x128x128xbf16> to vector<128x128xbf16>
    %cst_74 = arith.constant dense<0.000000e+00> : vector<288x128xf32>
    %83 = tpu.matmul %80, %82, %cst_74 {dimension_numbers = #tpu.dot_dimension_numbers<[1], [0], [0], [1], [0, 0, 1, 1], [], []>} : vector<288x128xbf16>, vector<128x128xbf16>, vector<288x128xf32> -> vector<288x128xf32>
    %84 = arith.addf %77, %83 : vector<288x128xf32>
    %c0_75 = arith.constant 0 : index
    %c36 = arith.constant 36 : index
    %c0_76 = arith.constant 0 : index
    %85 = vector.load %arg1[%c0_75, %c36, %c0_76] : memref<1x342x128xf32, #tpu.memory_space<vmem>>, vector<1x288x128xf32>
    %86 = vector.shape_cast %85 : vector<1x288x128xf32> to vector<288x128xf32>
    %87 = arith.truncf %86 : vector<288x128xf32> to vector<288x128xbf16>
    %c6 = arith.constant 6 : index
    %c0_77 = arith.constant 0 : index
    %c0_78 = arith.constant 0 : index
    %88 = vector.load %arg3[%c6, %c0_77, %c0_78] : memref<9x128x128xbf16, #tpu.memory_space<vmem>>, vector<1x128x128xbf16>
    %89 = vector.shape_cast %88 : vector<1x128x128xbf16> to vector<128x128xbf16>
    %cst_79 = arith.constant dense<0.000000e+00> : vector<288x128xf32>
    %90 = tpu.matmul %87, %89, %cst_79 {dimension_numbers = #tpu.dot_dimension_numbers<[1], [0], [0], [1], [0, 0, 1, 1], [], []>} : vector<288x128xbf16>, vector<128x128xbf16>, vector<288x128xf32> -> vector<288x128xf32>
    %91 = arith.addf %84, %90 : vector<288x128xf32>
    %c0_80 = arith.constant 0 : index
    %c36_81 = arith.constant 36 : index
    %c0_82 = arith.constant 0 : index
    %92 = vector.load %arg2[%c0_80, %c36_81, %c0_82] : memref<1x342x128xf32, #tpu.memory_space<vmem>>, vector<1x288x128xf32>
    %93 = vector.shape_cast %92 : vector<1x288x128xf32> to vector<288x128xf32>
    %94 = arith.truncf %93 : vector<288x128xf32> to vector<288x128xbf16>
    %c6_83 = arith.constant 6 : index
    %c0_84 = arith.constant 0 : index
    %c0_85 = arith.constant 0 : index
    %95 = vector.load %arg4[%c6_83, %c0_84, %c0_85] : memref<9x128x128xbf16, #tpu.memory_space<vmem>>, vector<1x128x128xbf16>
    %96 = vector.shape_cast %95 : vector<1x128x128xbf16> to vector<128x128xbf16>
    %cst_86 = arith.constant dense<0.000000e+00> : vector<288x128xf32>
    %97 = tpu.matmul %94, %96, %cst_86 {dimension_numbers = #tpu.dot_dimension_numbers<[1], [0], [0], [1], [0, 0, 1, 1], [], []>} : vector<288x128xbf16>, vector<128x128xbf16>, vector<288x128xf32> -> vector<288x128xf32>
    %98 = arith.addf %91, %97 : vector<288x128xf32>
    %c0_87 = arith.constant 0 : index
    %c37 = arith.constant 37 : index
    %c0_88 = arith.constant 0 : index
    %99 = vector.load %arg1[%c0_87, %c37, %c0_88] : memref<1x342x128xf32, #tpu.memory_space<vmem>>, vector<1x288x128xf32>
    %100 = vector.shape_cast %99 : vector<1x288x128xf32> to vector<288x128xf32>
    %101 = arith.truncf %100 : vector<288x128xf32> to vector<288x128xbf16>
    %c7 = arith.constant 7 : index
    %c0_89 = arith.constant 0 : index
    %c0_90 = arith.constant 0 : index
    %102 = vector.load %arg3[%c7, %c0_89, %c0_90] : memref<9x128x128xbf16, #tpu.memory_space<vmem>>, vector<1x128x128xbf16>
    %103 = vector.shape_cast %102 : vector<1x128x128xbf16> to vector<128x128xbf16>
    %cst_91 = arith.constant dense<0.000000e+00> : vector<288x128xf32>
    %104 = tpu.matmul %101, %103, %cst_91 {dimension_numbers = #tpu.dot_dimension_numbers<[1], [0], [0], [1], [0, 0, 1, 1], [], []>} : vector<288x128xbf16>, vector<128x128xbf16>, vector<288x128xf32> -> vector<288x128xf32>
    %105 = arith.addf %98, %104 : vector<288x128xf32>
    %c0_92 = arith.constant 0 : index
    %c37_93 = arith.constant 37 : index
    %c0_94 = arith.constant 0 : index
    %106 = vector.load %arg2[%c0_92, %c37_93, %c0_94] : memref<1x342x128xf32, #tpu.memory_space<vmem>>, vector<1x288x128xf32>
    %107 = vector.shape_cast %106 : vector<1x288x128xf32> to vector<288x128xf32>
    %108 = arith.truncf %107 : vector<288x128xf32> to vector<288x128xbf16>
    %c7_95 = arith.constant 7 : index
    %c0_96 = arith.constant 0 : index
    %c0_97 = arith.constant 0 : index
    %109 = vector.load %arg4[%c7_95, %c0_96, %c0_97] : memref<9x128x128xbf16, #tpu.memory_space<vmem>>, vector<1x128x128xbf16>
    %110 = vector.shape_cast %109 : vector<1x128x128xbf16> to vector<128x128xbf16>
    %cst_98 = arith.constant dense<0.000000e+00> : vector<288x128xf32>
    %111 = tpu.matmul %108, %110, %cst_98 {dimension_numbers = #tpu.dot_dimension_numbers<[1], [0], [0], [1], [0, 0, 1, 1], [], []>} : vector<288x128xbf16>, vector<128x128xbf16>, vector<288x128xf32> -> vector<288x128xf32>
    %112 = arith.addf %105, %111 : vector<288x128xf32>
    %c0_99 = arith.constant 0 : index
    %c38 = arith.constant 38 : index
    %c0_100 = arith.constant 0 : index
    %113 = vector.load %arg1[%c0_99, %c38, %c0_100] : memref<1x342x128xf32, #tpu.memory_space<vmem>>, vector<1x288x128xf32>
    %114 = vector.shape_cast %113 : vector<1x288x128xf32> to vector<288x128xf32>
    %115 = arith.truncf %114 : vector<288x128xf32> to vector<288x128xbf16>
    %c8 = arith.constant 8 : index
    %c0_101 = arith.constant 0 : index
    %c0_102 = arith.constant 0 : index
    %116 = vector.load %arg3[%c8, %c0_101, %c0_102] : memref<9x128x128xbf16, #tpu.memory_space<vmem>>, vector<1x128x128xbf16>
    %117 = vector.shape_cast %116 : vector<1x128x128xbf16> to vector<128x128xbf16>
    %cst_103 = arith.constant dense<0.000000e+00> : vector<288x128xf32>
    %118 = tpu.matmul %115, %117, %cst_103 {dimension_numbers = #tpu.dot_dimension_numbers<[1], [0], [0], [1], [0, 0, 1, 1], [], []>} : vector<288x128xbf16>, vector<128x128xbf16>, vector<288x128xf32> -> vector<288x128xf32>
    %119 = arith.addf %112, %118 : vector<288x128xf32>
    %c0_104 = arith.constant 0 : index
    %c38_105 = arith.constant 38 : index
    %c0_106 = arith.constant 0 : index
    %120 = vector.load %arg2[%c0_104, %c38_105, %c0_106] : memref<1x342x128xf32, #tpu.memory_space<vmem>>, vector<1x288x128xf32>
    %121 = vector.shape_cast %120 : vector<1x288x128xf32> to vector<288x128xf32>
    %122 = arith.truncf %121 : vector<288x128xf32> to vector<288x128xbf16>
    %c8_107 = arith.constant 8 : index
    %c0_108 = arith.constant 0 : index
    %c0_109 = arith.constant 0 : index
    %123 = vector.load %arg4[%c8_107, %c0_108, %c0_109] : memref<9x128x128xbf16, #tpu.memory_space<vmem>>, vector<1x128x128xbf16>
    %124 = vector.shape_cast %123 : vector<1x128x128xbf16> to vector<128x128xbf16>
    %cst_110 = arith.constant dense<0.000000e+00> : vector<288x128xf32>
    %125 = tpu.matmul %122, %124, %cst_110 {dimension_numbers = #tpu.dot_dimension_numbers<[1], [0], [0], [1], [0, 0, 1, 1], [], []>} : vector<288x128xbf16>, vector<128x128xbf16>, vector<288x128xf32> -> vector<288x128xf32>
    %126 = arith.addf %119, %125 : vector<288x128xf32>
    %c0_111 = arith.constant 0 : index
    %c0_112 = arith.constant 0 : index
    %127 = vector.load %arg5[%c0_111, %c0_112] : memref<1x128xf32, #tpu.memory_space<vmem>>, vector<1x128xf32>
    %128 = vector.broadcast %127 : vector<1x128xf32> to vector<288x128xf32>
    %129 = arith.addf %126, %128 : vector<288x128xf32>
    %cst_113 = arith.constant 0.000000e+00 : f32
    %130 = vector.broadcast %cst_113 : f32 to vector<288x128xf32>
    %131 = arith.maximumf %129, %130 : vector<288x128xf32>
    %c0_114 = arith.constant 0 : index
    %c0_115 = arith.constant 0 : index
    %132 = vector.load %arg8[%c0_114, %c0_115] : memref<288x1xf32, #tpu.memory_space<vmem>>, vector<288x1xf32>
    %133 = vector.broadcast %132 : vector<288x1xf32> to vector<288x128xf32>
    %134 = arith.mulf %131, %133 : vector<288x128xf32>
    %cst_116 = arith.constant 0.000000e+00 : f32
    %135 = vector.broadcast %cst_116 : f32 to vector<19x128xf32>
    %c0_117 = arith.constant 0 : index
    %c0_118 = arith.constant 0 : index
    %136 = vector.load %arg10[%c0_117, %c0_118] : memref<342x128xf32, #tpu.memory_space<vmem>>, vector<19x128xf32>
    tpu.vector_store %arg10[%c0_117, %c0_118], %135 {strides = array<i32>} : memref<342x128xf32, #tpu.memory_space<vmem>>, vector<19x128xf32>,
    %cst_119 = arith.constant 0.000000e+00 : f32
    %137 = vector.broadcast %cst_119 : f32 to vector<35x128xf32>
    %c307 = arith.constant 307 : index
    %c0_120 = arith.constant 0 : index
    %138 = vector.load %arg10[%c307, %c0_120] : memref<342x128xf32, #tpu.memory_space<vmem>>, vector<35x128xf32>
    tpu.vector_store %arg10[%c307, %c0_120], %137 {strides = array<i32>} : memref<342x128xf32, #tpu.memory_space<vmem>>, vector<35x128xf32>,
    %c19_121 = arith.constant 19 : index
    %c0_122 = arith.constant 0 : index
    %139 = vector.load %arg10[%c19_121, %c0_122] : memref<342x128xf32, #tpu.memory_space<vmem>>, vector<288x128xf32>
    tpu.vector_store %arg10[%c19_121, %c0_122], %134 {strides = array<i32>} : memref<342x128xf32, #tpu.memory_space<vmem>>, vector<288x128xf32>,
    %cst_123 = arith.constant 0.000000e+00 : f32
    %140 = vector.broadcast %cst_123 : f32 to vector<288x128xf32>
    %c0_124 = arith.constant 0 : index
    %c0_125 = arith.constant 0 : index
    %141 = vector.load %arg10[%c0_124, %c0_125] : memref<342x128xf32, #tpu.memory_space<vmem>>, vector<288x128xf32>
    %142 = arith.truncf %141 : vector<288x128xf32> to vector<288x128xbf16>
    %c0_126 = arith.constant 0 : index
    %c0_127 = arith.constant 0 : index
    %c0_128 = arith.constant 0 : index
    %143 = vector.load %arg6[%c0_126, %c0_127, %c0_128] : memref<9x128x128xbf16, #tpu.memory_space<vmem>>, vector<1x128x128xbf16>
    %144 = vector.shape_cast %143 : vector<1x128x128xbf16> to vector<128x128xbf16>
    %cst_129 = arith.constant dense<0.000000e+00> : vector<288x128xf32>
    %145 = tpu.matmul %142, %144, %cst_129 {dimension_numbers = #tpu.dot_dimension_numbers<[1], [0], [0], [1], [0, 0, 1, 1], [], []>} : vector<288x128xbf16>, vector<128x128xbf16>, vector<288x128xf32> -> vector<288x128xf32>
    %146 = arith.addf %140, %145 : vector<288x128xf32>
    %c1_130 = arith.constant 1 : index
    %c0_131 = arith.constant 0 : index
    %147 = vector.load %arg10[%c1_130, %c0_131] : memref<342x128xf32, #tpu.memory_space<vmem>>, vector<288x128xf32>
    %148 = arith.truncf %147 : vector<288x128xf32> to vector<288x128xbf16>
    %c1_132 = arith.constant 1 : index
    %c0_133 = arith.constant 0 : index
    %c0_134 = arith.constant 0 : index
    %149 = vector.load %arg6[%c1_132, %c0_133, %c0_134] : memref<9x128x128xbf16, #tpu.memory_space<vmem>>, vector<1x128x128xbf16>
    %150 = vector.shape_cast %149 : vector<1x128x128xbf16> to vector<128x128xbf16>
    %cst_135 = arith.constant dense<0.000000e+00> : vector<288x128xf32>
    %151 = tpu.matmul %148, %150, %cst_135 {dimension_numbers = #tpu.dot_dimension_numbers<[1], [0], [0], [1], [0, 0, 1, 1], [], []>} : vector<288x128xbf16>, vector<128x128xbf16>, vector<288x128xf32> -> vector<288x128xf32>
    %152 = arith.addf %146, %151 : vector<288x128xf32>
    %c2_136 = arith.constant 2 : index
    %c0_137 = arith.constant 0 : index
    %153 = vector.load %arg10[%c2_136, %c0_137] : memref<342x128xf32, #tpu.memory_space<vmem>>, vector<288x128xf32>
    %154 = arith.truncf %153 : vector<288x128xf32> to vector<288x128xbf16>
    %c2_138 = arith.constant 2 : index
    %c0_139 = arith.constant 0 : index
    %c0_140 = arith.constant 0 : index
    %155 = vector.load %arg6[%c2_138, %c0_139, %c0_140] : memref<9x128x128xbf16, #tpu.memory_space<vmem>>, vector<1x128x128xbf16>
    %156 = vector.shape_cast %155 : vector<1x128x128xbf16> to vector<128x128xbf16>
    %cst_141 = arith.constant dense<0.000000e+00> : vector<288x128xf32>
    %157 = tpu.matmul %154, %156, %cst_141 {dimension_numbers = #tpu.dot_dimension_numbers<[1], [0], [0], [1], [0, 0, 1, 1], [], []>} : vector<288x128xbf16>, vector<128x128xbf16>, vector<288x128xf32> -> vector<288x128xf32>
    %158 = arith.addf %152, %157 : vector<288x128xf32>
    %c18_142 = arith.constant 18 : index
    %c0_143 = arith.constant 0 : index
    %159 = vector.load %arg10[%c18_142, %c0_143] : memref<342x128xf32, #tpu.memory_space<vmem>>, vector<288x128xf32>
    %160 = arith.truncf %159 : vector<288x128xf32> to vector<288x128xbf16>
    %c3_144 = arith.constant 3 : index
    %c0_145 = arith.constant 0 : index
    %c0_146 = arith.constant 0 : index
    %161 = vector.load %arg6[%c3_144, %c0_145, %c0_146] : memref<9x128x128xbf16, #tpu.memory_space<vmem>>, vector<1x128x128xbf16>
    %162 = vector.shape_cast %161 : vector<1x128x128xbf16> to vector<128x128xbf16>
    %cst_147 = arith.constant dense<0.000000e+00> : vector<288x128xf32>
    %163 = tpu.matmul %160, %162, %cst_147 {dimension_numbers = #tpu.dot_dimension_numbers<[1], [0], [0], [1], [0, 0, 1, 1], [], []>} : vector<288x128xbf16>, vector<128x128xbf16>, vector<288x128xf32> -> vector<288x128xf32>
    %164 = arith.addf %158, %163 : vector<288x128xf32>
    %c19_148 = arith.constant 19 : index
    %c0_149 = arith.constant 0 : index
    %165 = vector.load %arg10[%c19_148, %c0_149] : memref<342x128xf32, #tpu.memory_space<vmem>>, vector<288x128xf32>
    %166 = arith.truncf %165 : vector<288x128xf32> to vector<288x128xbf16>
    %c4_150 = arith.constant 4 : index
    %c0_151 = arith.constant 0 : index
    %c0_152 = arith.constant 0 : index
    %167 = vector.load %arg6[%c4_150, %c0_151, %c0_152] : memref<9x128x128xbf16, #tpu.memory_space<vmem>>, vector<1x128x128xbf16>
    %168 = vector.shape_cast %167 : vector<1x128x128xbf16> to vector<128x128xbf16>
    %cst_153 = arith.constant dense<0.000000e+00> : vector<288x128xf32>
    %169 = tpu.matmul %166, %168, %cst_153 {dimension_numbers = #tpu.dot_dimension_numbers<[1], [0], [0], [1], [0, 0, 1, 1], [], []>} : vector<288x128xbf16>, vector<128x128xbf16>, vector<288x128xf32> -> vector<288x128xf32>
    %170 = arith.addf %164, %169 : vector<288x128xf32>
    %c20_154 = arith.constant 20 : index
    %c0_155 = arith.constant 0 : index
    %171 = vector.load %arg10[%c20_154, %c0_155] : memref<342x128xf32, #tpu.memory_space<vmem>>, vector<288x128xf32>
    %172 = arith.truncf %171 : vector<288x128xf32> to vector<288x128xbf16>
    %c5_156 = arith.constant 5 : index
    %c0_157 = arith.constant 0 : index
    %c0_158 = arith.constant 0 : index
    %173 = vector.load %arg6[%c5_156, %c0_157, %c0_158] : memref<9x128x128xbf16, #tpu.memory_space<vmem>>, vector<1x128x128xbf16>
    %174 = vector.shape_cast %173 : vector<1x128x128xbf16> to vector<128x128xbf16>
    %cst_159 = arith.constant dense<0.000000e+00> : vector<288x128xf32>
    %175 = tpu.matmul %172, %174, %cst_159 {dimension_numbers = #tpu.dot_dimension_numbers<[1], [0], [0], [1], [0, 0, 1, 1], [], []>} : vector<288x128xbf16>, vector<128x128xbf16>, vector<288x128xf32> -> vector<288x128xf32>
    %176 = arith.addf %170, %175 : vector<288x128xf32>
    %c36_160 = arith.constant 36 : index
    %c0_161 = arith.constant 0 : index
    %177 = vector.load %arg10[%c36_160, %c0_161] : memref<342x128xf32, #tpu.memory_space<vmem>>, vector<288x128xf32>
    %178 = arith.truncf %177 : vector<288x128xf32> to vector<288x128xbf16>
    %c6_162 = arith.constant 6 : index
    %c0_163 = arith.constant 0 : index
    %c0_164 = arith.constant 0 : index
    %179 = vector.load %arg6[%c6_162, %c0_163, %c0_164] : memref<9x128x128xbf16, #tpu.memory_space<vmem>>, vector<1x128x128xbf16>
    %180 = vector.shape_cast %179 : vector<1x128x128xbf16> to vector<128x128xbf16>
    %cst_165 = arith.constant dense<0.000000e+00> : vector<288x128xf32>
    %181 = tpu.matmul %178, %180, %cst_165 {dimension_numbers = #tpu.dot_dimension_numbers<[1], [0], [0], [1], [0, 0, 1, 1], [], []>} : vector<288x128xbf16>, vector<128x128xbf16>, vector<288x128xf32> -> vector<288x128xf32>
    %182 = arith.addf %176, %181 : vector<288x128xf32>
    %c37_166 = arith.constant 37 : index
    %c0_167 = arith.constant 0 : index
    %183 = vector.load %arg10[%c37_166, %c0_167] : memref<342x128xf32, #tpu.memory_space<vmem>>, vector<288x128xf32>
    %184 = arith.truncf %183 : vector<288x128xf32> to vector<288x128xbf16>
    %c7_168 = arith.constant 7 : index
    %c0_169 = arith.constant 0 : index
    %c0_170 = arith.constant 0 : index
    %185 = vector.load %arg6[%c7_168, %c0_169, %c0_170] : memref<9x128x128xbf16, #tpu.memory_space<vmem>>, vector<1x128x128xbf16>
    %186 = vector.shape_cast %185 : vector<1x128x128xbf16> to vector<128x128xbf16>
    %cst_171 = arith.constant dense<0.000000e+00> : vector<288x128xf32>
    %187 = tpu.matmul %184, %186, %cst_171 {dimension_numbers = #tpu.dot_dimension_numbers<[1], [0], [0], [1], [0, 0, 1, 1], [], []>} : vector<288x128xbf16>, vector<128x128xbf16>, vector<288x128xf32> -> vector<288x128xf32>
    %188 = arith.addf %182, %187 : vector<288x128xf32>
    %c38_172 = arith.constant 38 : index
    %c0_173 = arith.constant 0 : index
    %189 = vector.load %arg10[%c38_172, %c0_173] : memref<342x128xf32, #tpu.memory_space<vmem>>, vector<288x128xf32>
    %190 = arith.truncf %189 : vector<288x128xf32> to vector<288x128xbf16>
    %c8_174 = arith.constant 8 : index
    %c0_175 = arith.constant 0 : index
    %c0_176 = arith.constant 0 : index
    %191 = vector.load %arg6[%c8_174, %c0_175, %c0_176] : memref<9x128x128xbf16, #tpu.memory_space<vmem>>, vector<1x128x128xbf16>
    %192 = vector.shape_cast %191 : vector<1x128x128xbf16> to vector<128x128xbf16>
    %cst_177 = arith.constant dense<0.000000e+00> : vector<288x128xf32>
    %193 = tpu.matmul %190, %192, %cst_177 {dimension_numbers = #tpu.dot_dimension_numbers<[1], [0], [0], [1], [0, 0, 1, 1], [], []>} : vector<288x128xbf16>, vector<128x128xbf16>, vector<288x128xf32> -> vector<288x128xf32>
    %194 = arith.addf %188, %193 : vector<288x128xf32>
    %c0_178 = arith.constant 0 : index
    %c0_179 = arith.constant 0 : index
    %195 = vector.load %arg7[%c0_178, %c0_179] : memref<1x128xf32, #tpu.memory_space<vmem>>, vector<1x128xf32>
    %196 = vector.broadcast %195 : vector<1x128xf32> to vector<288x128xf32>
    %197 = arith.addf %194, %196 : vector<288x128xf32>
    %cst_180 = arith.constant 0.000000e+00 : f32
    %198 = vector.broadcast %cst_180 : f32 to vector<288x128xf32>
    %199 = arith.maximumf %197, %198 : vector<288x128xf32>
    %c0_181 = arith.constant 0 : index
    %c0_182 = arith.constant 0 : index
    %200 = vector.load %arg8[%c0_181, %c0_182] : memref<288x1xf32, #tpu.memory_space<vmem>>, vector<288x1xf32>
    %201 = vector.broadcast %200 : vector<288x1xf32> to vector<288x128xf32>
    %202 = arith.mulf %199, %201 : vector<288x128xf32>
    %c0_183 = arith.constant 0 : index
    %c0_184 = arith.constant 0 : index
    %c0_185 = arith.constant 0 : index
    %203 = vector.load %arg9[%c0_183, %c0_184, %c0_185] : memref<1x288x128xf32, #tpu.memory_space<vmem>>, vector<1x288x128xf32>
    %204 = vector.shape_cast %203 : vector<1x288x128xf32> to vector<288x128xf32>
    %205 = vector.shape_cast %202 : vector<288x128xf32> to vector<1x288x128xf32>
    tpu.vector_store %arg9[%c0_183, %c0_184, %c0_185], %205 {strides = array<i32>} : memref<1x288x128xf32, #tpu.memory_space<vmem>>, vector<1x288x128xf32>,
    return
  }
  func.func @transform_0(%arg0: i32) -> (i32, i32, i32) {
    %c0_i32 = arith.constant 0 : i32
    %c0_i32_0 = arith.constant 0 : i32
    %c0_i32_1 = arith.constant 0 : i32
    return %arg0, %c0_i32, %c0_i32_0 : i32, i32, i32
  }
  func.func @transform_1(%arg0: i32) -> (i32, i32, i32) {
    %c0_i32 = arith.constant 0 : i32
    %c0_i32_0 = arith.constant 0 : i32
    %c0_i32_1 = arith.constant 0 : i32
    return %arg0, %c0_i32, %c0_i32_0 : i32, i32, i32
  }
  func.func @transform_2(%arg0: i32) -> (i32, i32, i32) {
    %c0_i32 = arith.constant 0 : i32
    %c0_i32_0 = arith.constant 0 : i32
    %c0_i32_1 = arith.constant 0 : i32
    %c0_i32_2 = arith.constant 0 : i32
    return %c0_i32, %c0_i32_0, %c0_i32_1 : i32, i32, i32
  }
  func.func @transform_3(%arg0: i32) -> (i32, i32, i32) {
    %c0_i32 = arith.constant 0 : i32
    %c0_i32_0 = arith.constant 0 : i32
    %c0_i32_1 = arith.constant 0 : i32
    %c0_i32_2 = arith.constant 0 : i32
    return %c0_i32, %c0_i32_0, %c0_i32_1 : i32, i32, i32
  }
  func.func @transform_4(%arg0: i32) -> (i32, i32) {
    %c0_i32 = arith.constant 0 : i32
    %c0_i32_0 = arith.constant 0 : i32
    %c0_i32_1 = arith.constant 0 : i32
    return %c0_i32, %c0_i32_0 : i32, i32
  }
  func.func @transform_5(%arg0: i32) -> (i32, i32, i32) {
    %c0_i32 = arith.constant 0 : i32
    %c0_i32_0 = arith.constant 0 : i32
    %c0_i32_1 = arith.constant 0 : i32
    %c0_i32_2 = arith.constant 0 : i32
    return %c0_i32, %c0_i32_0, %c0_i32_1 : i32, i32, i32
  }
  func.func @transform_6(%arg0: i32) -> (i32, i32) {
    %c0_i32 = arith.constant 0 : i32
    %c0_i32_0 = arith.constant 0 : i32
    %c0_i32_1 = arith.constant 0 : i32
    return %c0_i32, %c0_i32_0 : i32, i32
  }
  func.func @transform_7(%arg0: i32) -> (i32, i32) {
    %c0_i32 = arith.constant 0 : i32
    %c0_i32_0 = arith.constant 0 : i32
    %c0_i32_1 = arith.constant 0 : i32
    return %c0_i32, %c0_i32_0 : i32, i32
  }
  func.func @transform_8(%arg0: i32) -> (i32, i32, i32) {
    %c0_i32 = arith.constant 0 : i32
    %c0_i32_0 = arith.constant 0 : i32
    %c0_i32_1 = arith.constant 0 : i32
    return %arg0, %c0_i32, %c0_i32_0 : i32, i32, i32
  }
}

</mosaic_0001>

<bundles_post_ra>
// kernel: tile.8
= control target key start
LH: loop header
LB: loop body
LE: loop exit
PB: predicated region body
PF: predicated region fallthrough
CT: control target
= control target key end

     0   :  { %s22_s0 = inlined_call_operand.vmem [shape: f32[2], index: 0, kind: input, shape index: {}]   ;;  %s23_s1 = inlined_call_operand.vmem [shape: f32[4,2], index: 1, kind: output, shape index: {}]  }
   0x1   :  { %v4_v0 = vld [vmem:[%s22_s0] ss:$0 sm:$0xff] }
   0x2   :  { %5 = vst [vmem:[%s23_s1] sm:$0xf] %v4_v0 }

// kernel: tile.9
= control target key start
LH: loop header
LB: loop body
LE: loop exit
PB: predicated region body
PF: predicated region fallthrough
CT: control target
= control target key end

     0   :  { %vm7_vm0 = vcmask 15360   ;;  %s37_s8 = smov 2   ;;  %s38_s9 = smov 4   ;;  %vm13_vm1 = vcmask 64560   ;;  %vm19_vm2 = vcmask 48160   ;;  %vm25_vm3 = vcmask 31760   ;;  %s55_s0 = inlined_call_operand.vmem [shape: f32[4,2], index: 0, kind: input, shape index: {}]   ;;  %s56_s1 = inlined_call_operand.vmem [shape: f32[1,8], index: 1, kind: output, shape index: {}]  }
   0x1   :  { %v4_v0 = vld [vmem:[%s55_s0] sm:$0xf]  ;;  %s36_s0 = smov 6  }
   0x2   :  { %5 = vst [vmem:[#allocation1] sm:$0xf] %v4_v0 }
   0x9   :  { %v10_v1 = vld [vmem:[#allocation1 + $0x3] sm:$0x1]   ;;  %v22_v2 = vld [vmem:[#allocation1 + $0x1] sm:$0x1]   ;;  %v6_v3 = vld [vmem:[#allocation1] sm:$0x1]  }
   0xa   :  { %11 = vrot.lane.b32.xlu0 %v10_v1, %s36_s0  ;;  %23 = vrot.lane.b32.xlu1 %v22_v2, %s37_s8  ;;  %v16_v4 = vld [vmem:[#allocation1 + $0x2] sm:$0x1]   ;;  %8 = vst.msk [vmem:[#allocation0] sm:$0x1] %vm7_vm0, %v6_v3  }
   0xe   :  { %17 = vrot.lane.b32.xlu0 %v16_v4, %s38_s9 }
  0x7c   :  { %v12_v5 = vpop.permute.xlu0 %11   ;;  %v24_v6 = vpop.permute.xlu1 %23  }
  0x7d   :  { %14 = vst.msk [vmem:[#allocation0] sm:$0x1] %vm13_vm1, %v12_v5  }
  0x80   :  { %v18_v7 = vpop.permute.xlu0 %17  }
  0x81   :  { %20 = vst.msk [vmem:[#allocation0] sm:$0x1] %vm19_vm2, %v18_v7  }
  0x82   :  { %26 = vst.msk [vmem:[#allocation0] sm:$0x1] %vm25_vm3, %v24_v6  }
  0x89   :  { %v30_v8 = vld [vmem:[#allocation0] sm:$0x1] }
  0x8a   :  { %32 = vst [vmem:[%s56_s1] sm:$0x1] %v30_v8 }

// kernel: upsample_forward.2
= control target key start
LH: loop header
LB: loop body
LE: loop exit
PB: predicated region body
PF: predicated region fallthrough
CT: control target
= control target key end

     0   :  { %s529_s12 = smov 0   ;;  %s583_s0 = inlined_call_operand.vmem [shape: bf16[2,64,128], index: 0, kind: input, shape index: {}]   ;;  %s584_s1 = inlined_call_operand.vmem [shape: bf16[128,128], index: 1, kind: input, shape index: {}]   ;;  %s585_s2 = inlined_call_operand.vmem [shape: f32[1,128], index: 2, kind: input, shape index: {}]   ;;  %s586_s3 = inlined_call_operand.vmem [shape: f32[2,64,128], index: 3, kind: output, shape index: {}]  }
   0x1 LB: > { %s403_s13 = sadd.s32 4294967295, %s507_s12   ;;  %p407_p0 = scmp.ge.s32.totalorder %s507_s12, 1  ;;  %s507_s12 = sphi %s529_s12, %s13_s12  }
   0x2   : > { %p137_p1 = scmp.lt.s32.totalorder %s507_s12, 3 }
   0x4   : > { %p138_p2 = pnand %p407_p0, %p137_p1 }
   0x5   : > { %v489_v0 = vld [vmem:[%s584_s1] sm:$0xff] (!%p138_p2)   ;;  %p161_p3 = scmp.lt.s32.totalorder (!%p138_p2), %s403_s13, 1  ;;  %v490_v1 = vld [vmem:[%s584_s1 + $0x8] sm:$0xff] (!%p138_p2)   ;;  %v491_v2 = vld [vmem:[%s584_s1 + $0x10] sm:$0xff] (!%p138_p2)  }
   0x6   : > { %141 = sbr.rel (%p138_p2) target bundleno = 256 (0x100), region = 32  ;;  %441 = vmatprep.subr.bf16.mxu0 (!%p138_p2), %v489_v0  ;;  %465 = vmatprep.subr.bf16.mxu1 (!%p138_p2), %v489_v0  ;;  %v492_v3 = vld [vmem:[%s584_s1 + $0x18] sm:$0xff] (!%p138_p2)   ;;  %v493_v6 = vld [vmem:[%s584_s1 + $0x20] sm:$0xff] (!%p138_p2)   ;;  %v494_v7 = vld [vmem:[%s584_s1 + $0x28] sm:$0xff] (!%p138_p2)  }
   0x7   : > { %442 = vmatpush3.bf16.msra.mxu0 (!%p138_p2), %v489_v0  ;;  %473 = vmatpush3.bf16.msra.mxu1 (!%p138_p2), %v489_v0  ;;  %v495_v8 = vld [vmem:[%s584_s1 + $0x30] sm:$0xff] (!%p138_p2)   ;;  %v496_v9 = vld [vmem:[%s584_s1 + $0x38] sm:$0xff] (!%p138_p2)   ;;  %v412_v12 = vld [vmem:[%s585_s2] ss:$0 sm:$0xff] (!%p138_p2) }
   0x8   : > { %443 = vmatprep.subr.bf16.mxu0 (!%p138_p2), %v490_v1  ;;  %466 = vmatprep.subr.bf16.mxu1 (!%p138_p2), %v490_v1 }
   0xb   : > { %444 = vmatpush3.bf16.msra.mxu0 (!%p138_p2), %v490_v1  ;;  %474 = vmatpush3.bf16.msra.mxu1 (!%p138_p2), %v490_v1 }
   0xc   : > { %445 = vmatprep.subr.bf16.mxu0 (!%p138_p2), %v491_v2  ;;  %467 = vmatprep.subr.bf16.mxu1 (!%p138_p2), %v491_v2 }
   0xd   : > { %s588_s13 = smov (!%p161_p3, %s403_s13), 1 }
   0xe   : > { %s427_s20 = sshll.u32 %s588_s13, 5  ;;  %s428_s7 = sshll.u32 %s588_s13, 6 }
   0xf   : > { %s552_s23 = scalar_lea.vmem %s583_s0, %s427_s20  ;;  %446 = vmatpush3.bf16.msra.mxu0 %v491_v2  ;;  %475 = vmatpush3.bf16.msra.mxu1 %v491_v2  ;;  %s170_s14 = scalar_lea.vmem %s586_s3, %s428_s7 }
  0x10   : > { %v497_v4 = vld [vmem:[%s552_s23] sm:$0xff]   ;;  %v498_v5 = vld [vmem:[%s552_s23 + $0x10] sm:$0xff]   ;;  %447 = vmatprep.subr.bf16.mxu0 %v492_v3  ;;  %468 = vmatprep.subr.bf16.mxu1 %v492_v3  ;;  %v499_v10 = vld [vmem:[%s552_s23 + $0x8] sm:$0xff]  }
  0x11   : > { %457 = vmatprep.mubr.bf16.mxu0 %v497_v4  ;;  %461 = vmatprep.mubr.bf16.mxu1 %v498_v5  ;;  %v500_v11 = vld [vmem:[%s552_s23 + $0x18] sm:$0xff]  }
  0x13   : > { %448 = vmatpush3.bf16.msra.mxu0 %v492_v3  ;;  %476 = vmatpush3.bf16.msra.mxu1 %v492_v3 }
  0x14   : > { %449 = vmatprep.subr.bf16.mxu0 %v493_v6  ;;  %469 = vmatprep.subr.bf16.mxu1 %v493_v6 }
  0x17   : > { %450 = vmatpush3.bf16.msra.mxu0 %v493_v6  ;;  %477 = vmatpush3.bf16.msra.mxu1 %v493_v6 }
  0x18   : > { %451 = vmatprep.subr.bf16.mxu0 %v494_v7  ;;  %470 = vmatprep.subr.bf16.mxu1 %v494_v7 }
  0x1b   : > { %452 = vmatpush3.bf16.msra.mxu0 %v494_v7  ;;  %478 = vmatpush3.bf16.msra.mxu1 %v494_v7 }
  0x1c   : > { %453 = vmatprep.subr.bf16.mxu0 %v495_v8  ;;  %471 = vmatprep.subr.bf16.mxu1 %v495_v8 }
  0x1f   : > { %454 = vmatpush3.bf16.msra.mxu0 %v495_v8  ;;  %479 = vmatpush3.bf16.msra.mxu1 %v495_v8 }
  0x20   : > { %455 = vmatprep.subr.bf16.mxu0 %v496_v9  ;;  %472 = vmatprep.subr.bf16.mxu1 %v496_v9 }
  0x23   : > { %456 = vmatpush3.bf16.msra.mxu0 %v496_v9  ;;  %480 = vmatpush3.bf16.msra.mxu1 %v496_v9 }
  0x26   : > { %458 = vmatmul.mubr.bf16.vlgmr.msra.gmra.mrb[0].mxu0 %v499_v10  ;;  %462 = vmatmul.mubr.bf16.vlgmr.msra.gmra.mrb[0].mxu1 %v500_v11 }
  0xf9   : > { %v459_v13 = vpop.f32.mrb[0].mxu0  ;;  %v463_v14 = vpop.f32.mrb[0].mxu1 }
  0xfa   : > { %v318_v15 = vadd.f32 %v459_v13, %v412_v12  ;;  %v334_v16 = vadd.f32 %v463_v14, %v412_v12  ;;  %v309_v17 = vpop.f32.mrb[1].mxu0  ;;  %v325_v18 = vpop.f32.mrb[1].mxu1 }
  0xfb   : > { %v310_v19 = vadd.f32 %v412_v12, %v309_v17  ;;  %v326_v20 = vadd.f32 %v412_v12, %v325_v18  ;;  %v460_v21 = vpop.f32.mrb[2].mxu0  ;;  %v464_v22 = vpop.f32.mrb[2].mxu1 }
  0xfc   : > { %342 = vst [vmem:[%s170_s14 + $0x10] sm:$0xff] %v318_v15  ;;  %346 = vst [vmem:[%s170_s14 + $0x30] sm:$0xff] %v334_v16  ;;  %v321_v23 = vadd.f32 %v460_v21, %v412_v12  ;;  %v337_v24 = vadd.f32 %v464_v22, %v412_v12  ;;  %v312_v25 = vpop.f32.mrb[3].mxu0  ;;  %v328_v26 = vpop.f32.mrb[3].mxu1 }
  0xfd   : > { %340 = vst [vmem:[%s170_s14] sm:$0xff] %v310_v19  ;;  %344 = vst [vmem:[%s170_s14 + $0x20] sm:$0xff] %v326_v20  ;;  %v313_v27 = vadd.f32 %v412_v12, %v312_v25  ;;  %v329_v28 = vadd.f32 %v412_v12, %v328_v26 }
  0xfe   : > { %343 = vst [vmem:[%s170_s14 + $0x18] sm:$0xff] %v321_v23  ;;  %347 = vst [vmem:[%s170_s14 + $0x38] sm:$0xff] %v337_v24 }
  0xff   : > { %341 = vst [vmem:[%s170_s14 + $0x8] sm:$0xff] %v313_v27  ;;  %345 = vst [vmem:[%s170_s14 + $0x28] sm:$0xff] %v329_v28 }
 0x100 PF: > { %s13_s12 = sadd.s32 1, %s507_s12  }
 0x101   : > { %p10_p4 = scmp.ge.s32.totalorder %s13_s12, 4  }
 0x103   :  { %12 = sbr.rel (!%p10_p4) target bundleno = 1 (0x1), region = 62 }

// kernel: upsample_forward.3
= control target key start
LH: loop header
LB: loop body
LE: loop exit
PB: predicated region body
PF: predicated region fallthrough
CT: control target
= control target key end

     0   :  { %s13881_s27 = smov 0   ;;  %s16045_s0 = inlined_call_operand.vmem [shape: f32[2,342,128], index: 0, kind: input, shape index: {}]   ;;  %s16046_s1 = inlined_call_operand.vmem [shape: f32[2,342,128], index: 1, kind: input, shape index: {}]   ;;  %s16047_s2 = inlined_call_operand.vmem [shape: bf16[9,128,128], index: 2, kind: input, shape index: {}]   ;;  %s16048_s3 = inlined_call_operand.vmem [shape: bf16[9,128,128], index: 3, kind: input, shape index: {}]   ;;  %s16049_s4 = inlined_call_operand.vmem [shape: f32[1,128], index: 4, kind: input, shape index: {}]   ;;  %s16050_s5 = inlined_call_operand.vmem [shape: bf16[9,128,128], index: 5, kind: input, shape index: {}]   ;;  %s16051_s6 = inlined_call_operand.vmem [shape: f32[1,128], index: 6, kind: input, shape index: {}]   ;;  %s16052_s7 = inlined_call_operand.vmem [shape: f32[288,1], index: 7, kind: input, shape index: {}]   ;;  %s16053_s8 = inlined_call_operand.vmem [shape: f32[2,288,128], index: 8, kind: output, shape index: {}]  }
   0x1 LB: > { %s9953_s28 = sadd.s32 4294967295, %s13831_s27   ;;  %p9957_p0 = scmp.ge.s32.totalorder %s13831_s27, 1  ;;  %s13831_s27 = sphi %s13881_s27, %s18_s27  }
   0x2   : > { %p272_p1 = scmp.lt.s32.totalorder %s13831_s27, 3 }
   0x4   : > { %p273_p2 = pnand %p9957_p0, %p272_p1 }
   0x6   : > { %276 = sbr.rel (%p273_p2) target bundleno = 2037 (0x7f5), region = 52 }
   0xd   : > { %v13601_v0 = vld [vmem:[%s16047_s2 + $0x80] sm:$0xff]   ;;  %p311_p3 = scmp.lt.s32.totalorder %s9953_s28, 1  ;;  %v13602_v1 = vld [vmem:[%s16047_s2 + $0x88] sm:$0xff]   ;;  %v13603_v2 = vld [vmem:[%s16047_s2 + $0x90] sm:$0xff]  }
   0xe   : > { %11475 = vmatprep.subr.bf16.mxu0 %v13601_v0  ;;  %v13604_v3 = vld [vmem:[%s16047_s2 + $0x98] sm:$0xff]   ;;  %v13605_v7 = vld [vmem:[%s16047_s2 + $0xa0] sm:$0xff]   ;;  %v13606_v8 = vld [vmem:[%s16047_s2 + $0xa8] sm:$0xff]  }
   0xf   : > { %s16093_s28 = smov (!%p311_p3, %s9953_s28), 1  ;;  %11476 = vmatpush3.bf16.msra.mxu0 %v13601_v0  ;;  %v13607_v9 = vld [vmem:[%s16047_s2 + $0xb0] sm:$0xff]   ;;  %v13608_v10 = vld [vmem:[%s16047_s2 + $0xb8] sm:$0xff]   ;;  %v13609_v13 = vld [vmem:[%s16048_s3 + $0x80] sm:$0xff]  }
  0x10   : > { %11477 = vmatprep.subr.bf16.mxu0 %v13602_v1  ;;  %s13587_s13 = smul.u32 344, %s16093_s28  ;;  %v13610_v18 = vld [vmem:[%s16048_s3 + $0x88] sm:$0xff]   ;;  %v13611_v21 = vld [vmem:[%s16048_s3 + $0x90] sm:$0xff]   ;;  %v13612_v26 = vld [vmem:[%s16048_s3 + $0x98] sm:$0xff]  }
  0x11   : > { %v13613_v29 = vld [vmem:[%s16048_s3 + $0xa0] sm:$0xff]   ;;  %v13614_v34 = vld [vmem:[%s16048_s3 + $0xa8] sm:$0xff]   ;;  %v13615_v37 = vld [vmem:[%s16048_s3 + $0xb0] sm:$0xff]  }
  0x12   : > { %s13906_s16 = scalar_lea.vmem %s16045_s0, %s13587_s13  ;;  %s13976_s23 = scalar_lea.vmem %s16046_s1, %s13587_s13  ;;  %v13616_v41 = vld [vmem:[%s16048_s3 + $0xb8] sm:$0xff]   ;;  %v13617_v45 = vld [vmem:[%s16047_s2 + $0xc0] sm:$0xff]   ;;  %v13618_v49 = vld [vmem:[%s16047_s2 + $0xc8] sm:$0xff]  }
  0x13   : > { %11478 = vmatpush3.bf16.msra.mxu0 %v13602_v1  ;;  %v1581_v4 = vld [vmem:[%s13906_s16 + $0x2] sm:$0xff]  ;;  %v1582_v5 = vld [vmem:[%s13906_s16 + $0xa] sm:$0xff]  ;;  %v1583_v11 = vld [vmem:[%s13906_s16 + $0x12] sm:$0xff] }
  0x14   : > { %11479 = vmatprep.subr.bf16.mxu0 %v13603_v2  ;;  %v1617_v6 = vpack.c.bf16 %v1582_v5, %v1581_v4  ;;  %v1584_v12 = vld [vmem:[%s13906_s16 + $0x1a] sm:$0xff]  ;;  %v1585_v14 = vld [vmem:[%s13906_s16 + $0x22] sm:$0xff]  ;;  %v1586_v15 = vld [vmem:[%s13906_s16 + $0x2a] sm:$0xff] }
  0x15   : > { %v13932_v16 = vpack.c.bf16 %v1584_v12, %v1583_v11  ;;  %v13934_v17 = vpack.c.bf16 %v1586_v15, %v1585_v14  ;;  %v1587_v19 = vld [vmem:[%s13906_s16 + $0x32] sm:$0xff]  ;;  %v1588_v20 = vld [vmem:[%s13906_s16 + $0x3a] sm:$0xff]  ;;  %v1589_v22 = vld [vmem:[%s13906_s16 + $0x42] sm:$0xff] }
  0x16   : > { %11491 = vmatprep.mubr.bf16.mxu0 %v1617_v6  ;;  %v1590_v23 = vld [vmem:[%s13906_s16 + $0x4a] sm:$0xff]  ;;  %v13948_v24 = vpack.c.bf16 %v1588_v20, %v1587_v19  ;;  %v1591_v27 = vld [vmem:[%s13906_s16 + $0x52] sm:$0xff]  ;;  %v1592_v28 = vld [vmem:[%s13906_s16 + $0x5a] sm:$0xff] }
  0x17   : > { %11480 = vmatpush3.bf16.msra.mxu0 %v13603_v2  ;;  %v13950_v25 = vpack.c.bf16 %v1590_v23, %v1589_v22  ;;  %v1593_v30 = vld [vmem:[%s13906_s16 + $0x62] sm:$0xff]  ;;  %v1594_v31 = vld [vmem:[%s13906_s16 + $0x6a] sm:$0xff]  ;;  %v13964_v32 = vpack.c.bf16 %v1592_v28, %v1591_v27  ;;  %v1595_v35 = vld [vmem:[%s13906_s16 + $0x72] sm:$0xff] }
  0x18   : > { %11481 = vmatprep.subr.bf16.mxu0 %v13604_v3  ;;  %v13966_v33 = vpack.c.bf16 %v1594_v31, %v1593_v30  ;;  %v1596_v36 = vld [vmem:[%s13906_s16 + $0x7a] sm:$0xff]  ;;  %v1913_v38 = vld [vmem:[%s13976_s23 + $0x2] sm:$0xff]  ;;  %v1914_v39 = vld [vmem:[%s13976_s23 + $0xa] sm:$0xff] }
  0x19   : > { %v13987_v40 = vpack.c.bf16 %v1596_v36, %v1595_v35  ;;  %v1949_v42 = vpack.c.bf16 %v1914_v39, %v1913_v38  ;;  %v1915_v43 = vld [vmem:[%s13976_s23 + $0x12] sm:$0xff]  ;;  %v1916_v44 = vld [vmem:[%s13976_s23 + $0x1a] sm:$0xff]  ;;  %v1917_v46 = vld [vmem:[%s13976_s23 + $0x22] sm:$0xff] }
  0x1a   : > { %v1918_v47 = vld [vmem:[%s13976_s23 + $0x2a] sm:$0xff]  ;;  %v14000_v48 = vpack.c.bf16 %v1916_v44, %v1915_v43  ;;  %v1919_v51 = vld [vmem:[%s13976_s23 + $0x32] sm:$0xff]  ;;  %v1920_v52 = vld [vmem:[%s13976_s23 + $0x3a] sm:$0xff] }
  0x1b   : > { %11482 = vmatpush3.bf16.msra.mxu0 %v13604_v3  ;;  %v14005_v50 = vpack.c.bf16 %v1918_v47, %v1917_v46  ;;  %v1921_v53 = vld [vmem:[%s13976_s23 + $0x42] sm:$0xff]  ;;  %v1922_v54 = vld [vmem:[%s13976_s23 + $0x4a] sm:$0xff]  ;;  %v14016_v56 = vpack.c.bf16 %v1920_v52, %v1919_v51  ;;  %v13620_v57 = vld [vmem:[%s16047_s2 + $0xd8] sm:$0xff]  }
  0x1c   : > { %11483 = vmatprep.subr.bf16.mxu0 %v13605_v7  ;;  %v13619_v55 = vld [vmem:[%s16047_s2 + $0xd0] sm:$0xff]   ;;  %v14021_v58 = vpack.c.bf16 %v1922_v54, %v1921_v53  ;;  %v1924_v60 = vld [vmem:[%s13976_s23 + $0x5a] sm:$0xff]  ;;  %v1925_v61 = vld [vmem:[%s13976_s23 + $0x62] sm:$0xff] }
  0x1d   : > { %v1923_v59 = vld [vmem:[%s13976_s23 + $0x52] sm:$0xff]  ;;  %v1926_v62 = vld [vmem:[%s13976_s23 + $0x6a] sm:$0xff]  ;;  %v13621_v63 = vld [vmem:[%s16047_s2 + $0xe0] sm:$0xff]  }
  0x1e   : > { %v14032_v0 = vpack.c.bf16 %v1924_v60, %v1923_v59  ;;  %v13622_v1 = vld [vmem:[%s16047_s2 + $0xe8] sm:$0xff]   ;;  %v14037_v2 = vpack.c.bf16 %v1926_v62, %v1925_v61  ;;  %v1927_v3 = vld [vmem:[%s13976_s23 + $0x72] sm:$0xff]  ;;  %v1928_v4 = vld [vmem:[%s13976_s23 + $0x7a] sm:$0xff] }
  0x1f   : > { %11484 = vmatpush3.bf16.msra.mxu0 %v13605_v7  ;;  %v1929_v5 = vld [vmem:[%s13976_s23 + $0x82] sm:$0xff]  ;;  %v1930_v6 = vld [vmem:[%s13976_s23 + $0x8a] sm:$0xff]  ;;  %v1931_v11 = vld [vmem:[%s13976_s23 + $0x92] sm:$0xff] }
  0x20   : > { %11485 = vmatprep.subr.bf16.mxu0 %v13606_v8  ;;  %v13623_v7 = vld [vmem:[%s16047_s2 + $0xf0] sm:$0xff]   ;;  %v1932_v12 = vld [vmem:[%s13976_s23 + $0x9a] sm:$0xff]  ;;  %v1937_v22 = vld [vmem:[%s13976_s23 + $0xc2] sm:$0xff] }
  0x21   : > { %v1934_v14 = vld [vmem:[%s13976_s23 + $0xaa] sm:$0xff]  ;;  %v13625_v15 = vld [vmem:[%s16048_s3 + $0xc0] sm:$0xff]   ;;  %v1935_v20 = vld [vmem:[%s13976_s23 + $0xb2] sm:$0xff] }
  0x22   : > { %v1938_v23 = vld [vmem:[%s13976_s23 + $0xca] sm:$0xff]  ;;  %v1939_v28 = vld [vmem:[%s13976_s23 + $0xd2] sm:$0xff]  ;;  %v1941_v30 = vld [vmem:[%s13976_s23 + $0xe2] sm:$0xff] }
  0x23   : > { %11486 = vmatpush3.bf16.msra.mxu0 %v13606_v8  ;;  %v14048_v8 = vpack.c.bf16 %v1928_v4, %v1927_v3  ;;  %v14076_v27 = vpack.c.bf16 %v1938_v23, %v1937_v22  ;;  %v1942_v31 = vld [vmem:[%s13976_s23 + $0xea] sm:$0xff]  ;;  %v1943_v36 = vld [vmem:[%s13976_s23 + $0xf2] sm:$0xff]  ;;  %v1945_v38 = vld [vmem:[%s13976_s23 + $0x102] sm:$0xff] }
  0x24   : > { %11487 = vmatprep.subr.bf16.mxu0 %v13607_v9  ;;  %v14086_v35 = vpack.c.bf16 %v1942_v31, %v1941_v30  ;;  %v1946_v39 = vld [vmem:[%s13976_s23 + $0x10a] sm:$0xff]  ;;  %v1947_v43 = vld [vmem:[%s13976_s23 + $0x112] sm:$0xff]  ;;  %v1948_v44 = vld [vmem:[%s13976_s23 + $0x11a] sm:$0xff] }
  0x25   : > { %v13626_v46 = vld [vmem:[%s16048_s3 + $0xc8] sm:$0xff]   ;;  %v13627_v47 = vld [vmem:[%s16048_s3 + $0xd0] sm:$0xff]   ;;  %v2262_v51 = vld [vmem:[%s13906_s16 + $0x9a] sm:$0xff] }
  0x26   : > { %v13631_v52 = vld [vmem:[%s16048_s3 + $0xf0] sm:$0xff]   ;;  %v2266_v59 = vld [vmem:[%s13906_s16 + $0xba] sm:$0xff] }
  0x27   : > { %11488 = vmatpush3.bf16.msra.mxu0 %v13607_v9  ;;  %v13624_v9 = vld [vmem:[%s16047_s2 + $0xf8] sm:$0xff]   ;;  %v13633_v60 = vld [vmem:[%s16047_s2 + $0x100] sm:$0xff]   ;;  %v2280_v30 = vld [vmem:[%s13906_s16 + $0x12a] sm:$0xff] }
  0x28   : > { %11489 = vmatprep.subr.bf16.mxu0 %v13608_v10  ;;  %v2269_v3 = vld [vmem:[%s13906_s16 + $0xd2] sm:$0xff]  ;;  %v2270_v4 = vld [vmem:[%s13906_s16 + $0xda] sm:$0xff] }
  0x29   : > { %v2278_v22 = vld [vmem:[%s13906_s16 + $0x11a] sm:$0xff] }
  0x2b   : > { %11490 = vmatpush3.bf16.msra.mxu0 %v13608_v10  ;;  %v14053_v10 = vpack.c.bf16 %v1930_v6, %v1929_v5  ;;  %v2293_v6 = vpack.c.bf16 %v2270_v4, %v2269_v3  ;;  %v403_v3 = vld [vmem:[%s13976_s23 + $0x30] sm:$0xff]  ;;  %v2919_v4 = vld [vmem:[%s13906_s16 + $0x63] sm:$0xff] }
  0x2c   : > { %11527 = vmatprep.subr.bf16.mxu0 %v13609_v13 }
  0x2e   : > { %11492 = vmatmul.mubr.bf16.vlgmr.msra.gmra.mrb[0].mxu0 %v13932_v16 }
  0x2f   : > { %11528 = vmatpush3.bf16.msra.mxu0 %v13609_v13  ;;  %11495 = vmatprep.mubr.bf16.mxu0 %v13934_v17  ;;  %v1933_v13 = vld [vmem:[%s13976_s23 + $0xa2] sm:$0xff] }
  0x30   : > { %11529 = vmatprep.subr.bf16.mxu0 %v13610_v18  ;;  %v14066_v19 = vpack.c.bf16 %v1934_v14, %v1933_v13 }
  0x33   : > { %11530 = vmatpush3.bf16.msra.mxu0 %v13610_v18  ;;  %v14064_v18 = vpack.c.bf16 %v1932_v12, %v1931_v11  ;;  %v2273_v11 = vld [vmem:[%s13906_s16 + $0xf2] sm:$0xff]  ;;  %v2274_v12 = vld [vmem:[%s13906_s16 + $0xfa] sm:$0xff] }
  0x34   : > { %11531 = vmatprep.subr.bf16.mxu0 %v13611_v21  ;;  %v2295_v14 = vpack.c.bf16 %v2274_v12, %v2273_v11  ;;  %v2922_v11 = vld [vmem:[%s13906_s16 + $0x7b] sm:$0xff] }
  0x35   : > { %v13645_v12 = vld [vmem:[%s16048_s3 + $0x120] sm:$0xff]  }
  0x36   : > { %11496 = vmatmul.mubr.bf16.gmra.mrb[4].mxu0 %v13948_v24 }
  0x37   : > { %11532 = vmatpush3.bf16.msra.mxu0 %v13611_v21  ;;  %11499 = vmatprep.mubr.bf16.mxu0 %v13950_v25  ;;  %v1936_v21 = vld [vmem:[%s13976_s23 + $0xba] sm:$0xff] }
  0x38   : > { %11533 = vmatprep.subr.bf16.mxu0 %v13612_v26 }
  0x3b   : > { %11534 = vmatpush3.bf16.msra.mxu0 %v13612_v26  ;;  %v14074_v26 = vpack.c.bf16 %v1936_v21, %v1935_v20  ;;  %v2276_v20 = vld [vmem:[%s13906_s16 + $0x10a] sm:$0xff]  ;;  %v2277_v21 = vld [vmem:[%s13906_s16 + $0x112] sm:$0xff] }
  0x3c   : > { %11535 = vmatprep.subr.bf16.mxu0 %v13613_v29 }
  0x3e   : > { %11500 = vmatmul.mubr.bf16.gmra.mrb[8].mxu0 %v13964_v32 }
  0x3f   : > { %11536 = vmatpush3.bf16.msra.mxu0 %v13613_v29  ;;  %11503 = vmatprep.mubr.bf16.mxu0 %v13966_v33  ;;  %v1940_v29 = vld [vmem:[%s13976_s23 + $0xda] sm:$0xff] }
  0x40   : > { %11537 = vmatprep.subr.bf16.mxu0 %v13614_v34 }
  0x43   : > { %11538 = vmatpush3.bf16.msra.mxu0 %v13614_v34  ;;  %v14084_v34 = vpack.c.bf16 %v1940_v29, %v1939_v28  ;;  %v2297_v28 = vpack.c.bf16 %v2278_v22, %v2277_v21  ;;  %v2279_v29 = vld [vmem:[%s13906_s16 + $0x122] sm:$0xff]  ;;  %v2924_v22 = vld [vmem:[%s13906_s16 + $0x8b] sm:$0xff] }
  0x44   : > { %11539 = vmatprep.subr.bf16.mxu0 %v13615_v37  ;;  %v2298_v31 = vpack.c.bf16 %v2280_v30, %v2279_v29  ;;  %v2923_v21 = vld [vmem:[%s13906_s16 + $0x83] sm:$0xff]  ;;  %v407_v30 = vld [vmem:[%s13976_s23 + $0x50] sm:$0xff] }
  0x45   : > { %v406_v29 = vld [vmem:[%s13976_s23 + $0x48] sm:$0xff] }
  0x46   : > { %11504 = vmatmul.mubr.bf16.gmra.mrb[12].mxu0 %v13987_v40 }
  0x47   : > { %11540 = vmatpush3.bf16.msra.mxu0 %v13615_v37  ;;  %11543 = vmatprep.mubr.bf16.mxu0 %v1949_v42  ;;  %v1944_v37 = vld [vmem:[%s13976_s23 + $0xfa] sm:$0xff]  ;;  %v14096_v42 = vpack.c.bf16 %v1946_v39, %v1945_v38 }
  0x48   : > { %11541 = vmatprep.subr.bf16.mxu0 %v13616_v41  ;;  %v2910_v38 = vld [vmem:[%s13906_s16 + $0x1b] sm:$0xff] }
  0x4b   : > { %11542 = vmatpush3.bf16.msra.mxu0 %v13616_v41  ;;  %v14094_v41 = vpack.c.bf16 %v1944_v37, %v1943_v36  ;;  %v13634_v36 = vld [vmem:[%s16047_s2 + $0x108] sm:$0xff]   ;;  %v13635_v37 = vld [vmem:[%s16047_s2 + $0x110] sm:$0xff]  }
  0x4c   : > { %11579 = vmatprep.subr.bf16.mxu0 %v13617_v45 }
  0x4e   : > { %11544 = vmatmul.mubr.bf16.vlgmr.msra.gmra.mrb[0].mxu0 %v14000_v48 }
  0x4f   : > { %11580 = vmatpush3.bf16.msra.mxu0 %v13617_v45  ;;  %11547 = vmatprep.mubr.bf16.mxu0 %v14005_v50  ;;  %v14102_v45 = vpack.c.bf16 %v1948_v44, %v1947_v43  ;;  %v13661_v43 = vld [vmem:[%s16048_s3 + $0x30] sm:$0xff]   ;;  %v2911_v44 = vld [vmem:[%s13906_s16 + $0x23] sm:$0xff] }
  0x50   : > { %11581 = vmatprep.subr.bf16.mxu0 %v13618_v49 }
  0x53   : > { %11582 = vmatpush3.bf16.msra.mxu0 %v13618_v49  ;;  %v2259_v49 = vld [vmem:[%s13906_s16 + $0x82] sm:$0xff] }
  0x54   : > { %11583 = vmatprep.subr.bf16.mxu0 %v13619_v55 }
  0x56   : > { %11548 = vmatmul.mubr.bf16.gmra.mrb[4].mxu0 %v14016_v56 }
  0x57   : > { %11551 = vmatprep.mubr.bf16.mxu0 %v14021_v58  ;;  %11584 = vmatpush3.bf16.msra.mxu0 %v13619_v55  ;;  %v2264_v55 = vld [vmem:[%s13906_s16 + $0xaa] sm:$0xff] }
  0x58   : > { %11585 = vmatprep.subr.bf16.mxu0 %v13620_v57 }
  0x5b   : > { %11586 = vmatpush3.bf16.msra.mxu0 %v13620_v57  ;;  %v2265_v57 = vld [vmem:[%s13906_s16 + $0xb2] sm:$0xff] }
  0x5c   : > { %11587 = vmatprep.subr.bf16.mxu0 %v13621_v63  ;;  %v2291_v62 = vpack.c.bf16 %v2266_v59, %v2265_v57  ;;  %v13643_v57 = vld [vmem:[%s16048_s3 + $0x110] sm:$0xff]  }
  0x5e   : > { %11552 = vmatmul.mubr.bf16.gmra.mrb[8].mxu0 %v14032_v0 }
  0x5f   : > { %11555 = vmatprep.mubr.bf16.mxu0 %v14037_v2  ;;  %11588 = vmatpush3.bf16.msra.mxu0 %v13621_v63  ;;  %v2267_v63 = vld [vmem:[%s13906_s16 + $0xc2] sm:$0xff] }
  0x60   : > { %11589 = vmatprep.subr.bf16.mxu0 %v13622_v1 }
  0x63   : > { %11590 = vmatpush3.bf16.msra.mxu0 %v13622_v1  ;;  %v2268_v1 = vld [vmem:[%s13906_s16 + $0xca] sm:$0xff] }
  0x64   : > { %11591 = vmatprep.subr.bf16.mxu0 %v13623_v7  ;;  %v2292_v5 = vpack.c.bf16 %v2268_v1, %v2267_v63  ;;  %v401_v63 = vld [vmem:[%s13976_s23 + $0x20] sm:$0xff]  ;;  %v402_v1 = vld [vmem:[%s13976_s23 + $0x28] sm:$0xff] }
  0x66   : > { %11556 = vmatmul.mubr.bf16.gmra.mrb[12].mxu0 %v14048_v8 }
  0x67   : > { %11559 = vmatprep.mubr.bf16.mxu0 %v14053_v10  ;;  %11592 = vmatpush3.bf16.msra.mxu0 %v13623_v7  ;;  %v2271_v7 = vld [vmem:[%s13906_s16 + $0xe2] sm:$0xff] }
  0x68   : > { %11593 = vmatprep.subr.bf16.mxu0 %v13624_v9 }
  0x6b   : > { %11594 = vmatpush3.bf16.msra.mxu0 %v13624_v9  ;;  %v2272_v9 = vld [vmem:[%s13906_s16 + $0xea] sm:$0xff] }
  0x6c   : > { %11631 = vmatprep.subr.bf16.mxu0 %v13625_v15  ;;  %v2294_v13 = vpack.c.bf16 %v2272_v9, %v2271_v7  ;;  %v404_v7 = vld [vmem:[%s13976_s23 + $0x38] sm:$0xff] }
  0x6d   : > { %v2921_v9 = vld [vmem:[%s13906_s16 + $0x73] sm:$0xff] }
  0x6e   : > { %11560 = vmatmul.mubr.bf16.gmra.mrb[16].mxu0 %v14064_v18 }
  0x6f   : > { %11563 = vmatprep.mubr.bf16.mxu0 %v14066_v19 }
  0x76   : > { %11564 = vmatmul.mubr.bf16.gmra.mrb[20].mxu0 %v14074_v26 }
  0x77   : > { %11567 = vmatprep.mubr.bf16.mxu0 %v14076_v27 }
  0x7e   : > { %11568 = vmatmul.mubr.bf16.gmra.mrb[24].mxu0 %v14084_v34 }
  0x7f   : > { %11571 = vmatprep.mubr.bf16.mxu0 %v14086_v35 }
  0x86   : > { %11572 = vmatmul.mubr.bf16.gmra.mrb[28].mxu0 %v14094_v41 }
  0x87   : > { %11575 = vmatprep.mubr.bf16.mxu0 %v14096_v42 }
  0x8e   : > { %11576 = vmatmul.mubr.bf16.gmra.mrb[32].mxu0 %v14102_v45 }
  0x8f   : > { %11595 = vmatprep.mubr.bf16.mxu0 %v13932_v16  ;;  %v13628_v16 = vld [vmem:[%s16048_s3 + $0xd8] sm:$0xff]  }
  0x96   : > { %11596 = vmatmul.mubr.bf16.vlgmr.msra.gmra.mrb[0].mxu0 %v13934_v17  ;;  %v13629_v17 = vld [vmem:[%s16048_s3 + $0xe0] sm:$0xff]  }
  0x97   : > { %11632 = vmatpush3.bf16.msra.mxu0 %v13625_v15  ;;  %11599 = vmatprep.mubr.bf16.mxu0 %v13948_v24  ;;  %v13630_v24 = vld [vmem:[%s16048_s3 + $0xe8] sm:$0xff]  }
  0x98   : > { %11633 = vmatprep.subr.bf16.mxu0 %v13626_v46  ;;  %v2275_v15 = vld [vmem:[%s13906_s16 + $0x102] sm:$0xff] }
  0x99   : > { %v2296_v23 = vpack.c.bf16 %v2276_v20, %v2275_v15  ;;  %v2951_v15 = vpack.c.bf16 %v2922_v11, %v2921_v9  ;;  %v13646_v20 = vld [vmem:[%s16048_s3 + $0x128] sm:$0xff]   ;;  %v423_v11 = vld [vmem:[%s13976_s23 + $0xd0] sm:$0xff] }
  0x9b   : > { %11634 = vmatpush3.bf16.msra.mxu0 %v13626_v46  ;;  %v2913_v46 = vld [vmem:[%s13906_s16 + $0x33] sm:$0xff] }
  0x9c   : > { %11635 = vmatprep.subr.bf16.mxu0 %v13627_v47 }
  0x9e   : > { %11600 = vmatmul.mubr.bf16.gmra.mrb[4].mxu0 %v13950_v25  ;;  %v2260_v25 = vld [vmem:[%s13906_s16 + $0x8a] sm:$0xff] }
  0x9f   : > { %11603 = vmatprep.mubr.bf16.mxu0 %v13964_v32  ;;  %11636 = vmatpush3.bf16.msra.mxu0 %v13627_v47  ;;  %v2261_v32 = vld [vmem:[%s13906_s16 + $0x92] sm:$0xff]  ;;  %v2288_v53 = vpack.c.bf16 %v2260_v25, %v2259_v49  ;;  %v2914_v47 = vld [vmem:[%s13906_s16 + $0x3b] sm:$0xff] }
  0xa0   : > { %11637 = vmatprep.subr.bf16.mxu0 %v13628_v16  ;;  %v2289_v54 = vpack.c.bf16 %v2262_v51, %v2261_v32  ;;  %v13663_v49 = vld [vmem:[%s16048_s3 + $0x38] sm:$0xff]   ;;  %v397_v25 = vld [vmem:[%s13976_s23] sm:$0xff]  ;;  %v398_v32 = vld [vmem:[%s13976_s23 + $0x8] sm:$0xff] }
  0xa1   : > { %v399_v51 = vld [vmem:[%s13976_s23 + $0x10] sm:$0xff] }
  0xa3   : > { %11638 = vmatpush3.bf16.msra.mxu0 %v13628_v16 }
  0xa4   : > { %11639 = vmatprep.subr.bf16.mxu0 %v13629_v17 }
  0xa6   : > { %11604 = vmatmul.mubr.bf16.gmra.mrb[8].mxu0 %v13966_v33  ;;  %v13632_v33 = vld [vmem:[%s16048_s3 + $0xf8] sm:$0xff]  }
  0xa7   : > { %11607 = vmatprep.mubr.bf16.mxu0 %v13987_v40  ;;  %11640 = vmatpush3.bf16.msra.mxu0 %v13629_v17  ;;  %v2263_v40 = vld [vmem:[%s13906_s16 + $0xa2] sm:$0xff]  ;;  %v2947_v17 = vpack.c.bf16 %v2914_v47, %v2913_v46  ;;  %v2932_v46 = vld [vmem:[%s13906_s16 + $0xcb] sm:$0xff] }
  0xa8   : > { %11641 = vmatprep.subr.bf16.mxu0 %v13630_v24  ;;  %v2290_v61 = vpack.c.bf16 %v2264_v55, %v2263_v40  ;;  %v2917_v40 = vld [vmem:[%s13906_s16 + $0x53] sm:$0xff]  ;;  %v2918_v55 = vld [vmem:[%s13906_s16 + $0x5b] sm:$0xff] }
  0xab   : > { %11642 = vmatpush3.bf16.msra.mxu0 %v13630_v24  ;;  %v13642_v24 = vld [vmem:[%s16048_s3 + $0x108] sm:$0xff]  }
  0xac   : > { %11643 = vmatprep.subr.bf16.mxu0 %v13631_v52 }
  0xae   : > { %11608 = vmatmul.mubr.bf16.gmra.mrb[12].mxu0 %v2288_v53  ;;  %v2916_v53 = vld [vmem:[%s13906_s16 + $0x4b] sm:$0xff] }
  0xaf   : > { %11611 = vmatprep.mubr.bf16.mxu0 %v2289_v54  ;;  %11644 = vmatpush3.bf16.msra.mxu0 %v13631_v52  ;;  %v2915_v52 = vld [vmem:[%s13906_s16 + $0x43] sm:$0xff]  ;;  %v400_v54 = vld [vmem:[%s13976_s23 + $0x18] sm:$0xff] }
  0xb0   : > { %11645 = vmatprep.subr.bf16.mxu0 %v13632_v33  ;;  %v434_v59 = vpack.c.bf16 %v400_v54, %v399_v51  ;;  %v418_v54 = vld [vmem:[%s13976_s23 + $0xa8] sm:$0xff] }
  0xb3   : > { %11646 = vmatpush3.bf16.msra.mxu0 %v13632_v33  ;;  %v433_v33 = vpack.c.bf16 %v398_v32, %v397_v25 }
  0xb4   : > { %11683 = vmatprep.subr.bf16.mxu0 %v13633_v60 }
  0xb5   : > { %11283 = vmatprep.mubr.bf16.mxu1 %v433_v33  ;;  %v417_v33 = vld [vmem:[%s13976_s23 + $0xa0] sm:$0xff] }
  0xb6   : > { %11612 = vmatmul.mubr.bf16.gmra.mrb[16].mxu0 %v2290_v61  ;;  %v2949_v61 = vpack.c.bf16 %v2918_v55, %v2917_v40  ;;  %v443_v40 = vpack.c.bf16 %v418_v54, %v417_v33  ;;  %v419_v55 = vld [vmem:[%s13976_s23 + $0xb0] sm:$0xff]  ;;  %v3250_v33 = vld [vmem:[%s13976_s23 + $0x5b] sm:$0xff] }
  0xb7   : > { %11615 = vmatprep.mubr.bf16.mxu0 %v2291_v62  ;;  %v13644_v62 = vld [vmem:[%s16048_s3 + $0x118] sm:$0xff]   ;;  %v13651_v54 = vld [vmem:[%s16047_s2 + $0x150] sm:$0xff]  }
  0xbe   : > { %11616 = vmatmul.mubr.bf16.gmra.mrb[20].mxu0 %v2292_v5  ;;  %v2920_v5 = vld [vmem:[%s13906_s16 + $0x6b] sm:$0xff] }
  0xbf   : > { %11619 = vmatprep.mubr.bf16.mxu0 %v2293_v6  ;;  %v435_v6 = vpack.c.bf16 %v402_v1, %v401_v63 }
  0xc6   : > { %11620 = vmatmul.mubr.bf16.gmra.mrb[24].mxu0 %v2294_v13  ;;  %v436_v13 = vpack.c.bf16 %v404_v7, %v403_v3  ;;  %v2939_v3 = vld [vmem:[%s13906_s16 + $0x103] sm:$0xff] }
  0xc7   : > { %11623 = vmatprep.mubr.bf16.mxu0 %v2295_v14  ;;  %v2950_v14 = vpack.c.bf16 %v2920_v5, %v2919_v4  ;;  %v13670_v4 = vld [vmem:[%s16047_s2 + $0x8] sm:$0xff]  }
  0xc8   : > { %v2940_v5 = vld [vmem:[%s13906_s16 + $0x10b] sm:$0xff] }
  0xc9   : > { %v422_v7 = vld [vmem:[%s13976_s23 + $0xc8] sm:$0xff] }
  0xce   : > { %11624 = vmatmul.mubr.bf16.gmra.mrb[28].mxu0 %v2296_v23  ;;  %v2925_v23 = vld [vmem:[%s13906_s16 + $0x93] sm:$0xff] }
  0xcf   : > { %11627 = vmatprep.mubr.bf16.mxu0 %v2297_v28  ;;  %v405_v28 = vld [vmem:[%s13976_s23 + $0x40] sm:$0xff] }
  0xd6   : > { %11628 = vmatmul.mubr.bf16.gmra.mrb[32].mxu0 %v2298_v31  ;;  %v2926_v31 = vld [vmem:[%s13906_s16 + $0x9b] sm:$0xff] }
  0xd7   : > { %11647 = vmatprep.mubr.bf16.mxu0 %v14000_v48  ;;  %v13636_v48 = vld [vmem:[%s16047_s2 + $0x118] sm:$0xff]  }
  0xde   : > { %11648 = vmatmul.mubr.bf16.vlgmr.msra.gmra.mrb[0].mxu0 %v14005_v50  ;;  %v13637_v50 = vld [vmem:[%s16047_s2 + $0x120] sm:$0xff]  }
  0xdf   : > { %11684 = vmatpush3.bf16.msra.mxu0 %v13633_v60  ;;  %11651 = vmatprep.mubr.bf16.mxu0 %v14016_v56  ;;  %v13638_v56 = vld [vmem:[%s16047_s2 + $0x128] sm:$0xff]   ;;  %v2948_v60 = vpack.c.bf16 %v2916_v53, %v2915_v52 }
  0xe0   : > { %11685 = vmatprep.subr.bf16.mxu0 %v13634_v36  ;;  %v2935_v52 = vld [vmem:[%s13906_s16 + $0xe3] sm:$0xff]  ;;  %v2936_v53 = vld [vmem:[%s13906_s16 + $0xeb] sm:$0xff] }
  0xe1   : > { %v2958_v63 = vpack.c.bf16 %v2936_v53, %v2935_v52  ;;  %v330_v52 = vld [vmem:[%s13906_s16 + $0x18] sm:$0xff] }
  0xe2   : > { %v3249_v53 = vld [vmem:[%s13976_s23 + $0x53] sm:$0xff] }
  0xe3   : > { %11686 = vmatpush3.bf16.msra.mxu0 %v13634_v36  ;;  %v13647_v36 = vld [vmem:[%s16048_s3 + $0x130] sm:$0xff]  }
  0xe4   : > { %11687 = vmatprep.subr.bf16.mxu0 %v13635_v37 }
  0xe6   : > { %11652 = vmatmul.mubr.bf16.gmra.mrb[4].mxu0 %v14021_v58  ;;  %v13639_v58 = vld [vmem:[%s16047_s2 + $0x130] sm:$0xff]  }
  0xe7   : > { %11655 = vmatprep.mubr.bf16.mxu0 %v14032_v0  ;;  %11688 = vmatpush3.bf16.msra.mxu0 %v13635_v37  ;;  %v13640_v0 = vld [vmem:[%s16047_s2 + $0x138] sm:$0xff]   ;;  %v437_v37 = vpack.c.bf16 %v406_v29, %v405_v28  ;;  %v2944_v29 = vld [vmem:[%s13906_s16 + $0x12b] sm:$0xff] }
  0xe8   : > { %11689 = vmatprep.subr.bf16.mxu0 %v13636_v48  ;;  %v13673_v28 = vld [vmem:[%s16047_s2 + $0x18] sm:$0xff]  }
  0xeb   : > { %11690 = vmatpush3.bf16.msra.mxu0 %v13636_v48  ;;  %v408_v48 = vld [vmem:[%s13976_s23 + $0x58] sm:$0xff] }
  0xec   : > { %11691 = vmatprep.subr.bf16.mxu0 %v13637_v50 }
  0xee   : > { %11656 = vmatmul.mubr.bf16.gmra.mrb[8].mxu0 %v14037_v2  ;;  %v13641_v2 = vld [vmem:[%s16048_s3 + $0x100] sm:$0xff]  }
  0xef   : > { %11659 = vmatprep.mubr.bf16.mxu0 %v14048_v8  ;;  %11692 = vmatpush3.bf16.msra.mxu0 %v13637_v50  ;;  %v13653_v8 = vld [vmem:[%s16048_s3] sm:$0xff]   ;;  %v438_v50 = vpack.c.bf16 %v408_v48, %v407_v30  ;;  %v428_v48 = vld [vmem:[%s13976_s23 + $0xf8] sm:$0xff] }
  0xf0   : > { %11693 = vmatprep.subr.bf16.mxu0 %v13638_v56  ;;  %11267 = vmatprep.subr.bf16.mxu1 %v13653_v8  ;;  %v425_v30 = vld [vmem:[%s13976_s23 + $0xe0] sm:$0xff] }
  0xf1   : > { %11268 = vmatpush3.bf16.msra.mxu1 %v13653_v8  ;;  %v409_v8 = vld [vmem:[%s13976_s23 + $0x60] sm:$0xff] }
  0xf3   : > { %11694 = vmatpush3.bf16.msra.mxu0 %v13638_v56  ;;  %v2952_v56 = vpack.c.bf16 %v2924_v22, %v2923_v21  ;;  %v2960_v21 = vpack.c.bf16 %v2940_v5, %v2939_v3  ;;  %v334_v3 = vld [vmem:[%s13906_s16 + $0x38] sm:$0xff] }
  0xf4   : > { %11695 = vmatprep.subr.bf16.mxu0 %v13639_v58  ;;  %v3254_v5 = vld [vmem:[%s13976_s23 + $0x7b] sm:$0xff] }
  0xf6   : > { %11660 = vmatmul.mubr.bf16.gmra.mrb[12].mxu0 %v14053_v10  ;;  %v13654_v10 = vld [vmem:[%s16048_s3 + $0x8] sm:$0xff]  }
  0xf7   : > { %11663 = vmatprep.mubr.bf16.mxu0 %v14064_v18  ;;  %11696 = vmatpush3.bf16.msra.mxu0 %v13639_v58  ;;  %v13656_v18 = vld [vmem:[%s16048_s3 + $0x10] sm:$0xff]   ;;  %v2953_v58 = vpack.c.bf16 %v2926_v31, %v2925_v23  ;;  %v2943_v23 = vld [vmem:[%s13906_s16 + $0x123] sm:$0xff] }
  0xf8   : > { %11697 = vmatprep.subr.bf16.mxu0 %v13640_v0  ;;  %11269 = vmatprep.subr.bf16.mxu1 %v13654_v10  ;;  %v426_v31 = vld [vmem:[%s13976_s23 + $0xe8] sm:$0xff] }
  0xf9   : > { %11270 = vmatpush3.bf16.msra.mxu1 %v13654_v10  ;;  %v410_v10 = vld [vmem:[%s13976_s23 + $0x68] sm:$0xff] }
  0xfa   : > { %11271 = vmatprep.subr.bf16.mxu1 %v13656_v18 }
  0xfb   : > { %11698 = vmatpush3.bf16.msra.mxu0 %v13640_v0  ;;  %v13648_v0 = vld [vmem:[%s16048_s3 + $0x138] sm:$0xff]  }
  0xfc   : > { %11735 = vmatprep.subr.bf16.mxu0 %v13641_v2 }
  0xfd   : > { %11272 = vmatpush3.bf16.msra.mxu1 %v13656_v18  ;;  %v2928_v18 = vld [vmem:[%s13906_s16 + $0xab] sm:$0xff] }
  0xfe   : > { %11664 = vmatmul.mubr.bf16.gmra.mrb[16].mxu0 %v14066_v19  ;;  %v13657_v19 = vld [vmem:[%s16048_s3 + $0x18] sm:$0xff]  }
  0xff   : > { %11667 = vmatprep.mubr.bf16.mxu0 %v14074_v26  ;;  %v13659_v26 = vld [vmem:[%s16048_s3 + $0x20] sm:$0xff]   ;;  %11273 = vmatprep.subr.bf16.mxu1 %v13657_v19 }
 0x101   : > { %11274 = vmatpush3.bf16.msra.mxu1 %v13657_v19  ;;  %v439_v19 = vpack.c.bf16 %v410_v10, %v409_v8  ;;  %v3243_v10 = vld [vmem:[%s13976_s23 + $0x23] sm:$0xff] }
 0x102   : > { %11275 = vmatprep.subr.bf16.mxu1 %v13659_v26 }
 0x105   : > { %11276 = vmatpush3.bf16.msra.mxu1 %v13659_v26  ;;  %v411_v26 = vld [vmem:[%s13976_s23 + $0x70] sm:$0xff] }
 0x106   : > { %11668 = vmatmul.mubr.bf16.gmra.mrb[20].mxu0 %v14076_v27  ;;  %v2611_v27 = vld [vmem:[%s13976_s23 + $0x122] sm:$0xff] }
 0x107   : > { %11671 = vmatprep.mubr.bf16.mxu0 %v14084_v34  ;;  %v2612_v34 = vld [vmem:[%s13976_s23 + $0x12a] sm:$0xff] }
 0x108   : > { %v2630_v39 = vpack.c.bf16 %v2612_v34, %v2611_v27  ;;  %v412_v27 = vld [vmem:[%s13976_s23 + $0x78] sm:$0xff] }
 0x109   : > { %v2929_v34 = vld [vmem:[%s13906_s16 + $0xb3] sm:$0xff] }
 0x10e   : > { %11672 = vmatmul.mubr.bf16.gmra.mrb[24].mxu0 %v14086_v35  ;;  %v2909_v35 = vld [vmem:[%s13906_s16 + $0x13] sm:$0xff] }
 0x10f   : > { %11675 = vmatprep.mubr.bf16.mxu0 %v14094_v41  ;;  %v2945_v41 = vpack.c.bf16 %v2910_v38, %v2909_v35  ;;  %v2930_v35 = vld [vmem:[%s13906_s16 + $0xbb] sm:$0xff] }
 0x110   : > { %v14287_v38 = vld [vmem:[%s16047_s2 + $0x140] sm:$0xff]  }
 0x116   : > { %11676 = vmatmul.mubr.bf16.gmra.mrb[28].mxu0 %v14096_v42  ;;  %v13660_v42 = vld [vmem:[%s16048_s3 + $0x28] sm:$0xff]  }
 0x117   : > { %11679 = vmatprep.mubr.bf16.mxu0 %v14102_v45  ;;  %v2912_v45 = vld [vmem:[%s13906_s16 + $0x2b] sm:$0xff]  ;;  %11277 = vmatprep.subr.bf16.mxu1 %v13660_v42 }
 0x118   : > { %11278 = vmatpush3.bf16.msra.mxu1 %v13660_v42  ;;  %v2946_v16 = vpack.c.bf16 %v2912_v45, %v2911_v44  ;;  %v2955_v42 = vpack.c.bf16 %v2930_v35, %v2929_v34  ;;  %v413_v44 = vld [vmem:[%s13976_s23 + $0x80] sm:$0xff]  ;;  %v414_v45 = vld [vmem:[%s13976_s23 + $0x88] sm:$0xff] }
 0x119   : > { %11279 = vmatprep.subr.bf16.mxu1 %v13661_v43  ;;  %v441_v47 = vpack.c.bf16 %v414_v45, %v413_v44  ;;  %v3244_v34 = vld [vmem:[%s13976_s23 + $0x2b] sm:$0xff] }
 0x11a   : > { %v3278_v45 = vpack.c.bf16 %v3244_v34, %v3243_v10  ;;  %v342_v10 = vld [vmem:[%s13906_s16 + $0x78] sm:$0xff] }
 0x11c   : > { %11280 = vmatpush3.bf16.msra.mxu1 %v13661_v43  ;;  %v2931_v43 = vld [vmem:[%s13906_s16 + $0xc3] sm:$0xff] }
 0x11d   : > { %11281 = vmatprep.subr.bf16.mxu1 %v13663_v49  ;;  %v2956_v32 = vpack.c.bf16 %v2932_v46, %v2931_v43  ;;  %v3246_v43 = vld [vmem:[%s13976_s23 + $0x3b] sm:$0xff] }
 0x11e   : > { %11680 = vmatmul.mubr.bf16.gmra.mrb[32].mxu0 %v2630_v39  ;;  %v440_v39 = vpack.c.bf16 %v412_v27, %v411_v26  ;;  %v430_v26 = vld [vmem:[%s13976_s23 + $0x108] sm:$0xff]  ;;  %v431_v27 = vld [vmem:[%s13976_s23 + $0x110] sm:$0xff] }
 0x11f   : > { %11699 = vmatprep.mubr.bf16.mxu0 %v2945_v41 }
 0x120   : > { %11282 = vmatpush3.bf16.msra.mxu1 %v13663_v49  ;;  %v2934_v49 = vld [vmem:[%s13906_s16 + $0xdb] sm:$0xff] }
 0x123   : > { %11284 = vmatmul.mubr.bf16.vlgmr.msra.gmra.mrb[0].mxu1 %v434_v59  ;;  %v13669_v59 = vld [vmem:[%s16047_s2] sm:$0xff]  }
 0x124   : > { %11287 = vmatprep.mubr.bf16.mxu1 %v435_v6  ;;  %11319 = vmatprep.subr.bf16.mxu1 %v13669_v59  ;;  %v421_v6 = vld [vmem:[%s13976_s23 + $0xc0] sm:$0xff] }
 0x125   : > { %11320 = vmatpush3.bf16.msra.mxu1 %v13669_v59  ;;  %v445_v9 = vpack.c.bf16 %v422_v7, %v421_v6  ;;  %v331_v59 = vld [vmem:[%s13906_s16 + $0x20] sm:$0xff] }
 0x126   : > { %11700 = vmatmul.mubr.bf16.vlgmr.msra.gmra.mrb[0].mxu0 %v2946_v16  ;;  %v415_v16 = vld [vmem:[%s13976_s23 + $0x90] sm:$0xff]  ;;  %11321 = vmatprep.subr.bf16.mxu1 %v13670_v4  ;;  %v13655_v6 = vld [vmem:[%s16047_s2 + $0x160] sm:$0xff]  }
 0x127   : > { %11736 = vmatpush3.bf16.msra.mxu0 %v13641_v2  ;;  %11703 = vmatprep.mubr.bf16.mxu0 %v2947_v17  ;;  %v2927_v2 = vld [vmem:[%s13906_s16 + $0xa3] sm:$0xff]  ;;  %v416_v17 = vld [vmem:[%s13976_s23 + $0x98] sm:$0xff] }
 0x128   : > { %11737 = vmatprep.subr.bf16.mxu0 %v13642_v24  ;;  %v2954_v41 = vpack.c.bf16 %v2928_v18, %v2927_v2  ;;  %v442_v25 = vpack.c.bf16 %v416_v17, %v415_v16  ;;  %v2962_v2 = vpack.c.bf16 %v2944_v29, %v2943_v23  ;;  %v13676_v18 = vld [vmem:[%s16047_s2 + $0x28] sm:$0xff]   ;;  %v13679_v16 = vld [vmem:[%s16047_s2 + $0x38] sm:$0xff]   ;;  %v327_v17 = vld [vmem:[%s13906_s16] sm:$0xff] }
 0x129   : > { %11322 = vmatpush3.bf16.msra.mxu1 %v13670_v4  ;;  %v3253_v4 = vld [vmem:[%s13976_s23 + $0x73] sm:$0xff]  ;;  %v3258_v23 = vld [vmem:[%s13976_s23 + $0x9b] sm:$0xff] }
 0x12b   : > { %11738 = vmatpush3.bf16.msra.mxu0 %v13642_v24  ;;  %11288 = vmatmul.mubr.bf16.gmra.mrb[4].mxu1 %v436_v13  ;;  %v2933_v24 = vld [vmem:[%s13906_s16 + $0xd3] sm:$0xff] }
 0x12c   : > { %11739 = vmatprep.subr.bf16.mxu0 %v13643_v57  ;;  %11291 = vmatprep.mubr.bf16.mxu1 %v437_v37  ;;  %v2957_v51 = vpack.c.bf16 %v2934_v49, %v2933_v24  ;;  %v13672_v13 = vld [vmem:[%s16047_s2 + $0x10] sm:$0xff]   ;;  %v328_v24 = vld [vmem:[%s13906_s16 + $0x8] sm:$0xff] }
 0x12d   : > { %11323 = vmatprep.subr.bf16.mxu1 %v13672_v13  ;;  %v427_v37 = vld [vmem:[%s13976_s23 + $0xf0] sm:$0xff] }
 0x12e   : > { %11704 = vmatmul.mubr.bf16.gmra.mrb[4].mxu0 %v2948_v60  ;;  %v2937_v60 = vld [vmem:[%s13906_s16 + $0xf3] sm:$0xff]  ;;  %11324 = vmatpush3.bf16.msra.mxu1 %v13672_v13  ;;  %v3255_v13 = vld [vmem:[%s13976_s23 + $0x83] sm:$0xff] }
 0x12f   : > { %11707 = vmatprep.mubr.bf16.mxu0 %v2949_v61  ;;  %11740 = vmatpush3.bf16.msra.mxu0 %v13643_v57  ;;  %v420_v57 = vld [vmem:[%s13976_s23 + $0xb8] sm:$0xff]  ;;  %v329_v49 = vld [vmem:[%s13906_s16 + $0x10] sm:$0xff] }
 0x130   : > { %11741 = vmatprep.subr.bf16.mxu0 %v13644_v62  ;;  %v2938_v61 = vld [vmem:[%s13906_s16 + $0xfb] sm:$0xff]  ;;  %11325 = vmatprep.subr.bf16.mxu1 %v13673_v28 }
 0x131   : > { %v2959_v1 = vpack.c.bf16 %v2938_v61, %v2937_v60  ;;  %v332_v60 = vld [vmem:[%s13906_s16 + $0x28] sm:$0xff]  ;;  %v333_v61 = vld [vmem:[%s13906_s16 + $0x30] sm:$0xff] }
 0x132   : > { %11326 = vmatpush3.bf16.msra.mxu1 %v13673_v28  ;;  %v366_v7 = vpack.c.bf16 %v334_v3, %v333_v61  ;;  %v13662_v28 = vld [vmem:[%s16047_s2 + $0x170] sm:$0xff]   ;;  %v3271_v61 = vld [vmem:[%s13976_s23 + $0x103] sm:$0xff] }
 0x133   : > { %11742 = vmatpush3.bf16.msra.mxu0 %v13644_v62  ;;  %11292 = vmatmul.mubr.bf16.gmra.mrb[8].mxu1 %v438_v50  ;;  %v444_v62 = vpack.c.bf16 %v420_v57, %v419_v55  ;;  %v13675_v50 = vld [vmem:[%s16047_s2 + $0x20] sm:$0xff]   ;;  %v3281_v55 = vpack.c.bf16 %v3250_v33, %v3249_v53  ;;  %v13652_v57 = vld [vmem:[%s16047_s2 + $0x158] sm:$0xff]   ;;  %v349_v33 = vld [vmem:[%s13906_s16 + $0xb0] sm:$0xff] }
 0x134   : > { %11743 = vmatprep.subr.bf16.mxu0 %v13645_v12  ;;  %11295 = vmatprep.mubr.bf16.mxu1 %v439_v19  ;;  %v429_v19 = vld [vmem:[%s13976_s23 + $0x100] sm:$0xff]  ;;  %v352_v3 = vld [vmem:[%s13906_s16 + $0xc8] sm:$0xff] }
 0x135   : > { %11327 = vmatprep.subr.bf16.mxu1 %v13675_v50  ;;  %v449_v35 = vpack.c.bf16 %v430_v26, %v429_v19  ;;  %v3262_v19 = vld [vmem:[%s13976_s23 + $0xbb] sm:$0xff] }
 0x136   : > { %11708 = vmatmul.mubr.bf16.gmra.mrb[8].mxu0 %v2950_v14  ;;  %v2941_v14 = vld [vmem:[%s13906_s16 + $0x113] sm:$0xff]  ;;  %11328 = vmatpush3.bf16.msra.mxu1 %v13675_v50  ;;  %v3259_v50 = vld [vmem:[%s13976_s23 + $0xa3] sm:$0xff] }
 0x137   : > { %11711 = vmatprep.mubr.bf16.mxu0 %v2951_v15  ;;  %11744 = vmatpush3.bf16.msra.mxu0 %v13645_v12  ;;  %v424_v12 = vld [vmem:[%s13976_s23 + $0xd8] sm:$0xff]  ;;  %v14411_v26 = vld [vmem:[%s16048_s3 + $0x140] sm:$0xff]  }
 0x138   : > { %11745 = vmatprep.subr.bf16.mxu0 %v13646_v20  ;;  %v2942_v15 = vld [vmem:[%s13906_s16 + $0x11b] sm:$0xff]  ;;  %11329 = vmatprep.subr.bf16.mxu1 %v13676_v18 }
 0x139   : > { %v2961_v22 = vpack.c.bf16 %v2942_v15, %v2941_v14  ;;  %v3256_v14 = vld [vmem:[%s13976_s23 + $0x8b] sm:$0xff]  ;;  %v3257_v15 = vld [vmem:[%s13976_s23 + $0x93] sm:$0xff] }
 0x13a   : > { %11330 = vmatpush3.bf16.msra.mxu1 %v13676_v18  ;;  %v3261_v18 = vld [vmem:[%s13976_s23 + $0xb3] sm:$0xff] }
 0x13b   : > { %11746 = vmatpush3.bf16.msra.mxu0 %v13646_v20  ;;  %11296 = vmatmul.mubr.bf16.gmra.mrb[12].mxu1 %v440_v39  ;;  %v446_v20 = vpack.c.bf16 %v424_v12, %v423_v11  ;;  %v432_v39 = vld [vmem:[%s13976_s23 + $0x118] sm:$0xff]  ;;  %v3283_v11 = vpack.c.bf16 %v3254_v5, %v3253_v4  ;;  %v13658_v12 = vld [vmem:[%s16047_s2 + $0x168] sm:$0xff]   ;;  %v353_v5 = vld [vmem:[%s13906_s16 + $0xd0] sm:$0xff] }
 0x13c   : > { %11747 = vmatprep.subr.bf16.mxu0 %v13647_v36  ;;  %11299 = vmatprep.mubr.bf16.mxu1 %v441_v47  ;;  %v450_v44 = vpack.c.bf16 %v432_v39, %v431_v27  ;;  %v13650_v47 = vld [vmem:[%s16047_s2 + $0x148] sm:$0xff]  }
 0x13d   : > { %v3263_v39 = vld [vmem:[%s13976_s23 + $0xc3] sm:$0xff] }
 0x13e   : > { %11712 = vmatmul.mubr.bf16.gmra.mrb[12].mxu0 %v2952_v56  ;;  %v3241_v56 = vld [vmem:[%s13976_s23 + $0x13] sm:$0xff] }
 0x13f   : > { %11715 = vmatprep.mubr.bf16.mxu0 %v2953_v58  ;;  %11748 = vmatpush3.bf16.msra.mxu0 %v13647_v36  ;;  %v447_v36 = vpack.c.bf16 %v426_v31, %v425_v30  ;;  %v3242_v58 = vld [vmem:[%s13976_s23 + $0x1b] sm:$0xff] }
 0x140   : > { %11749 = vmatprep.subr.bf16.mxu0 %v13648_v0  ;;  %v3277_v8 = vpack.c.bf16 %v3242_v58, %v3241_v56  ;;  %v338_v30 = vld [vmem:[%s13906_s16 + $0x58] sm:$0xff]  ;;  %v339_v56 = vld [vmem:[%s13906_s16 + $0x60] sm:$0xff]  ;;  %v340_v58 = vld [vmem:[%s13906_s16 + $0x68] sm:$0xff] }
 0x143   : > { %11750 = vmatpush3.bf16.msra.mxu0 %v13648_v0  ;;  %11300 = vmatmul.mubr.bf16.gmra.mrb[16].mxu1 %v442_v25  ;;  %v448_v0 = vpack.c.bf16 %v428_v48, %v427_v37  ;;  %v3247_v25 = vld [vmem:[%s13976_s23 + $0x43] sm:$0xff]  ;;  %v3285_v37 = vpack.c.bf16 %v3258_v23, %v3257_v15  ;;  %v13664_v48 = vld [vmem:[%s16047_s2 + $0x178] sm:$0xff]  }
 0x144   : > { %11787 = vmatprep.subr.bf16.mxu0 %v14287_v38  ;;  %11303 = vmatprep.mubr.bf16.mxu1 %v443_v40  ;;  %v364_v40 = vpack.c.bf16 %v330_v52, %v329_v49  ;;  %v348_v52 = vld [vmem:[%s13906_s16 + $0xa8] sm:$0xff] }
 0x145   : > { %v3275_v15 = vld [vmem:[%s13976_s23 + $0x123] sm:$0xff] }
 0x146   : > { %11716 = vmatmul.mubr.bf16.gmra.mrb[16].mxu0 %v2954_v41  ;;  %v13677_v41 = vld [vmem:[%s16047_s2 + $0x30] sm:$0xff]   ;;  %v356_v23 = vld [vmem:[%s13906_s16 + $0xe8] sm:$0xff] }
 0x147   : > { %11719 = vmatprep.mubr.bf16.mxu0 %v2955_v42  ;;  %v3245_v42 = vld [vmem:[%s13976_s23 + $0x33] sm:$0xff]  ;;  %11331 = vmatprep.subr.bf16.mxu1 %v13677_v41 }
 0x148   : > { %v3279_v46 = vpack.c.bf16 %v3246_v43, %v3245_v42  ;;  %11332 = vmatpush3.bf16.msra.mxu1 %v13677_v41  ;;  %v343_v41 = vld [vmem:[%s13906_s16 + $0x80] sm:$0xff]  ;;  %v344_v42 = vld [vmem:[%s13906_s16 + $0x88] sm:$0xff] }
 0x149   : > { %11333 = vmatprep.subr.bf16.mxu1 %v13679_v16  ;;  %v3264_v43 = vld [vmem:[%s13976_s23 + $0xcb] sm:$0xff] }
 0x14b   : > { %11304 = vmatmul.mubr.bf16.gmra.mrb[20].mxu1 %v444_v62  ;;  %v3251_v62 = vld [vmem:[%s13976_s23 + $0x63] sm:$0xff] }
 0x14c   : > { %11307 = vmatprep.mubr.bf16.mxu1 %v445_v9  ;;  %11334 = vmatpush3.bf16.msra.mxu1 %v13679_v16  ;;  %v3266_v16 = vld [vmem:[%s13976_s23 + $0xdb] sm:$0xff] }
 0x14e   : > { %11720 = vmatmul.mubr.bf16.gmra.mrb[20].mxu0 %v2956_v32  ;;  %v3248_v32 = vld [vmem:[%s13976_s23 + $0x4b] sm:$0xff] }
 0x14f   : > { %11723 = vmatprep.mubr.bf16.mxu0 %v2957_v51  ;;  %v363_v51 = vpack.c.bf16 %v328_v24, %v327_v17  ;;  %v3288_v24 = vpack.c.bf16 %v3264_v43, %v3263_v39  ;;  %v3578_v39 = vld [vmem:[%s13906_s16 + $0x3c] sm:$0xff] }
 0x153   : > { %11308 = vmatmul.mubr.bf16.gmra.mrb[24].mxu1 %v446_v20  ;;  %v335_v20 = vld [vmem:[%s13906_s16 + $0x40] sm:$0xff] }
 0x154   : > { %11311 = vmatprep.mubr.bf16.mxu1 %v447_v36  ;;  %v3284_v36 = vpack.c.bf16 %v3256_v14, %v3255_v13 }
 0x156   : > { %11724 = vmatmul.mubr.bf16.gmra.mrb[24].mxu0 %v2958_v63  ;;  %v3252_v63 = vld [vmem:[%s13976_s23 + $0x6b] sm:$0xff] }
 0x157   : > { %11727 = vmatprep.mubr.bf16.mxu0 %v2959_v1  ;;  %v365_v1 = vpack.c.bf16 %v332_v60, %v331_v59  ;;  %v3282_v9 = vpack.c.bf16 %v3252_v63, %v3251_v62  ;;  %v13686_v62 = vld [vmem:[%s16047_s2 + $0x48] sm:$0xff]  }
 0x158   : > { %v3272_v63 = vld [vmem:[%s13976_s23 + $0x10b] sm:$0xff] }
 0x159   : > { %v3292_v13 = vpack.c.bf16 %v3272_v63, %v3271_v61  ;;  %v924_v61 = vld [vmem:[%s13906_s16 + $0x39] sm:$0xff] }
 0x15a   : > { %v3586_v63 = vld [vmem:[%s13906_s16 + $0x7c] sm:$0xff] }
 0x15b   : > { %11312 = vmatmul.mubr.bf16.gmra.mrb[28].mxu1 %v448_v0  ;;  %v3260_v0 = vld [vmem:[%s13976_s23 + $0xab] sm:$0xff] }
 0x15c   : > { %11315 = vmatprep.mubr.bf16.mxu1 %v449_v35  ;;  %v3286_v34 = vpack.c.bf16 %v3260_v0, %v3259_v50  ;;  %v3287_v35 = vpack.c.bf16 %v3262_v19, %v3261_v18  ;;  %v13692_v0 = vld [vmem:[%s16047_s2 + $0x68] sm:$0xff]  }
 0x15d   : > { %v3576_v18 = vld [vmem:[%s13906_s16 + $0x2c] sm:$0xff] }
 0x15e   : > { %11728 = vmatmul.mubr.bf16.gmra.mrb[28].mxu0 %v2960_v21  ;;  %v336_v21 = vld [vmem:[%s13906_s16 + $0x48] sm:$0xff] }
 0x15f   : > { %11731 = vmatprep.mubr.bf16.mxu0 %v2961_v22  ;;  %v337_v22 = vld [vmem:[%s13906_s16 + $0x50] sm:$0xff]  ;;  %v367_v29 = vpack.c.bf16 %v336_v21, %v335_v20  ;;  %v13689_v20 = vld [vmem:[%s16047_s2 + $0x58] sm:$0xff]  }
 0x160   : > { %v368_v31 = vpack.c.bf16 %v338_v30, %v337_v22  ;;  %v3276_v21 = vld [vmem:[%s13976_s23 + $0x12b] sm:$0xff]  ;;  %v355_v22 = vld [vmem:[%s13906_s16 + $0xe0] sm:$0xff]  ;;  %v358_v30 = vld [vmem:[%s13906_s16 + $0xf8] sm:$0xff] }
 0x161   : > { %v3294_v50 = vpack.c.bf16 %v3276_v21, %v3275_v15  ;;  %v3590_v15 = vld [vmem:[%s13906_s16 + $0x9c] sm:$0xff] }
 0x163   : > { %11316 = vmatmul.mubr.bf16.gmra.mrb[32].mxu1 %v450_v44  ;;  %v371_v44 = vpack.c.bf16 %v344_v42, %v343_v41 }
 0x164   : > { %11335 = vmatprep.mubr.bf16.mxu1 %v363_v51  ;;  %v347_v51 = vld [vmem:[%s13906_s16 + $0xa0] sm:$0xff] }
 0x165   : > { %v373_v53 = vpack.c.bf16 %v348_v52, %v347_v51  ;;  %v3582_v51 = vld [vmem:[%s13906_s16 + $0x5c] sm:$0xff]  ;;  %v13667_v52 = vld [vmem:[%s16048_s3 + $0x150] sm:$0xff]  }
 0x166   : > { %11732 = vmatmul.mubr.bf16.gmra.mrb[32].mxu0 %v2962_v2  ;;  %v369_v2 = vpack.c.bf16 %v340_v58, %v339_v56  ;;  %v3575_v58 = vld [vmem:[%s13906_s16 + $0x24] sm:$0xff] }
 0x167   : > { %11751 = vmatprep.mubr.bf16.mxu0 %v3277_v8  ;;  %v341_v8 = vld [vmem:[%s13906_s16 + $0x70] sm:$0xff]  ;;  %v14475_v42 = vpack.c.bf16 %v3576_v18, %v3575_v58  ;;  %v932_v58 = vld [vmem:[%s13906_s16 + $0x79] sm:$0xff] }
 0x168   : > { %v370_v27 = vpack.c.bf16 %v342_v10, %v341_v8  ;;  %v360_v8 = vld [vmem:[%s13906_s16 + $0x108] sm:$0xff]  ;;  %v361_v10 = vld [vmem:[%s13906_s16 + $0x110] sm:$0xff] }
 0x16b   : > { %11336 = vmatmul.mubr.bf16.vlgmr.msra.gmra.mrb[0].mxu1 %v364_v40  ;;  %v13685_v40 = vld [vmem:[%s16047_s2 + $0x40] sm:$0xff]  }
 0x16c   : > { %11339 = vmatprep.mubr.bf16.mxu1 %v365_v1  ;;  %11371 = vmatprep.subr.bf16.mxu1 %v13685_v40  ;;  %v351_v1 = vld [vmem:[%s13906_s16 + $0xc0] sm:$0xff] }
 0x16d   : > { %11372 = vmatpush3.bf16.msra.mxu1 %v13685_v40  ;;  %v375_v4 = vpack.c.bf16 %v352_v3, %v351_v1  ;;  %v921_v40 = vld [vmem:[%s13906_s16 + $0x21] sm:$0xff] }
 0x16e   : > { %11752 = vmatmul.mubr.bf16.vlgmr.msra.gmra.mrb[0].mxu0 %v3278_v45  ;;  %v345_v45 = vld [vmem:[%s13906_s16 + $0x90] sm:$0xff]  ;;  %11373 = vmatprep.subr.bf16.mxu1 %v13686_v62  ;;  %v13671_v1 = vld [vmem:[%s16048_s3 + $0x160] sm:$0xff]  }
 0x16f   : > { %11788 = vmatpush3.bf16.msra.mxu0 %v14287_v38  ;;  %11755 = vmatprep.mubr.bf16.mxu0 %v3279_v46  ;;  %v3280_v38 = vpack.c.bf16 %v3248_v32, %v3247_v25  ;;  %v346_v46 = vld [vmem:[%s13906_s16 + $0x98] sm:$0xff]  ;;  %v3267_v25 = vld [vmem:[%s13976_s23 + $0xe3] sm:$0xff]  ;;  %v3268_v32 = vld [vmem:[%s13976_s23 + $0xeb] sm:$0xff] }
 0x170   : > { %11789 = vmatprep.subr.bf16.mxu0 %v13650_v47  ;;  %v372_v17 = vpack.c.bf16 %v346_v46, %v345_v45  ;;  %v3290_v59 = vpack.c.bf16 %v3268_v32, %v3267_v25  ;;  %v13695_v45 = vld [vmem:[%s16047_s2 + $0x78] sm:$0xff]   ;;  %v917_v46 = vld [vmem:[%s13906_s16 + $0x1] sm:$0xff] }
 0x171   : > { %11374 = vmatpush3.bf16.msra.mxu1 %v13686_v62  ;;  %v920_v25 = vld [vmem:[%s13906_s16 + $0x19] sm:$0xff] }
 0x172   : > { %v3581_v32 = vld [vmem:[%s13906_s16 + $0x54] sm:$0xff] }
 0x173   : > { %11790 = vmatpush3.bf16.msra.mxu0 %v13650_v47  ;;  %11340 = vmatmul.mubr.bf16.gmra.mrb[4].mxu1 %v366_v7  ;;  %v3265_v47 = vld [vmem:[%s13976_s23 + $0xd3] sm:$0xff] }
 0x174   : > { %11791 = vmatprep.subr.bf16.mxu0 %v13651_v54  ;;  %11343 = vmatprep.mubr.bf16.mxu1 %v367_v29  ;;  %v3289_v49 = vpack.c.bf16 %v3266_v16, %v3265_v47  ;;  %v13688_v7 = vld [vmem:[%s16047_s2 + $0x50] sm:$0xff]  }
 0x175   : > { %11375 = vmatprep.subr.bf16.mxu1 %v13688_v7  ;;  %v357_v29 = vld [vmem:[%s13906_s16 + $0xf0] sm:$0xff] }
 0x176   : > { %11756 = vmatmul.mubr.bf16.gmra.mrb[4].mxu0 %v3280_v38  ;;  %v3269_v38 = vld [vmem:[%s13976_s23 + $0xf3] sm:$0xff]  ;;  %11376 = vmatpush3.bf16.msra.mxu1 %v13688_v7  ;;  %v918_v47 = vld [vmem:[%s13906_s16 + $0x9] sm:$0xff] }
 0x177   : > { %11759 = vmatprep.mubr.bf16.mxu0 %v3281_v55  ;;  %11792 = vmatpush3.bf16.msra.mxu0 %v13651_v54  ;;  %v350_v54 = vld [vmem:[%s13906_s16 + $0xb8] sm:$0xff]  ;;  %v3587_v7 = vld [vmem:[%s13906_s16 + $0x84] sm:$0xff] }
 0x178   : > { %11793 = vmatprep.subr.bf16.mxu0 %v13652_v57  ;;  %v3270_v55 = vld [vmem:[%s13976_s23 + $0xfb] sm:$0xff]  ;;  %11377 = vmatprep.subr.bf16.mxu1 %v13689_v20  ;;  %v919_v16 = vld [vmem:[%s13906_s16 + $0x11] sm:$0xff] }
 0x179   : > { %v3291_v60 = vpack.c.bf16 %v3270_v55, %v3269_v38  ;;  %v922_v38 = vld [vmem:[%s13906_s16 + $0x29] sm:$0xff]  ;;  %v923_v55 = vld [vmem:[%s13906_s16 + $0x31] sm:$0xff] }
 0x17a   : > { %11378 = vmatpush3.bf16.msra.mxu1 %v13689_v20  ;;  %v3585_v62 = vld [vmem:[%s13906_s16 + $0x74] sm:$0xff]  ;;  %v956_v3 = vpack.c.bf16 %v924_v61, %v923_v55  ;;  %v3602_v55 = vld [vmem:[%s13906_s16 + $0xfc] sm:$0xff]  ;;  %v3603_v61 = vld [vmem:[%s13906_s16 + $0x104] sm:$0xff] }
 0x17b   : > { %11794 = vmatpush3.bf16.msra.mxu0 %v13652_v57  ;;  %11344 = vmatmul.mubr.bf16.gmra.mrb[8].mxu1 %v368_v31  ;;  %v374_v57 = vpack.c.bf16 %v350_v54, %v349_v33  ;;  %v13691_v31 = vld [vmem:[%s16047_s2 + $0x60] sm:$0xff]   ;;  %v14501_v33 = vpack.c.bf16 %v3582_v51, %v3581_v32  ;;  %v13668_v54 = vld [vmem:[%s16048_s3 + $0x158] sm:$0xff]   ;;  %v13678_v20 = vld [vmem:[%s16048_s3 + $0x170] sm:$0xff]  }
 0x17c   : > { %11795 = vmatprep.subr.bf16.mxu0 %v13655_v6  ;;  %11347 = vmatprep.mubr.bf16.mxu1 %v369_v2  ;;  %v359_v2 = vld [vmem:[%s13906_s16 + $0x100] sm:$0xff]  ;;  %v938_v51 = vld [vmem:[%s13906_s16 + $0xa9] sm:$0xff] }
 0x17d   : > { %11379 = vmatprep.subr.bf16.mxu1 %v13691_v31  ;;  %v379_v19 = vpack.c.bf16 %v360_v8, %v359_v2  ;;  %v3594_v2 = vld [vmem:[%s13906_s16 + $0xbc] sm:$0xff] }
 0x17e   : > { %11760 = vmatmul.mubr.bf16.gmra.mrb[8].mxu0 %v3282_v9  ;;  %v3273_v9 = vld [vmem:[%s13976_s23 + $0x113] sm:$0xff]  ;;  %11380 = vmatpush3.bf16.msra.mxu1 %v13691_v31  ;;  %v3591_v31 = vld [vmem:[%s13906_s16 + $0xa4] sm:$0xff] }
 0x17f   : > { %11763 = vmatprep.mubr.bf16.mxu0 %v3283_v11  ;;  %11796 = vmatpush3.bf16.msra.mxu0 %v13655_v6  ;;  %v354_v6 = vld [vmem:[%s13906_s16 + $0xd8] sm:$0xff]  ;;  %v14559_v8 = vld [vmem:[%s16047_s2 + $0x180] sm:$0xff]  }
 0x180   : > { %11797 = vmatprep.subr.bf16.mxu0 %v13658_v12  ;;  %v3274_v11 = vld [vmem:[%s13976_s23 + $0x11b] sm:$0xff]  ;;  %11381 = vmatprep.subr.bf16.mxu1 %v13692_v0 }
 0x181   : > { %v3293_v14 = vpack.c.bf16 %v3274_v11, %v3273_v9  ;;  %v3588_v9 = vld [vmem:[%s13906_s16 + $0x8c] sm:$0xff]  ;;  %v3589_v11 = vld [vmem:[%s13906_s16 + $0x94] sm:$0xff]  ;;  %v937_v32 = vld [vmem:[%s13906_s16 + $0xa1] sm:$0xff] }
 0x182   : > { %11382 = vmatpush3.bf16.msra.mxu1 %v13692_v0  ;;  %v3593_v0 = vld [vmem:[%s13906_s16 + $0xb4] sm:$0xff] }
 0x183   : > { %11798 = vmatpush3.bf16.msra.mxu0 %v13658_v12  ;;  %11348 = vmatmul.mubr.bf16.gmra.mrb[12].mxu1 %v370_v27  ;;  %v376_v12 = vpack.c.bf16 %v354_v6, %v353_v5  ;;  %v362_v27 = vld [vmem:[%s13906_s16 + $0x118] sm:$0xff]  ;;  %v14521_v5 = vpack.c.bf16 %v3586_v63, %v3585_v62  ;;  %v13674_v6 = vld [vmem:[%s16048_s3 + $0x168] sm:$0xff]  }
 0x184   : > { %11799 = vmatprep.subr.bf16.mxu0 %v13662_v28  ;;  %11351 = vmatprep.mubr.bf16.mxu1 %v371_v44  ;;  %v380_v41 = vpack.c.bf16 %v362_v27, %v361_v10  ;;  %v13666_v44 = vld [vmem:[%s16048_s3 + $0x148] sm:$0xff]  }
 0x185   : > { %v3595_v27 = vld [vmem:[%s13906_s16 + $0xc4] sm:$0xff]  ;;  %v3604_v63 = vld [vmem:[%s13906_s16 + $0x10c] sm:$0xff] }
 0x186   : > { %11764 = vmatmul.mubr.bf16.gmra.mrb[12].mxu0 %v3284_v36  ;;  %v3573_v36 = vld [vmem:[%s13906_s16 + $0x14] sm:$0xff]  ;;  %v13702_v62 = vld [vmem:[%s16048_s3 + $0x48] sm:$0xff]  }
 0x187   : > { %11767 = vmatprep.mubr.bf16.mxu0 %v3285_v37  ;;  %11800 = vmatpush3.bf16.msra.mxu0 %v13662_v28  ;;  %v377_v28 = vpack.c.bf16 %v356_v23, %v355_v22  ;;  %v3574_v37 = vld [vmem:[%s13906_s16 + $0x1c] sm:$0xff] }
 0x188   : > { %11801 = vmatprep.subr.bf16.mxu0 %v13664_v48  ;;  %v3609_v56 = vpack.c.bf16 %v3574_v37, %v3573_v36  ;;  %v928_v22 = vld [vmem:[%s13906_s16 + $0x59] sm:$0xff]  ;;  %v929_v36 = vld [vmem:[%s13906_s16 + $0x61] sm:$0xff]  ;;  %v930_v37 = vld [vmem:[%s13906_s16 + $0x69] sm:$0xff] }
 0x18b   : > { %11802 = vmatpush3.bf16.msra.mxu0 %v13664_v48  ;;  %11352 = vmatmul.mubr.bf16.gmra.mrb[16].mxu1 %v372_v17  ;;  %v378_v48 = vpack.c.bf16 %v358_v30, %v357_v29  ;;  %v3579_v17 = vld [vmem:[%s13906_s16 + $0x44] sm:$0xff]  ;;  %v14541_v29 = vpack.c.bf16 %v3590_v15, %v3589_v11  ;;  %v13680_v30 = vld [vmem:[%s16048_s3 + $0x178] sm:$0xff]   ;;  %v13704_v11 = vld [vmem:[%s16048_s3 + $0x50] sm:$0xff]   ;;  %v14613_v15 = vpack.c.bf16 %v3604_v63, %v3603_v61 }
 0x18c   : > { %11839 = vmatprep.subr.bf16.mxu0 %v14411_v26  ;;  %11355 = vmatprep.mubr.bf16.mxu1 %v373_v53  ;;  %v3913_v63 = vld [vmem:[%s13976_s23 + $0x54] sm:$0xff] }
 0x18e   : > { %11768 = vmatmul.mubr.bf16.gmra.mrb[16].mxu0 %v3286_v34  ;;  %v13693_v34 = vld [vmem:[%s16047_s2 + $0x70] sm:$0xff]  }
 0x18f   : > { %11771 = vmatprep.mubr.bf16.mxu0 %v3287_v35  ;;  %v3577_v35 = vld [vmem:[%s13906_s16 + $0x34] sm:$0xff]  ;;  %11383 = vmatprep.subr.bf16.mxu1 %v13693_v34 }
 0x190   : > { %v14477_v43 = vpack.c.bf16 %v3578_v39, %v3577_v35  ;;  %11384 = vmatpush3.bf16.msra.mxu1 %v13693_v34  ;;  %v933_v34 = vld [vmem:[%s13906_s16 + $0x81] sm:$0xff]  ;;  %v934_v35 = vld [vmem:[%s13906_s16 + $0x89] sm:$0xff] }
 0x191   : > { %11385 = vmatprep.subr.bf16.mxu1 %v13695_v45  ;;  %v3596_v39 = vld [vmem:[%s13906_s16 + $0xcc] sm:$0xff] }
 0x193   : > { %11356 = vmatmul.mubr.bf16.gmra.mrb[20].mxu1 %v374_v57  ;;  %v3583_v57 = vld [vmem:[%s13906_s16 + $0x64] sm:$0xff] }
 0x194   : > { %11359 = vmatprep.mubr.bf16.mxu1 %v375_v4  ;;  %11386 = vmatpush3.bf16.msra.mxu1 %v13695_v45  ;;  %v936_v45 = vld [vmem:[%s13906_s16 + $0x99] sm:$0xff] }
 0x196   : > { %11772 = vmatmul.mubr.bf16.gmra.mrb[20].mxu0 %v3288_v24  ;;  %v3580_v24 = vld [vmem:[%s13906_s16 + $0x4c] sm:$0xff] }
 0x197   : > { %11775 = vmatprep.mubr.bf16.mxu0 %v3289_v49  ;;  %v953_v49 = vpack.c.bf16 %v918_v47, %v917_v46  ;;  %v14499_v53 = vpack.c.bf16 %v3580_v24, %v3579_v17  ;;  %v3597_v46 = vld [vmem:[%s13906_s16 + $0xd4] sm:$0xff]  ;;  %v3598_v47 = vld [vmem:[%s13906_s16 + $0xdc] sm:$0xff]  ;;  %v14576_v17 = vpack.c.bf16 %v3596_v39, %v3595_v27  ;;  %v3907_v27 = vld [vmem:[%s13976_s23 + $0x24] sm:$0xff] }
 0x198   : > { %v14578_v24 = vpack.c.bf16 %v3598_v47, %v3597_v46  ;;  %v950_v39 = vld [vmem:[%s13906_s16 + $0x109] sm:$0xff]  ;;  %v952_v46 = vld [vmem:[%s13906_s16 + $0x119] sm:$0xff] }
 0x199   : > { %v13709_v47 = vld [vmem:[%s16048_s3 + $0x70] sm:$0xff]  }
 0x19b   : > { %11360 = vmatmul.mubr.bf16.gmra.mrb[24].mxu1 %v376_v12  ;;  %v925_v12 = vld [vmem:[%s13906_s16 + $0x41] sm:$0xff] }
 0x19c   : > { %11363 = vmatprep.mubr.bf16.mxu1 %v377_v28  ;;  %v14539_v28 = vpack.c.bf16 %v3588_v9, %v3587_v7  ;;  %v943_v7 = vld [vmem:[%s13906_s16 + $0xd1] sm:$0xff]  ;;  %v944_v9 = vld [vmem:[%s13906_s16 + $0xd9] sm:$0xff] }
 0x19e   : > { %11776 = vmatmul.mubr.bf16.gmra.mrb[24].mxu0 %v3290_v59  ;;  %v3584_v59 = vld [vmem:[%s13906_s16 + $0x6c] sm:$0xff] }
 0x19f   : > { %11779 = vmatprep.mubr.bf16.mxu0 %v3291_v60  ;;  %v955_v60 = vpack.c.bf16 %v922_v38, %v921_v40  ;;  %v14519_v4 = vpack.c.bf16 %v3584_v59, %v3583_v57  ;;  %v13701_v40 = vld [vmem:[%s16048_s3 + $0x40] sm:$0xff]   ;;  %v3601_v38 = vld [vmem:[%s13906_s16 + $0xf4] sm:$0xff] }
 0x1a0   : > { %11423 = vmatprep.subr.bf16.mxu1 %v13701_v40 }
 0x1a3   : > { %11364 = vmatmul.mubr.bf16.gmra.mrb[28].mxu1 %v378_v48  ;;  %v3592_v48 = vld [vmem:[%s13906_s16 + $0xac] sm:$0xff] }
 0x1a4   : > { %11367 = vmatprep.mubr.bf16.mxu1 %v379_v19  ;;  %v14561_v18 = vpack.c.bf16 %v3592_v48, %v3591_v31  ;;  %v14563_v19 = vpack.c.bf16 %v3594_v2, %v3593_v0  ;;  %v946_v31 = vld [vmem:[%s13906_s16 + $0xe9] sm:$0xff]  ;;  %v948_v48 = vld [vmem:[%s13906_s16 + $0xf9] sm:$0xff] }
 0x1a6   : > { %11780 = vmatmul.mubr.bf16.gmra.mrb[28].mxu0 %v3292_v13  ;;  %v926_v13 = vld [vmem:[%s13906_s16 + $0x49] sm:$0xff] }
 0x1a7   : > { %11783 = vmatprep.mubr.bf16.mxu0 %v3293_v14  ;;  %v927_v14 = vld [vmem:[%s13906_s16 + $0x51] sm:$0xff]  ;;  %v957_v21 = vpack.c.bf16 %v926_v13, %v925_v12  ;;  %v3606_v13 = vld [vmem:[%s13906_s16 + $0x11c] sm:$0xff] }
 0x1a8   : > { %v958_v23 = vpack.c.bf16 %v928_v22, %v927_v14  ;;  %v3605_v12 = vld [vmem:[%s13906_s16 + $0x114] sm:$0xff]  ;;  %v966_v14 = vpack.c.bf16 %v944_v9, %v943_v7  ;;  %v13817_v7 = vld [vmem:[%s16047_s2 + $0x80] sm:$0xff]  }
 0x1a9   : > { %v13705_v22 = vld [vmem:[%s16048_s3 + $0x58] sm:$0xff]  }
 0x1ab   : > { %11368 = vmatmul.mubr.bf16.gmra.mrb[32].mxu1 %v380_v41  ;;  %v961_v41 = vpack.c.bf16 %v934_v35, %v933_v34  ;;  %v13708_v34 = vld [vmem:[%s16048_s3 + $0x68] sm:$0xff]  }
 0x1ac   : > { %11387 = vmatprep.mubr.bf16.mxu1 %v953_v49  ;;  %v3599_v49 = vld [vmem:[%s13906_s16 + $0xe4] sm:$0xff] }
 0x1ad   : > { %v949_v35 = vld [vmem:[%s13906_s16 + $0x101] sm:$0xff] }
 0x1ae   : > { %11784 = vmatmul.mubr.bf16.gmra.mrb[32].mxu0 %v3294_v50  ;;  %v959_v50 = vpack.c.bf16 %v930_v37, %v929_v36  ;;  %v947_v37 = vld [vmem:[%s13906_s16 + $0xf1] sm:$0xff] }
 0x1af   : > { %11803 = vmatprep.mubr.bf16.mxu0 %v3609_v56  ;;  %v931_v56 = vld [vmem:[%s13906_s16 + $0x71] sm:$0xff]  ;;  %v968_v0 = vpack.c.bf16 %v948_v48, %v947_v37  ;;  %v3918_v37 = vld [vmem:[%s13976_s23 + $0x7c] sm:$0xff] }
 0x1b0   : > { %v960_v10 = vpack.c.bf16 %v932_v58, %v931_v56  ;;  %v3905_v56 = vld [vmem:[%s13976_s23 + $0x14] sm:$0xff]  ;;  %v3906_v58 = vld [vmem:[%s13976_s23 + $0x1c] sm:$0xff] }
 0x1b1   : > { %v13687_v48 = vld [vmem:[%s16047_s2 + $0x1a0] sm:$0xff]  }
 0x1b6   : > { %11804 = vmatmul.mubr.bf16.vlgmr.msra.gmra.mrb[0].mxu0 %v14475_v42 }
 0x1b7   : > { %11840 = vmatpush3.bf16.msra.mxu0 %v14411_v26  ;;  %11807 = vmatprep.mubr.bf16.mxu0 %v14477_v43  ;;  %v954_v26 = vpack.c.bf16 %v920_v25, %v919_v16  ;;  %v3600_v25 = vld [vmem:[%s13906_s16 + $0xec] sm:$0xff] }
 0x1b8   : > { %11841 = vmatprep.subr.bf16.mxu0 %v13666_v44  ;;  %v14593_v59 = vpack.c.bf16 %v3600_v25, %v3599_v49  ;;  %v3910_v49 = vld [vmem:[%s13976_s23 + $0x3c] sm:$0xff] }
 0x1b9   : > { %11388 = vmatmul.mubr.bf16.vlgmr.msra.gmra.mrb[0].mxu1 %v954_v26  ;;  %v939_v26 = vld [vmem:[%s13906_s16 + $0xb1] sm:$0xff] }
 0x1ba   : > { %11391 = vmatprep.mubr.bf16.mxu1 %v955_v60  ;;  %11424 = vmatpush3.bf16.msra.mxu1 %v13701_v40  ;;  %v14595_v60 = vpack.c.bf16 %v3602_v55, %v3601_v38  ;;  %v1250_v40 = vld [vmem:[%s13976_s23 + $0x9] sm:$0xff]  ;;  %v1251_v38 = vld [vmem:[%s13976_s23 + $0x11] sm:$0xff] }
 0x1bb   : > { %11842 = vmatpush3.bf16.msra.mxu0 %v13666_v44  ;;  %v935_v44 = vld [vmem:[%s13906_s16 + $0x91] sm:$0xff]  ;;  %11425 = vmatprep.subr.bf16.mxu1 %v13702_v62  ;;  %v3911_v55 = vld [vmem:[%s13976_s23 + $0x44] sm:$0xff] }
 0x1bc   : > { %11843 = vmatprep.subr.bf16.mxu0 %v13667_v52  ;;  %v962_v16 = vpack.c.bf16 %v936_v45, %v935_v44  ;;  %v3908_v44 = vld [vmem:[%s13976_s23 + $0x2c] sm:$0xff]  ;;  %v969_v45 = vpack.c.bf16 %v950_v39, %v949_v35  ;;  %v3921_v35 = vld [vmem:[%s13976_s23 + $0x94] sm:$0xff] }
 0x1bd   : > { %v13820_v39 = vld [vmem:[%s16047_s2 + $0x98] sm:$0xff]  }
 0x1be   : > { %11808 = vmatmul.mubr.bf16.gmra.mrb[4].mxu0 %v14499_v53  ;;  %11426 = vmatpush3.bf16.msra.mxu1 %v13702_v62  ;;  %v1252_v62 = vld [vmem:[%s13976_s23 + $0x19] sm:$0xff] }
 0x1bf   : > { %11811 = vmatprep.mubr.bf16.mxu0 %v14501_v33  ;;  %11844 = vmatpush3.bf16.msra.mxu0 %v13667_v52  ;;  %v963_v52 = vpack.c.bf16 %v938_v51, %v937_v32  ;;  %v14650_v32 = vpack.c.bf16 %v3908_v44, %v3907_v27  ;;  %v3919_v27 = vld [vmem:[%s13976_s23 + $0x84] sm:$0xff] }
 0x1c0   : > { %11845 = vmatprep.subr.bf16.mxu0 %v13668_v54  ;;  %11427 = vmatprep.subr.bf16.mxu1 %v13704_v11  ;;  %v1258_v44 = vld [vmem:[%s13976_s23 + $0x49] sm:$0xff] }
 0x1c1   : > { %11392 = vmatmul.mubr.bf16.gmra.mrb[4].mxu1 %v956_v3  ;;  %v942_v3 = vld [vmem:[%s13906_s16 + $0xc9] sm:$0xff] }
 0x1c2   : > { %11395 = vmatprep.mubr.bf16.mxu1 %v957_v21  ;;  %v3607_v21 = vld [vmem:[%s13906_s16 + $0x124] sm:$0xff]  ;;  %11428 = vmatpush3.bf16.msra.mxu1 %v13704_v11  ;;  %v13684_v11 = vld [vmem:[%s16047_s2 + $0x198] sm:$0xff]  }
 0x1c3   : > { %11846 = vmatpush3.bf16.msra.mxu0 %v13668_v54  ;;  %v940_v54 = vld [vmem:[%s13906_s16 + $0xb9] sm:$0xff]  ;;  %11429 = vmatprep.subr.bf16.mxu1 %v13705_v22 }
 0x1c4   : > { %11847 = vmatprep.subr.bf16.mxu0 %v13671_v1  ;;  %v964_v57 = vpack.c.bf16 %v940_v54, %v939_v26  ;;  %v13711_v26 = vld [vmem:[%s16048_s3 + $0x78] sm:$0xff]   ;;  %v1249_v54 = vld [vmem:[%s13976_s23 + $0x1] sm:$0xff] }
 0x1c5   : > { %v1285_v61 = vpack.c.bf16 %v1250_v40, %v1249_v54  ;;  %v13696_v40 = vld [vmem:[%s16047_s2 + $0x1b8] sm:$0xff]  }
 0x1c6   : > { %11812 = vmatmul.mubr.bf16.gmra.mrb[8].mxu0 %v14519_v4  ;;  %11430 = vmatpush3.bf16.msra.mxu1 %v13705_v22  ;;  %v3915_v22 = vld [vmem:[%s13976_s23 + $0x64] sm:$0xff] }
 0x1c7   : > { %11815 = vmatprep.mubr.bf16.mxu0 %v14521_v5  ;;  %11848 = vmatpush3.bf16.msra.mxu0 %v13671_v1  ;;  %v941_v1 = vld [vmem:[%s13906_s16 + $0xc1] sm:$0xff] }
 0x1c8   : > { %11849 = vmatprep.subr.bf16.mxu0 %v13674_v6 }
 0x1c9   : > { %11396 = vmatmul.mubr.bf16.gmra.mrb[8].mxu1 %v958_v23  ;;  %v3608_v23 = vld [vmem:[%s13906_s16 + $0x12c] sm:$0xff] }
 0x1ca   : > { %11399 = vmatprep.mubr.bf16.mxu1 %v959_v50  ;;  %v13707_v50 = vld [vmem:[%s16048_s3 + $0x60] sm:$0xff]   ;;  %v14633_v2 = vpack.c.bf16 %v3608_v23, %v3607_v21  ;;  %v13818_v21 = vld [vmem:[%s16047_s2 + $0x88] sm:$0xff]  }
 0x1cb   : > { %11850 = vmatpush3.bf16.msra.mxu0 %v13674_v6  ;;  %v965_v6 = vpack.c.bf16 %v942_v3, %v941_v1  ;;  %11431 = vmatprep.subr.bf16.mxu1 %v13707_v50  ;;  %v3914_v1 = vld [vmem:[%s13976_s23 + $0x5c] sm:$0xff]  ;;  %v13683_v3 = vld [vmem:[%s16047_s2 + $0x190] sm:$0xff]  }
 0x1cc   : > { %11851 = vmatprep.subr.bf16.mxu0 %v13678_v20  ;;  %11432 = vmatpush3.bf16.msra.mxu1 %v13707_v50  ;;  %v14679_v9 = vpack.c.bf16 %v3914_v1, %v3913_v63  ;;  %v3916_v23 = vld [vmem:[%s13976_s23 + $0x6c] sm:$0xff] }
 0x1cd   : > { %11433 = vmatprep.subr.bf16.mxu1 %v13708_v34  ;;  %v1263_v1 = vld [vmem:[%s13976_s23 + $0x71] sm:$0xff] }
 0x1ce   : > { %11816 = vmatmul.mubr.bf16.gmra.mrb[12].mxu0 %v14539_v28 }
 0x1cf   : > { %11819 = vmatprep.mubr.bf16.mxu0 %v14541_v29  ;;  %11852 = vmatpush3.bf16.msra.mxu0 %v13678_v20  ;;  %v14615_v20 = vpack.c.bf16 %v3606_v13, %v3605_v12  ;;  %v1253_v12 = vld [vmem:[%s13976_s23 + $0x21] sm:$0xff]  ;;  %v1254_v13 = vld [vmem:[%s13976_s23 + $0x29] sm:$0xff] }
 0x1d0   : > { %11853 = vmatprep.subr.bf16.mxu0 %v13680_v30  ;;  %11434 = vmatpush3.bf16.msra.mxu1 %v13708_v34  ;;  %v3920_v34 = vld [vmem:[%s13976_s23 + $0x8c] sm:$0xff] }
 0x1d1   : > { %11400 = vmatmul.mubr.bf16.gmra.mrb[12].mxu1 %v960_v10  ;;  %v3941_v10 = vpack.c.bf16 %v3906_v58, %v3905_v56  ;;  %11435 = vmatprep.subr.bf16.mxu1 %v13709_v47  ;;  %v14700_v56 = vpack.c.bf16 %v3916_v23, %v3915_v22  ;;  %v13819_v58 = vld [vmem:[%s16047_s2 + $0x90] sm:$0xff]   ;;  %v3927_v22 = vld [vmem:[%s13976_s23 + $0xc4] sm:$0xff] }
 0x1d2   : > { %11403 = vmatprep.mubr.bf16.mxu1 %v961_v41  ;;  %v951_v41 = vld [vmem:[%s13906_s16 + $0x111] sm:$0xff]  ;;  %v1265_v23 = vld [vmem:[%s13976_s23 + $0x81] sm:$0xff] }
 0x1d3   : > { %11854 = vmatpush3.bf16.msra.mxu0 %v13680_v30  ;;  %v945_v30 = vld [vmem:[%s13906_s16 + $0xe1] sm:$0xff]  ;;  %v970_v25 = vpack.c.bf16 %v952_v46, %v951_v41 }
 0x1d4   : > { %11891 = vmatprep.subr.bf16.mxu0 %v14559_v8  ;;  %v967_v36 = vpack.c.bf16 %v946_v31, %v945_v30  ;;  %11436 = vmatpush3.bf16.msra.mxu1 %v13709_v47  ;;  %v1287_v30 = vpack.c.bf16 %v1254_v13, %v1253_v12  ;;  %v1256_v31 = vld [vmem:[%s13976_s23 + $0x39] sm:$0xff]  ;;  %v1257_v41 = vld [vmem:[%s13976_s23 + $0x41] sm:$0xff]  ;;  %v13694_v47 = vld [vmem:[%s16047_s2 + $0x1b0] sm:$0xff]  }
 0x1d5   : > { %11437 = vmatprep.subr.bf16.mxu1 %v13711_v26  ;;  %v3922_v46 = vld [vmem:[%s13976_s23 + $0x9c] sm:$0xff] }
 0x1d6   : > { %11820 = vmatmul.mubr.bf16.gmra.mrb[16].mxu0 %v14561_v18  ;;  %v14731_v54 = vpack.c.bf16 %v3922_v46, %v3921_v35 }
 0x1d7   : > { %11823 = vmatprep.mubr.bf16.mxu0 %v14563_v19 }
 0x1d8   : > { %11438 = vmatpush3.bf16.msra.mxu1 %v13711_v26  ;;  %v13821_v26 = vld [vmem:[%s16047_s2 + $0xa0] sm:$0xff]  }
 0x1d9   : > { %11404 = vmatmul.mubr.bf16.gmra.mrb[16].mxu1 %v962_v16  ;;  %v3909_v16 = vld [vmem:[%s13976_s23 + $0x34] sm:$0xff]  ;;  %12671 = vmatprep.subr.bf16.mxu1 %v13817_v7 }
 0x1da   : > { %11407 = vmatprep.mubr.bf16.mxu1 %v963_v52  ;;  %v14652_v51 = vpack.c.bf16 %v3910_v49, %v3909_v16  ;;  %v13682_v52 = vld [vmem:[%s16047_s2 + $0x188] sm:$0xff]   ;;  %v1289_v16 = vpack.c.bf16 %v1258_v44, %v1257_v41  ;;  %v1260_v49 = vld [vmem:[%s13976_s23 + $0x59] sm:$0xff] }
 0x1db   : > { %v1269_v41 = vld [vmem:[%s13976_s23 + $0xa1] sm:$0xff]  ;;  %v1270_v44 = vld [vmem:[%s13976_s23 + $0xa9] sm:$0xff] }
 0x1dc   : > { %v1295_v46 = vpack.c.bf16 %v1270_v44, %v1269_v41  ;;  %v1283_v41 = vld [vmem:[%s13976_s23 + $0x111] sm:$0xff] }
 0x1de   : > { %11824 = vmatmul.mubr.bf16.gmra.mrb[20].mxu0 %v14576_v17 }
 0x1df   : > { %11827 = vmatprep.mubr.bf16.mxu0 %v14578_v24 }
 0x1e1   : > { %11408 = vmatmul.mubr.bf16.gmra.mrb[20].mxu1 %v964_v57  ;;  %v3912_v57 = vld [vmem:[%s13976_s23 + $0x4c] sm:$0xff] }
 0x1e2   : > { %11411 = vmatprep.mubr.bf16.mxu1 %v965_v6  ;;  %v1286_v6 = vpack.c.bf16 %v1252_v62, %v1251_v38  ;;  %v3923_v38 = vld [vmem:[%s13976_s23 + $0xa4] sm:$0xff]  ;;  %v3924_v62 = vld [vmem:[%s13976_s23 + $0xac] sm:$0xff] }
 0x1e3   : > { %v14754_v13 = vpack.c.bf16 %v3924_v62, %v3923_v38  ;;  %v3936_v62 = vld [vmem:[%s13976_s23 + $0x10c] sm:$0xff] }
 0x1e6   : > { %11828 = vmatmul.mubr.bf16.gmra.mrb[24].mxu0 %v14593_v59 }
 0x1e7   : > { %11831 = vmatprep.mubr.bf16.mxu0 %v14595_v60 }
 0x1e9   : > { %11412 = vmatmul.mubr.bf16.gmra.mrb[24].mxu1 %v966_v14  ;;  %v1255_v14 = vld [vmem:[%s13976_s23 + $0x31] sm:$0xff] }
 0x1ea   : > { %11415 = vmatprep.mubr.bf16.mxu1 %v967_v36  ;;  %v3917_v36 = vld [vmem:[%s13976_s23 + $0x74] sm:$0xff]  ;;  %v1288_v50 = vpack.c.bf16 %v1256_v31, %v1255_v14 }
 0x1eb   : > { %v13823_v14 = vld [vmem:[%s16047_s2 + $0xb0] sm:$0xff]   ;;  %v13824_v31 = vld [vmem:[%s16047_s2 + $0xb8] sm:$0xff]  }
 0x1ee   : > { %11832 = vmatmul.mubr.bf16.gmra.mrb[28].mxu0 %v14613_v15 }
 0x1ef   : > { %11835 = vmatprep.mubr.bf16.mxu0 %v14615_v20 }
 0x1f1   : > { %11416 = vmatmul.mubr.bf16.gmra.mrb[28].mxu1 %v968_v0  ;;  %v14705_v0 = vpack.c.bf16 %v3918_v37, %v3917_v36  ;;  %v3928_v36 = vld [vmem:[%s13976_s23 + $0xcc] sm:$0xff] }
 0x1f2   : > { %11419 = vmatprep.mubr.bf16.mxu1 %v969_v45  ;;  %v1259_v45 = vld [vmem:[%s13976_s23 + $0x51] sm:$0xff] }
 0x1f6   : > { %11836 = vmatmul.mubr.bf16.gmra.mrb[32].mxu0 %v14633_v2 }
 0x1f7   : > { %11855 = vmatprep.mubr.bf16.mxu0 %v3941_v10  ;;  %v13690_v10 = vld [vmem:[%s16047_s2 + $0x1a8] sm:$0xff]  }
 0x1f9   : > { %11420 = vmatmul.mubr.bf16.gmra.mrb[32].mxu1 %v970_v25  ;;  %v1290_v25 = vpack.c.bf16 %v1260_v49, %v1259_v45  ;;  %v3932_v45 = vld [vmem:[%s13976_s23 + $0xec] sm:$0xff]  ;;  %v3933_v49 = vld [vmem:[%s13976_s23 + $0xf4] sm:$0xff] }
 0x1fa   : > { %11439 = vmatprep.mubr.bf16.mxu1 %v1285_v61  ;;  %v13822_v61 = vld [vmem:[%s16047_s2 + $0xa8] sm:$0xff]  }
 0x1fe   : > { %11856 = vmatmul.mubr.bf16.vlgmr.msra.gmra.mrb[0].mxu0 %v14650_v32 }
 0x1ff   : > { %11892 = vmatpush3.bf16.msra.mxu0 %v14559_v8  ;;  %11859 = vmatprep.mubr.bf16.mxu0 %v14652_v51  ;;  %v14674_v8 = vpack.c.bf16 %v3912_v57, %v3911_v55  ;;  %v1261_v55 = vld [vmem:[%s13976_s23 + $0x61] sm:$0xff]  ;;  %v1262_v57 = vld [vmem:[%s13976_s23 + $0x69] sm:$0xff] }
 0x200   : > { %11893 = vmatprep.subr.bf16.mxu0 %v13682_v52  ;;  %v1291_v63 = vpack.c.bf16 %v1262_v57, %v1261_v55  ;;  %v3935_v55 = vld [vmem:[%s13976_s23 + $0x104] sm:$0xff] }
 0x201   : > { %11440 = vmatmul.mubr.bf16.vlgmr.msra.gmra.mrb[0].mxu1 %v1286_v6  ;;  %v3925_v6 = vld [vmem:[%s13976_s23 + $0xb4] sm:$0xff]  ;;  %v1273_v57 = vld [vmem:[%s13976_s23 + $0xc1] sm:$0xff] }
 0x202   : > { %12679 = vmatpush3.bf16.msra.mxu1 %v13817_v7  ;;  %11443 = vmatprep.mubr.bf16.mxu1 %v1287_v30  ;;  %v3926_v7 = vld [vmem:[%s13976_s23 + $0xbc] sm:$0xff]  ;;  %v1266_v30 = vld [vmem:[%s13976_s23 + $0x89] sm:$0xff] }
 0x203   : > { %11894 = vmatpush3.bf16.msra.mxu0 %v13682_v52  ;;  %12672 = vmatprep.subr.bf16.mxu1 %v13818_v21  ;;  %v14726_v52 = vpack.c.bf16 %v3920_v34, %v3919_v27  ;;  %v1293_v37 = vpack.c.bf16 %v1266_v30, %v1265_v23  ;;  %v14775_v34 = vpack.c.bf16 %v3928_v36, %v3927_v22  ;;  %v3939_v23 = vld [vmem:[%s13976_s23 + $0x124] sm:$0xff]  ;;  %v3940_v36 = vld [vmem:[%s13976_s23 + $0x12c] sm:$0xff] }
 0x204   : > { %11895 = vmatprep.subr.bf16.mxu0 %v13683_v3  ;;  %v1277_v30 = vld [vmem:[%s13976_s23 + $0xe1] sm:$0xff] }
 0x206   : > { %11860 = vmatmul.mubr.bf16.gmra.mrb[4].mxu0 %v14674_v8  ;;  %12680 = vmatpush3.bf16.msra.mxu1 %v13818_v21  ;;  %v14759_v21 = vpack.c.bf16 %v3926_v7, %v3925_v6  ;;  %v3937_v6 = vld [vmem:[%s13976_s23 + $0x114] sm:$0xff]  ;;  %v3938_v7 = vld [vmem:[%s13976_s23 + $0x11c] sm:$0xff] }
 0x207   : > { %11863 = vmatprep.mubr.bf16.mxu0 %v14679_v9  ;;  %11896 = vmatpush3.bf16.msra.mxu0 %v13683_v3  ;;  %v1264_v3 = vld [vmem:[%s13976_s23 + $0x79] sm:$0xff]  ;;  %v14805_v22 = vpack.c.bf16 %v3938_v7, %v3937_v6  ;;  %v1606_v6 = vld [vmem:[%s13906_s16 + $0xca] sm:$0xff] }
 0x208   : > { %11897 = vmatprep.subr.bf16.mxu0 %v13684_v11  ;;  %12673 = vmatprep.subr.bf16.mxu1 %v13819_v58  ;;  %v1292_v12 = vpack.c.bf16 %v1264_v3, %v1263_v1  ;;  %v1275_v1 = vld [vmem:[%s13976_s23 + $0xd1] sm:$0xff]  ;;  %v1276_v3 = vld [vmem:[%s13976_s23 + $0xd9] sm:$0xff] }
 0x209   : > { %11444 = vmatmul.mubr.bf16.gmra.mrb[4].mxu1 %v1288_v50  ;;  %v1268_v50 = vld [vmem:[%s13976_s23 + $0x99] sm:$0xff] }
 0x20a   : > { %12681 = vmatpush3.bf16.msra.mxu1 %v13819_v58  ;;  %11447 = vmatprep.mubr.bf16.mxu1 %v1289_v16  ;;  %v3929_v58 = vld [vmem:[%s13976_s23 + $0xd4] sm:$0xff] }
 0x20b   : > { %11898 = vmatpush3.bf16.msra.mxu0 %v13684_v11  ;;  %12674 = vmatprep.subr.bf16.mxu1 %v13820_v39  ;;  %v14752_v11 = vld [vmem:[%s16048_s3 + $0x180] sm:$0xff]   ;;  %v1607_v7 = vld [vmem:[%s13906_s16 + $0xd2] sm:$0xff] }
 0x20c   : > { %11899 = vmatprep.subr.bf16.mxu0 %v13687_v48  ;;  %v1272_v16 = vld [vmem:[%s13976_s23 + $0xb9] sm:$0xff] }
 0x20e   : > { %11864 = vmatmul.mubr.bf16.gmra.mrb[8].mxu0 %v14700_v56  ;;  %12682 = vmatpush3.bf16.msra.mxu1 %v13820_v39  ;;  %v3931_v39 = vld [vmem:[%s13976_s23 + $0xe4] sm:$0xff] }
 0x20f   : > { %11867 = vmatprep.mubr.bf16.mxu0 %v14705_v0  ;;  %11900 = vmatpush3.bf16.msra.mxu0 %v13687_v48  ;;  %v1267_v48 = vld [vmem:[%s13976_s23 + $0x91] sm:$0xff] }
 0x210   : > { %11901 = vmatprep.subr.bf16.mxu0 %v13690_v10  ;;  %12675 = vmatprep.subr.bf16.mxu1 %v13821_v26  ;;  %v1294_v27 = vpack.c.bf16 %v1268_v50, %v1267_v48  ;;  %v1279_v48 = vld [vmem:[%s13976_s23 + $0xf1] sm:$0xff]  ;;  %v1280_v50 = vld [vmem:[%s13976_s23 + $0xf9] sm:$0xff] }
 0x211   : > { %11448 = vmatmul.mubr.bf16.gmra.mrb[8].mxu1 %v1290_v25  ;;  %v3934_v25 = vld [vmem:[%s13976_s23 + $0xfc] sm:$0xff] }
 0x212   : > { %12683 = vmatpush3.bf16.msra.mxu1 %v13821_v26  ;;  %11451 = vmatprep.mubr.bf16.mxu1 %v1291_v63  ;;  %v14791_v38 = vpack.c.bf16 %v3934_v25, %v3933_v49  ;;  %v1598_v49 = vld [vmem:[%s13906_s16 + $0x8a] sm:$0xff]  ;;  %v1599_v25 = vld [vmem:[%s13906_s16 + $0x92] sm:$0xff] }
 0x213   : > { %11902 = vmatpush3.bf16.msra.mxu0 %v13690_v10  ;;  %12676 = vmatprep.subr.bf16.mxu1 %v13822_v61  ;;  %v3930_v10 = vld [vmem:[%s13976_s23 + $0xdc] sm:$0xff] }
 0x214   : > { %11903 = vmatprep.subr.bf16.mxu0 %v13694_v47  ;;  %v14777_v35 = vpack.c.bf16 %v3930_v10, %v3929_v58  ;;  %v1300_v58 = vpack.c.bf16 %v1280_v50, %v1279_v48  ;;  %v14815_v10 = vpack.c.bf16 %v3940_v36, %v3939_v23  ;;  %v1610_v36 = vld [vmem:[%s13906_s16 + $0xea] sm:$0xff]  ;;  %v1611_v48 = vld [vmem:[%s13906_s16 + $0xf2] sm:$0xff]  ;;  %v1612_v50 = vld [vmem:[%s13906_s16 + $0xfa] sm:$0xff] }
 0x216   : > { %11868 = vmatmul.mubr.bf16.gmra.mrb[12].mxu0 %v14726_v52  ;;  %12684 = vmatpush3.bf16.msra.mxu1 %v13822_v61  ;;  %v1274_v61 = vld [vmem:[%s13976_s23 + $0xc9] sm:$0xff] }
 0x217   : > { %11871 = vmatprep.mubr.bf16.mxu0 %v14731_v54  ;;  %11904 = vmatpush3.bf16.msra.mxu0 %v13694_v47  ;;  %v1271_v47 = vld [vmem:[%s13976_s23 + $0xb1] sm:$0xff]  ;;  %v1297_v63 = vpack.c.bf16 %v1274_v61, %v1273_v57 }
 0x218   : > { %11905 = vmatprep.subr.bf16.mxu0 %v13696_v40  ;;  %12677 = vmatprep.subr.bf16.mxu1 %v13823_v14  ;;  %v1296_v26 = vpack.c.bf16 %v1272_v16, %v1271_v47  ;;  %v13698_v47 = vld [vmem:[%s16048_s3 + $0x188] sm:$0xff]   ;;  %v1603_v61 = vld [vmem:[%s13906_s16 + $0xb2] sm:$0xff] }
 0x219   : > { %11452 = vmatmul.mubr.bf16.gmra.mrb[12].mxu1 %v1292_v12  ;;  %v1298_v12 = vpack.c.bf16 %v1276_v3, %v1275_v1  ;;  %v1597_v16 = vld [vmem:[%s13906_s16 + $0x82] sm:$0xff] }
 0x21a   : > { %12685 = vmatpush3.bf16.msra.mxu1 %v13823_v14  ;;  %11455 = vmatprep.mubr.bf16.mxu1 %v1293_v37  ;;  %v14803_v14 = vpack.c.bf16 %v3936_v62, %v3935_v55  ;;  %v13699_v55 = vld [vmem:[%s16048_s3 + $0x190] sm:$0xff]   ;;  %v13703_v1 = vld [vmem:[%s16048_s3 + $0x1a0] sm:$0xff]  }
 0x21b   : > { %11906 = vmatpush3.bf16.msra.mxu0 %v13696_v40  ;;  %12678 = vmatprep.subr.bf16.mxu1 %v13824_v31  ;;  %v14789_v40 = vpack.c.bf16 %v3932_v45, %v3931_v39  ;;  %v1282_v39 = vld [vmem:[%s13976_s23 + $0x109] sm:$0xff]  ;;  %v1284_v45 = vld [vmem:[%s13976_s23 + $0x119] sm:$0xff] }
 0x21c   : > { %11943 = vmatprep.subr.bf16.mxu0 %v14752_v11 }
 0x21e   : > { %11872 = vmatmul.mubr.bf16.gmra.mrb[16].mxu0 %v14754_v13  ;;  %12686 = vmatpush3.bf16.msra.mxu1 %v13824_v31  ;;  %v1278_v31 = vld [vmem:[%s13976_s23 + $0xe9] sm:$0xff] }
 0x21f   : > { %11875 = vmatprep.mubr.bf16.mxu0 %v14759_v21  ;;  %v1299_v37 = vpack.c.bf16 %v1278_v31, %v1277_v30  ;;  %v1608_v30 = vld [vmem:[%s13906_s16 + $0xda] sm:$0xff] }
 0x220   : > { %v1630_v31 = vpack.c.bf16 %v1608_v30, %v1607_v7  ;;  %v4919_v30 = vld [vmem:[%s13906_s16 + $0xb5] sm:$0xff] }
 0x221   : > { %11456 = vmatmul.mubr.bf16.gmra.mrb[16].mxu1 %v1294_v27  ;;  %v1281_v27 = vld [vmem:[%s13976_s23 + $0x101] sm:$0xff] }
 0x222   : > { %11459 = vmatprep.mubr.bf16.mxu1 %v1295_v46  ;;  %v1301_v44 = vpack.c.bf16 %v1282_v39, %v1281_v27  ;;  %v1302_v46 = vpack.c.bf16 %v1284_v45, %v1283_v41  ;;  %v1632_v27 = vpack.c.bf16 %v1612_v50, %v1611_v48  ;;  %v1615_v41 = vld [vmem:[%s13906_s16 + $0x112] sm:$0xff]  ;;  %v14981_v50 = vld [vmem:[%s16052_s7] sm:$0xff] }
 0x226   : > { %11876 = vmatmul.mubr.bf16.gmra.mrb[20].mxu0 %v14775_v34 }
 0x227   : > { %11879 = vmatprep.mubr.bf16.mxu0 %v14777_v35 }
 0x229   : > { %11460 = vmatmul.mubr.bf16.gmra.mrb[20].mxu1 %v1296_v26  ;;  %v1600_v26 = vld [vmem:[%s13906_s16 + $0x9a] sm:$0xff] }
 0x22a   : > { %11463 = vmatprep.mubr.bf16.mxu1 %v1297_v63  ;;  %v1626_v57 = vpack.c.bf16 %v1600_v26, %v1599_v25  ;;  %v1604_v63 = vld [vmem:[%s13906_s16 + $0xba] sm:$0xff] }
 0x22b   : > { %v1628_v3 = vpack.c.bf16 %v1604_v63, %v1603_v61  ;;  %v13724_v26 = vld [vmem:[%s16048_s3 + $0x1d8] sm:$0xff]   ;;  %v13726_v63 = vld [vmem:[%s16048_s3 + $0x1e8] sm:$0xff]  }
 0x22e   : > { %11880 = vmatmul.mubr.bf16.gmra.mrb[24].mxu0 %v14789_v40 }
 0x22f   : > { %11883 = vmatprep.mubr.bf16.mxu0 %v14791_v38 }
 0x231   : > { %11464 = vmatmul.mubr.bf16.gmra.mrb[24].mxu1 %v1298_v12  ;;  %v13710_v12 = vld [vmem:[%s16048_s3 + $0x1b0] sm:$0xff]  }
 0x232   : > { %11467 = vmatprep.mubr.bf16.mxu1 %v1299_v37 }
 0x236   : > { %11884 = vmatmul.mubr.bf16.gmra.mrb[28].mxu0 %v14803_v14 }
 0x237   : > { %11887 = vmatprep.mubr.bf16.mxu0 %v14805_v22 }
 0x239   : > { %11468 = vmatmul.mubr.bf16.gmra.mrb[28].mxu1 %v1300_v58  ;;  %v13713_v58 = vld [vmem:[%s16047_s2 + $0x1c0] sm:$0xff]  }
 0x23a   : > { %11471 = vmatprep.mubr.bf16.mxu1 %v1301_v44  ;;  %v1616_v44 = vld [vmem:[%s13906_s16 + $0x11a] sm:$0xff] }
 0x23b   : > { %v1634_v45 = vpack.c.bf16 %v1616_v44, %v1615_v41 }
 0x23e   : > { %11888 = vmatmul.mubr.bf16.gmra.mrb[32].mxu0 %v14815_v10 }
 0x23f   : > { %11907 = vmatprep.mubr.bf16.mxu0 %v14475_v42  ;;  %v1625_v42 = vpack.c.bf16 %v1598_v49, %v1597_v16  ;;  %v4910_v16 = vld [vmem:[%s13906_s16 + $0x6d] sm:$0xff] }
 0x240   : > { %v13723_v49 = vld [vmem:[%s16048_s3 + $0x1d0] sm:$0xff]  }
 0x241   : > { %11472 = vmatmul.mubr.bf16.gmra.mrb[32].mxu1 %v1302_v46 }
 0x242   : > { %11507 = vmatprep.mubr.bf16.mxu1 %v1625_v42 }
 0x246   : > { %11908 = vmatmul.mubr.bf16.vlgmr.msra.gmra.mrb[0].mxu0 %v14477_v43  ;;  %v13700_v43 = vld [vmem:[%s16048_s3 + $0x198] sm:$0xff]  }
 0x247   : > { %11944 = vmatpush3.bf16.msra.mxu0 %v14752_v11  ;;  %11911 = vmatprep.mubr.bf16.mxu0 %v14499_v53  ;;  %v1601_v53 = vld [vmem:[%s13906_s16 + $0xa2] sm:$0xff]  ;;  %v1602_v11 = vld [vmem:[%s13906_s16 + $0xaa] sm:$0xff] }
 0x248   : > { %11945 = vmatprep.subr.bf16.mxu0 %v13698_v47  ;;  %v1627_v62 = vpack.c.bf16 %v1602_v11, %v1601_v53  ;;  %v4914_v53 = vld [vmem:[%s13906_s16 + $0x8d] sm:$0xff]  ;;  %v13725_v11 = vld [vmem:[%s16048_s3 + $0x1e0] sm:$0xff]  }
 0x249   : > { %11508 = vmatmul.mubr.bf16.vlgmr.msra.gmra.mrb[16].mxu1 %v1626_v57  ;;  %v4912_v57 = vld [vmem:[%s13906_s16 + $0x7d] sm:$0xff] }
 0x24a   : > { %11511 = vmatprep.mubr.bf16.mxu1 %v1627_v62 }
 0x24b   : > { %11946 = vmatpush3.bf16.msra.mxu0 %v13698_v47  ;;  %v4909_v47 = vld [vmem:[%s13906_s16 + $0x65] sm:$0xff] }
 0x24c   : > { %11947 = vmatprep.subr.bf16.mxu0 %v13699_v55  ;;  %v4941_v42 = vpack.c.bf16 %v4910_v16, %v4909_v47 }
 0x24e   : > { %11912 = vmatmul.mubr.bf16.gmra.mrb[4].mxu0 %v14501_v33  ;;  %v13706_v33 = vld [vmem:[%s16048_s3 + $0x1a8] sm:$0xff]  }
 0x24f   : > { %11915 = vmatprep.mubr.bf16.mxu0 %v14519_v4  ;;  %11948 = vmatpush3.bf16.msra.mxu0 %v13699_v55  ;;  %v1605_v4 = vld [vmem:[%s13906_s16 + $0xc2] sm:$0xff]  ;;  %v4911_v55 = vld [vmem:[%s13906_s16 + $0x75] sm:$0xff] }
 0x250   : > { %11949 = vmatprep.subr.bf16.mxu0 %v13700_v43  ;;  %v1629_v23 = vpack.c.bf16 %v1606_v6, %v1605_v4  ;;  %v4942_v61 = vpack.c.bf16 %v4912_v57, %v4911_v55  ;;  %v4918_v4 = vld [vmem:[%s13906_s16 + $0xad] sm:$0xff]  ;;  %v5233_v57 = vld [vmem:[%s13976_s23 + $0x25] sm:$0xff] }
 0x251   : > { %11512 = vmatmul.mubr.bf16.gmra.mrb[20].mxu1 %v1628_v3  ;;  %v4916_v3 = vld [vmem:[%s13906_s16 + $0x9d] sm:$0xff]  ;;  %v13727_v6 = vld [vmem:[%s16048_s3 + $0x1f0] sm:$0xff]  }
 0x252   : > { %11515 = vmatprep.mubr.bf16.mxu1 %v1629_v23  ;;  %v13728_v23 = vld [vmem:[%s16048_s3 + $0x1f8] sm:$0xff]  }
 0x253   : > { %11950 = vmatpush3.bf16.msra.mxu0 %v13700_v43  ;;  %v4913_v43 = vld [vmem:[%s13906_s16 + $0x85] sm:$0xff] }
 0x254   : > { %11951 = vmatprep.subr.bf16.mxu0 %v13703_v1  ;;  %v4943_v62 = vpack.c.bf16 %v4914_v53, %v4913_v43  ;;  %v5234_v43 = vld [vmem:[%s13976_s23 + $0x2d] sm:$0xff] }
 0x256   : > { %11916 = vmatmul.mubr.bf16.gmra.mrb[8].mxu0 %v14521_v5  ;;  %v13712_v5 = vld [vmem:[%s16048_s3 + $0x1b8] sm:$0xff]  }
 0x257   : > { %11919 = vmatprep.mubr.bf16.mxu0 %v14539_v28  ;;  %11952 = vmatpush3.bf16.msra.mxu0 %v13703_v1  ;;  %v1609_v28 = vld [vmem:[%s13906_s16 + $0xe2] sm:$0xff]  ;;  %v4915_v1 = vld [vmem:[%s13906_s16 + $0x95] sm:$0xff] }
 0x258   : > { %11953 = vmatprep.subr.bf16.mxu0 %v13706_v33  ;;  %v1631_v37 = vpack.c.bf16 %v1610_v36, %v1609_v28  ;;  %v4944_v7 = vpack.c.bf16 %v4916_v3, %v4915_v1  ;;  %v4922_v28 = vld [vmem:[%s13906_s16 + $0xcd] sm:$0xff]  ;;  %v14975_v36 = vld [vmem:[%s16047_s2 + $0x200] sm:$0xff]   ;;  %v5269_v1 = vpack.c.bf16 %v5234_v43, %v5233_v57 }
 0x259   : > { %11516 = vmatmul.mubr.bf16.gmra.mrb[24].mxu1 %v1630_v31  ;;  %v4920_v31 = vld [vmem:[%s13906_s16 + $0xbd] sm:$0xff]  ;;  %v5245_v43 = vld [vmem:[%s13976_s23 + $0x85] sm:$0xff] }
 0x25a   : > { %11519 = vmatprep.mubr.bf16.mxu1 %v1631_v37  ;;  %v4946_v37 = vpack.c.bf16 %v4920_v31, %v4919_v30  ;;  %v5238_v30 = vld [vmem:[%s13976_s23 + $0x4d] sm:$0xff] }
 0x25b   : > { %11954 = vmatpush3.bf16.msra.mxu0 %v13706_v33  ;;  %v4917_v33 = vld [vmem:[%s13906_s16 + $0xa5] sm:$0xff] }
 0x25c   : > { %11955 = vmatprep.subr.bf16.mxu0 %v13710_v12 }
 0x25e   : > { %11920 = vmatmul.mubr.bf16.gmra.mrb[12].mxu0 %v14541_v29  ;;  %v1613_v29 = vld [vmem:[%s13906_s16 + $0x102] sm:$0xff] }
 0x25f   : > { %11923 = vmatprep.mubr.bf16.mxu0 %v14561_v18  ;;  %11956 = vmatpush3.bf16.msra.mxu0 %v13710_v12  ;;  %v1614_v18 = vld [vmem:[%s13906_s16 + $0x10a] sm:$0xff]  ;;  %v4945_v12 = vpack.c.bf16 %v4918_v4, %v4917_v33 }
 0x260   : > { %11957 = vmatprep.subr.bf16.mxu0 %v13712_v5  ;;  %v1633_v39 = vpack.c.bf16 %v1614_v18, %v1613_v29  ;;  %v13833_v29 = vmov 0   ;;  %v4925_v18 = vld [vmem:[%s13906_s16 + $0xe5] sm:$0xff]  ;;  %v15106_v4 = vld [vmem:[%s16052_s7 + $0x70] sm:$0xff] }
 0x261   : > { %11520 = vmatmul.mubr.bf16.gmra.mrb[28].mxu1 %v1632_v27  ;;  %v4924_v27 = vld [vmem:[%s13906_s16 + $0xdd] sm:$0xff]  ;;  %13599 = vset.pattern.permute.xlu0 %v13833_v29  ;;  %v15101_v33 = vld [vmem:[%s16052_s7 + $0x68] sm:$0xff] }
 0x262   : > { %11523 = vmatprep.mubr.bf16.mxu1 %v1633_v39  ;;  %v4926_v39 = vld [vmem:[%s13906_s16 + $0xed] sm:$0xff]  ;;  %6346 = vperm.xlu0 %13599, %v14981_v50  }
 0x263   : > { %11958 = vmatpush3.bf16.msra.mxu0 %v13712_v5  ;;  %v4921_v5 = vld [vmem:[%s13906_s16 + $0xc5] sm:$0xff]  ;;  %13600 = vset.pattern.permute.xlu1 %v13833_v29  ;;  %v4949_v44 = vpack.c.bf16 %v4926_v39, %v4925_v18  ;;  %v15143_v18 = vld [vmem:[%s16052_s7 + $0x90] sm:$0xff] }
 0x264   : > { %11995 = vmatprep.subr.bf16.mxu0 %v13713_v58  ;;  %v4947_v48 = vpack.c.bf16 %v4922_v28, %v4921_v5  ;;  %v15121_v5 = vld [vmem:[%s16052_s7 + $0x78] sm:$0xff]  ;;  %v15138_v29 = vld [vmem:[%s16052_s7 + $0x88] sm:$0xff] }
 0x265   : > { %v5239_v39 = vld [vmem:[%s13976_s23 + $0x55] sm:$0xff] }
 0x266   : > { %11924 = vmatmul.mubr.bf16.gmra.mrb[16].mxu0 %v14563_v19  ;;  %v4271_v19 = vld [vmem:[%s13906_s16 + $0x134] sm:$0xff] }
 0x267   : > { %11927 = vmatprep.mubr.bf16.mxu0 %v14576_v17  ;;  %v4272_v17 = vld [vmem:[%s13906_s16 + $0x13c] sm:$0xff] }
 0x268   : > { %v4290_v46 = vpack.c.bf16 %v4272_v17, %v4271_v19  ;;  %v14993_v19 = vld [vmem:[%s16052_s7 + $0x10] sm:$0xff]  ;;  %v14998_v17 = vld [vmem:[%s16052_s7 + $0x8] sm:$0xff] }
 0x269   : > { %11524 = vmatmul.mubr.bf16.gmra.mrb[32].mxu1 %v1634_v45  ;;  %6356 = vperm.xlu1 %13600, %v14993_v19  }
 0x26a   : > { %6351 = vperm.xlu0 %13599, %v14998_v17  }
 0x26e   : > { %11928 = vmatmul.mubr.bf16.gmra.mrb[20].mxu0 %v14578_v24  ;;  %v13714_v24 = vld [vmem:[%s16047_s2 + $0x1c8] sm:$0xff]  }
 0x26f   : > { %11931 = vmatprep.mubr.bf16.mxu0 %v14593_v59  ;;  %v13715_v59 = vld [vmem:[%s16047_s2 + $0x1d0] sm:$0xff]  }
 0x276   : > { %11932 = vmatmul.mubr.bf16.gmra.mrb[24].mxu0 %v14595_v60  ;;  %v13716_v60 = vld [vmem:[%s16047_s2 + $0x1d8] sm:$0xff]  }
 0x277   : > { %11935 = vmatprep.mubr.bf16.mxu0 %v14613_v15  ;;  %v13717_v15 = vld [vmem:[%s16047_s2 + $0x1e0] sm:$0xff]  }
 0x27e   : > { %11936 = vmatmul.mubr.bf16.gmra.mrb[28].mxu0 %v14615_v20  ;;  %v13718_v20 = vld [vmem:[%s16047_s2 + $0x1e8] sm:$0xff]  }
 0x27f   : > { %11939 = vmatprep.mubr.bf16.mxu0 %v14633_v2  ;;  %v13719_v2 = vld [vmem:[%s16047_s2 + $0x1f0] sm:$0xff]  }
 0x286   : > { %11940 = vmatmul.mubr.bf16.gmra.mrb[32].mxu0 %v4290_v46  ;;  %v4927_v46 = vld [vmem:[%s13906_s16 + $0xf5] sm:$0xff] }
 0x287   : > { %11959 = vmatprep.mubr.bf16.mxu0 %v14650_v32  ;;  %v13720_v32 = vld [vmem:[%s16047_s2 + $0x1f8] sm:$0xff]  }
 0x28e   : > { %11960 = vmatmul.mubr.bf16.vlgmr.msra.gmra.mrb[0].mxu0 %v14652_v51  ;;  %v13721_v51 = vld [vmem:[%s16048_s3 + $0x1c0] sm:$0xff]  }
 0x28f   : > { %11996 = vmatpush3.bf16.msra.mxu0 %v13713_v58  ;;  %11963 = vmatprep.mubr.bf16.mxu0 %v14674_v8  ;;  %v4603_v8 = vld [vmem:[%s13976_s23 + $0x134] sm:$0xff] }
 0x290   : > { %11997 = vmatprep.subr.bf16.mxu0 %v13714_v24  ;;  %v4923_v58 = vld [vmem:[%s13906_s16 + $0xd5] sm:$0xff] }
 0x291   : > { %v4948_v41 = vpack.c.bf16 %v4924_v27, %v4923_v58  ;;  %v13730_v27 = vld [vmem:[%s16047_s2 + $0x208] sm:$0xff]  }
 0x293   : > { %11998 = vmatpush3.bf16.msra.mxu0 %v13714_v24  ;;  %v4928_v24 = vld [vmem:[%s13906_s16 + $0xfd] sm:$0xff] }
 0x294   : > { %11999 = vmatprep.subr.bf16.mxu0 %v13715_v59 }
 0x296   : > { %11964 = vmatmul.mubr.bf16.gmra.mrb[4].mxu0 %v14679_v9  ;;  %v4604_v9 = vld [vmem:[%s13976_s23 + $0x13c] sm:$0xff] }
 0x297   : > { %11967 = vmatprep.mubr.bf16.mxu0 %v14700_v56  ;;  %12000 = vmatpush3.bf16.msra.mxu0 %v13715_v59  ;;  %v4901_v56 = vld [vmem:[%s13906_s16 + $0x25] sm:$0xff] }
 0x298   : > { %12001 = vmatprep.subr.bf16.mxu0 %v13716_v60 }
 0x29b   : > { %12002 = vmatpush3.bf16.msra.mxu0 %v13716_v60  ;;  %v4929_v60 = vld [vmem:[%s13906_s16 + $0x105] sm:$0xff] }
 0x29c   : > { %12003 = vmatprep.subr.bf16.mxu0 %v13717_v15 }
 0x29e   : > { %11968 = vmatmul.mubr.bf16.gmra.mrb[8].mxu0 %v14705_v0  ;;  %v4902_v0 = vld [vmem:[%s13906_s16 + $0x2d] sm:$0xff] }
 0x29f   : > { %11971 = vmatprep.mubr.bf16.mxu0 %v14726_v52  ;;  %12004 = vmatpush3.bf16.msra.mxu0 %v13717_v15  ;;  %v4622_v52 = vpack.c.bf16 %v4604_v9, %v4603_v8  ;;  %v4930_v15 = vld [vmem:[%s13906_s16 + $0x10d] sm:$0xff]  ;;  %v4950_v8 = vpack.c.bf16 %v4928_v24, %v4927_v46  ;;  %v5241_v46 = vld [vmem:[%s13976_s23 + $0x65] sm:$0xff] }
 0x2a0   : > { %12005 = vmatprep.subr.bf16.mxu0 %v13718_v20  ;;  %v4951_v9 = vpack.c.bf16 %v4930_v15, %v4929_v60  ;;  %v5242_v24 = vld [vmem:[%s13976_s23 + $0x6d] sm:$0xff] }
 0x2a1   : > { %v13731_v60 = vld [vmem:[%s16047_s2 + $0x210] sm:$0xff]  }
 0x2a3   : > { %12006 = vmatpush3.bf16.msra.mxu0 %v13718_v20 }
 0x2a4   : > { %12007 = vmatprep.subr.bf16.mxu0 %v13719_v2 }
 0x2a6   : > { %11972 = vmatmul.mubr.bf16.gmra.mrb[12].mxu0 %v14731_v54  ;;  %v4937_v54 = vpack.c.bf16 %v4902_v0, %v4901_v56  ;;  %v15029_v0 = vld [vmem:[%s16052_s7 + $0x28] sm:$0xff] }
 0x2a7   : > { %11975 = vmatprep.mubr.bf16.mxu0 %v14754_v13  ;;  %12008 = vmatpush3.bf16.msra.mxu0 %v13719_v2  ;;  %v4903_v13 = vld [vmem:[%s13906_s16 + $0x35] sm:$0xff] }
 0x2a8   : > { %12009 = vmatprep.subr.bf16.mxu0 %v13720_v32  ;;  %v15013_v2 = vld [vmem:[%s16052_s7 + $0x18] sm:$0xff] }
 0x2a9   : > { %6361 = vperm.xlu1 %13600, %v15013_v2  }
 0x2ab   : > { %12010 = vmatpush3.bf16.msra.mxu0 %v13720_v32 }
 0x2ac   : > { %12047 = vmatprep.subr.bf16.mxu0 %v13721_v51 }
 0x2ad   : > { %6371 = vperm.xlu1 %13600, %v15029_v0  }
 0x2ae   : > { %11976 = vmatmul.mubr.bf16.gmra.mrb[16].mxu0 %v14759_v21  ;;  %v4904_v21 = vld [vmem:[%s13906_s16 + $0x3d] sm:$0xff] }
 0x2af   : > { %11979 = vmatprep.mubr.bf16.mxu0 %v14775_v34  ;;  %v4905_v34 = vld [vmem:[%s13906_s16 + $0x45] sm:$0xff] }
 0x2b6   : > { %11980 = vmatmul.mubr.bf16.gmra.mrb[20].mxu0 %v14777_v35  ;;  %v4906_v35 = vld [vmem:[%s13906_s16 + $0x4d] sm:$0xff] }
 0x2b7   : > { %11983 = vmatprep.mubr.bf16.mxu0 %v14789_v40  ;;  %v4938_v40 = vpack.c.bf16 %v4904_v21, %v4903_v13  ;;  %v4932_v13 = vld [vmem:[%s13906_s16 + $0x11d] sm:$0xff] }
 0x2be   : > { %11984 = vmatmul.mubr.bf16.gmra.mrb[24].mxu0 %v14791_v38  ;;  %v4939_v38 = vpack.c.bf16 %v4906_v35, %v4905_v34  ;;  %v4933_v34 = vld [vmem:[%s13906_s16 + $0x125] sm:$0xff]  ;;  %v4934_v35 = vld [vmem:[%s13906_s16 + $0x12d] sm:$0xff] }
 0x2bf   : > { %11987 = vmatprep.mubr.bf16.mxu0 %v14803_v14  ;;  %v13722_v14 = vld [vmem:[%s16048_s3 + $0x1c8] sm:$0xff]   ;;  %v4953_v47 = vpack.c.bf16 %v4934_v35, %v4933_v34  ;;  %v5273_v34 = vpack.c.bf16 %v5242_v24, %v5241_v46  ;;  %v13732_v35 = vld [vmem:[%s16047_s2 + $0x218] sm:$0xff]   ;;  %v15228_v46 = vld [vmem:[%s16052_s7 + $0xd0] sm:$0xff] }
 0x2c0   : > { %v5247_v24 = vld [vmem:[%s13976_s23 + $0x95] sm:$0xff] }
 0x2c6   : > { %11988 = vmatmul.mubr.bf16.gmra.mrb[28].mxu0 %v14805_v22  ;;  %v4907_v22 = vld [vmem:[%s13906_s16 + $0x55] sm:$0xff] }
 0x2c7   : > { %11991 = vmatprep.mubr.bf16.mxu0 %v14815_v10  ;;  %v4908_v10 = vld [vmem:[%s13906_s16 + $0x5d] sm:$0xff] }
 0x2c8   : > { %v4940_v25 = vpack.c.bf16 %v4908_v10, %v4907_v22  ;;  %v15056_v22 = vld [vmem:[%s16052_s7 + $0x40] sm:$0xff] }
 0x2ce   : > { %11992 = vmatmul.mubr.bf16.gmra.mrb[32].mxu0 %v4622_v52  ;;  %v15034_v52 = vld [vmem:[%s16052_s7 + $0x30] sm:$0xff] }
 0x2cf   : > { %12011 = vmatprep.mubr.bf16.mxu0 %v4937_v54  ;;  %v4931_v54 = vld [vmem:[%s13906_s16 + $0x115] sm:$0xff] }
 0x2d0   : > { %v4952_v10 = vpack.c.bf16 %v4932_v13, %v4931_v54  ;;  %v15171_v13 = vld [vmem:[%s16052_s7 + $0xa0] sm:$0xff] }
 0x2d4   : > { %v14988_v45 = vpop.f32.mrb[0].mxu1 }
 0x2d5   : > { %v15003_v59 = vpop.f32.mrb[1].mxu1 }
 0x2d6   : > { %12012 = vmatmul.mubr.bf16.vlgmr.msra.gmra.mrb[0].mxu0 %v4938_v40  ;;  %v15008_v20 = vpop.f32.mrb[2].mxu1 }
 0x2d7   : > { %12048 = vmatpush3.bf16.msra.mxu0 %v13721_v51  ;;  %12015 = vmatprep.mubr.bf16.mxu0 %v4939_v38  ;;  %v15015_v32 = vpop.f32.mrb[3].mxu1  ;;  %v15020_v51 = vld [vmem:[%s16052_s7 + $0x20] sm:$0xff]  ;;  %v15049_v38 = vld [vmem:[%s16052_s7 + $0x38] sm:$0xff] }
 0x2d8   : > { %12049 = vmatprep.subr.bf16.mxu0 %v13722_v14  ;;  %6366 = vperm.xlu0 %13599, %v15020_v51  }
 0x2d9   : > { %6381 = vperm.xlu1 %13600, %v15049_v38  }
 0x2db   : > { %12050 = vmatpush3.bf16.msra.mxu0 %v13722_v14 }
 0x2dc   : > { %12051 = vmatprep.subr.bf16.mxu0 %v13723_v49  ;;  %v15024_v56 = vpop.f32.mrb[4].mxu1  ;;  %6376 = vperm.xlu0 %13599, %v15034_v52  }
 0x2dd   : > { %v15039_v21 = vpop.f32.mrb[5].mxu1 }
 0x2de   : > { %12016 = vmatmul.mubr.bf16.gmra.mrb[4].mxu0 %v4940_v25  ;;  %v15044_v40 = vpop.f32.mrb[6].mxu1  ;;  %v15070_v25 = vld [vmem:[%s16052_s7 + $0x50] sm:$0xff] }
 0x2df   : > { %12019 = vmatprep.mubr.bf16.mxu0 %v4941_v42  ;;  %12052 = vmatpush3.bf16.msra.mxu0 %v13723_v49  ;;  %v15051_v14 = vpop.f32.mrb[7].mxu1  ;;  %v15065_v49 = vld [vmem:[%s16052_s7 + $0x48] sm:$0xff]  ;;  %v4935_v42 = vld [vmem:[%s13906_s16 + $0x135] sm:$0xff] }
 0x2e0   : > { %12053 = vmatprep.subr.bf16.mxu0 %v13724_v26  ;;  %6386 = vperm.xlu0 %13599, %v15056_v22  }
 0x2e1   : > { %6391 = vperm.xlu1 %13600, %v15065_v49  }
 0x2e3   : > { %12054 = vmatpush3.bf16.msra.mxu0 %v13724_v26  ;;  %v4936_v26 = vld [vmem:[%s13906_s16 + $0x13d] sm:$0xff] }
 0x2e4   : > { %12055 = vmatprep.subr.bf16.mxu0 %v13725_v11  ;;  %v15060_v16 = vpop.f32.mrb[8].mxu1  ;;  %6396 = vperm.xlu0 %13599, %v15070_v25  }
 0x2e5   : > { %v15075_v55 = vpop.f32.mrb[9].mxu1 }
 0x2e6   : > { %12020 = vmatmul.mubr.bf16.gmra.mrb[8].mxu0 %v4942_v61  ;;  %v15080_v53 = vpop.f32.mrb[10].mxu1 }
 0x2e7   : > { %12023 = vmatprep.mubr.bf16.mxu0 %v4943_v62  ;;  %12056 = vmatpush3.bf16.msra.mxu0 %v13725_v11  ;;  %v15085_v11 = vld [vmem:[%s16052_s7 + $0x58] sm:$0xff]  ;;  %v15087_v61 = vpop.f32.mrb[11].mxu1  ;;  %v15092_v62 = vld [vmem:[%s16052_s7 + $0x60] sm:$0xff] }
 0x2e8   : > { %12057 = vmatprep.subr.bf16.mxu0 %v13726_v63  ;;  %6401 = vperm.xlu1 %13600, %v15085_v11  }
 0x2e9   : > { %6406 = vperm.xlu0 %13599, %v15092_v62  }
 0x2eb   : > { %12058 = vmatpush3.bf16.msra.mxu0 %v13726_v63  ;;  %v4954_v63 = vpack.c.bf16 %v4936_v26, %v4935_v42  ;;  %v5243_v42 = vld [vmem:[%s13976_s23 + $0x75] sm:$0xff]  ;;  %v5244_v26 = vld [vmem:[%s13976_s23 + $0x7d] sm:$0xff] }
 0x2ec   : > { %12059 = vmatprep.subr.bf16.mxu0 %v13727_v6  ;;  %v15096_v3 = vpop.f32.mrb[12].mxu1  ;;  %6411 = vperm.xlu1 %13600, %v15101_v33  }
 0x2ed   : > { %6416 = vperm.xlu0 %13599, %v15106_v4  }
 0x2ee   : > { %12024 = vmatmul.mubr.bf16.gmra.mrb[12].mxu0 %v4944_v7  ;;  %v5236_v7 = vld [vmem:[%s13976_s23 + $0x3d] sm:$0xff] }
 0x2ef   : > { %12027 = vmatprep.mubr.bf16.mxu0 %v4945_v12  ;;  %12060 = vmatpush3.bf16.msra.mxu0 %v13727_v6  ;;  %v5235_v6 = vld [vmem:[%s13976_s23 + $0x35] sm:$0xff]  ;;  %v15111_v12 = vpop.f32.mrb[13].mxu1 }
 0x2f0   : > { %12061 = vmatprep.subr.bf16.mxu0 %v13728_v23  ;;  %v15116_v31 = vpop.f32.mrb[14].mxu1  ;;  %6421 = vperm.xlu1 %13600, %v15121_v5  }
 0x2f1   : > { %v15123_v28 = vpop.f32.mrb[15].mxu1 }
 0x2f3   : > { %12062 = vmatpush3.bf16.msra.mxu0 %v13728_v23  ;;  %v5237_v23 = vld [vmem:[%s13976_s23 + $0x45] sm:$0xff] }
 0x2f4   : > { %12099 = vmatprep.subr.bf16.mxu0 %v14975_v36  ;;  %v5271_v58 = vpack.c.bf16 %v5238_v30, %v5237_v23  ;;  %6431 = vperm.xlu1 %13600, %v15138_v29   ;;  %v15206_v23 = vld [vmem:[%s16052_s7 + $0xb8] sm:$0xff]  ;;  %v5274_v30 = vpack.c.bf16 %v5244_v26, %v5243_v42  ;;  %v13735_v42 = vld [vmem:[%s16047_s2 + $0x230] sm:$0xff]  }
 0x2f6   : > { %12028 = vmatmul.mubr.bf16.gmra.mrb[16].mxu0 %v4946_v37  ;;  %v15128_v37 = vld [vmem:[%s16052_s7 + $0x80] sm:$0xff] }
 0x2f7   : > { %12031 = vmatprep.mubr.bf16.mxu0 %v4947_v48  ;;  %v5270_v48 = vpack.c.bf16 %v5236_v7, %v5235_v6  ;;  %6426 = vperm.xlu0 %13599, %v15128_v37  }
 0x2fb   : > { %6436 = vperm.xlu0 %13599, %v15143_v18  }
 0x2fe   : > { %12032 = vmatmul.mubr.bf16.gmra.mrb[20].mxu0 %v4948_v41  ;;  %v5240_v41 = vld [vmem:[%s13976_s23 + $0x5d] sm:$0xff] }
 0x2ff   : > { %12035 = vmatprep.mubr.bf16.mxu0 %v4949_v44  ;;  %6446 = vperm.xlu0 %13599, %v15171_v13  }
 0x306   : > { %12036 = vmatmul.mubr.bf16.gmra.mrb[24].mxu0 %v4950_v8  ;;  %v15164_v8 = vld [vmem:[%s16052_s7 + $0x98] sm:$0xff] }
 0x307   : > { %12039 = vmatprep.mubr.bf16.mxu0 %v4951_v9  ;;  %v5272_v9 = vpack.c.bf16 %v5240_v41, %v5239_v39  ;;  %6441 = vperm.xlu1 %13600, %v15164_v8   ;;  %v13734_v39 = vld [vmem:[%s16047_s2 + $0x228] sm:$0xff]  }
 0x308   : > { %v15223_v41 = vld [vmem:[%s16052_s7 + $0xc8] sm:$0xff] }
 0x30e   : > { %12040 = vmatmul.mubr.bf16.gmra.mrb[28].mxu0 %v4952_v10  ;;  %v15181_v10 = vld [vmem:[%s16052_s7 + $0xa8] sm:$0xff] }
 0x30f   : > { %12043 = vmatprep.mubr.bf16.mxu0 %v4953_v47  ;;  %v15186_v47 = vld [vmem:[%s16052_s7 + $0xb0] sm:$0xff]  ;;  %6451 = vperm.xlu1 %13600, %v15181_v10  }
 0x310   : > { %6456 = vperm.xlu0 %13599, %v15186_v47  }
 0x313   : > { %6461 = vperm.xlu1 %13600, %v15206_v23  }
 0x316   : > { %12044 = vmatmul.mubr.bf16.gmra.mrb[32].mxu0 %v4954_v63  ;;  %v5246_v63 = vld [vmem:[%s13976_s23 + $0x8d] sm:$0xff] }
 0x317   : > { %12063 = vmatprep.mubr.bf16.mxu0 %v5269_v1  ;;  %v13733_v1 = vld [vmem:[%s16047_s2 + $0x220] sm:$0xff]   ;;  %6471 = vperm.xlu1 %13600, %v15223_v41  }
 0x31c   : > { %v15148_v44 = vpop.f32.mrb[16].mxu1 }
 0x31d   : > { %16054 = vst [vmem:[#allocation3_spill] sm:$0xff] %v15148_v44  ;;  %v15156_v15 = vpop.f32.mrb[17].mxu1  ;;  %v5262_v44 = vld [vmem:[%s13976_s23 + $0x10d] sm:$0xff] }
 0x31e   : > { %12064 = vmatmul.mubr.bf16.vlgmr.msra.gmra.mrb[0].mxu0 %v5270_v48  ;;  %16055 = vst [vmem:[#allocation4_spill] sm:$0xff] %v15156_v15  ;;  %v5261_v15 = vld [vmem:[%s13976_s23 + $0x105] sm:$0xff] }
 0x31f   : > { %12100 = vmatpush3.bf16.msra.mxu0 %v14975_v36  ;;  %12067 = vmatprep.mubr.bf16.mxu0 %v5271_v58  ;;  %v15159_v36 = vpop.f32.mrb[18].mxu1  ;;  %v15213_v58 = vld [vmem:[%s16052_s7 + $0xc0] sm:$0xff] }
 0x320   : > { %12101 = vmatprep.subr.bf16.mxu0 %v13730_v27  ;;  %16056 = vst [vmem:[#allocation5_spill] sm:$0xff] %v15159_v36  ;;  %v15166_v54 = vpop.f32.mrb[19].mxu1  ;;  %6466 = vperm.xlu0 %13599, %v15213_v58  }
 0x321   : > { %16057 = vst [vmem:[#allocation6_spill] sm:$0xff] %v15166_v54 }
 0x323   : > { %12102 = vmatpush3.bf16.msra.mxu0 %v13730_v27  ;;  %v5275_v27 = vpack.c.bf16 %v5246_v63, %v5245_v43  ;;  %v15248_v63 = vld [vmem:[%s16052_s7 + $0xd8] sm:$0xff] }
 0x324   : > { %12103 = vmatprep.subr.bf16.mxu0 %v13731_v60  ;;  %v15190_v57 = vpop.f32.mrb[20].mxu1  ;;  %6476 = vperm.xlu0 %13599, %v15228_v46  }
 0x325   : > { %16058 = vst [vmem:[#allocation7_spill] sm:$0xff] %v15190_v57  ;;  %v15198_v6 = vpop.f32.mrb[21].mxu1  ;;  %6481 = vperm.xlu1 %13600, %v15248_v63  }
 0x326   : > { %12068 = vmatmul.mubr.bf16.gmra.mrb[4].mxu0 %v5272_v9  ;;  %16059 = vst [vmem:[#allocation8_spill] sm:$0xff] %v15198_v6  ;;  %v15201_v7 = vpop.f32.mrb[22].mxu1 }
 0x327   : > { %12071 = vmatprep.mubr.bf16.mxu0 %v5273_v34  ;;  %12104 = vmatpush3.bf16.msra.mxu0 %v13731_v60  ;;  %16060 = vst [vmem:[#allocation9_spill] sm:$0xff] %v15201_v7  ;;  %v15208_v48 = vpop.f32.mrb[23].mxu1  ;;  %v5248_v60 = vld [vmem:[%s13976_s23 + $0x9d] sm:$0xff]  ;;  %v5249_v34 = vld [vmem:[%s13976_s23 + $0xa5] sm:$0xff] }
 0x328   : > { %12105 = vmatprep.subr.bf16.mxu0 %v13732_v35  ;;  %16061 = vst [vmem:[#allocation10_spill] sm:$0xff] %v15208_v48 }
 0x32b   : > { %12106 = vmatpush3.bf16.msra.mxu0 %v13732_v35  ;;  %v5250_v35 = vld [vmem:[%s13976_s23 + $0xad] sm:$0xff] }
 0x32c   : > { %12107 = vmatprep.subr.bf16.mxu0 %v13733_v1  ;;  %v15232_v9 = vpop.f32.mrb[24].mxu1 }
 0x32d   : > { %16062 = vst [vmem:[#allocation11_spill] sm:$0xff] %v15232_v9  ;;  %v15240_v26 = vpop.f32.mrb[25].mxu1  ;;  %v5254_v9 = vld [vmem:[%s13976_s23 + $0xcd] sm:$0xff] }
 0x32e   : > { %12072 = vmatmul.mubr.bf16.gmra.mrb[8].mxu0 %v5274_v30  ;;  %16063 = vst [vmem:[#allocation12_spill] sm:$0xff] %v15240_v26  ;;  %v15243_v43 = vpop.f32.mrb[26].mxu1  ;;  %v5277_v26 = vpack.c.bf16 %v5250_v35, %v5249_v34  ;;  %v5252_v34 = vld [vmem:[%s13976_s23 + $0xbd] sm:$0xff] }
 0x32f   : > { %12075 = vmatprep.mubr.bf16.mxu0 %v5275_v27  ;;  %12108 = vmatpush3.bf16.msra.mxu0 %v13733_v1  ;;  %16064 = vst [vmem:[#allocation13_spill] sm:$0xff] %v15243_v43  ;;  %v5276_v1 = vpack.c.bf16 %v5248_v60, %v5247_v24  ;;  %v15250_v30 = vpop.f32.mrb[27].mxu1  ;;  %v15255_v27 = vld [vmem:[%s16052_s7 + $0xe0] sm:$0xff]  ;;  %v13736_v43 = vld [vmem:[%s16047_s2 + $0x238] sm:$0xff]   ;;  %v15265_v24 = vld [vmem:[%s16052_s7 + $0xe8] sm:$0xff] }
 0x330   : > { %12109 = vmatprep.subr.bf16.mxu0 %v13734_v39  ;;  %16065 = vst [vmem:[#allocation14_spill] sm:$0xff] %v15250_v30  ;;  %6486 = vperm.xlu0 %13599, %v15255_v27   ;;  %v15270_v60 = vld [vmem:[%s16052_s7 + $0xf0] sm:$0xff]  ;;  %v5253_v30 = vld [vmem:[%s13976_s23 + $0xc5] sm:$0xff] }
 0x331   : > { %6491 = vperm.xlu1 %13600, %v15265_v24   ;;  %v5279_v6 = vpack.c.bf16 %v5254_v9, %v5253_v30  ;;  %v5255_v9 = vld [vmem:[%s13976_s23 + $0xd5] sm:$0xff] }
 0x333   : > { %12110 = vmatpush3.bf16.msra.mxu0 %v13734_v39  ;;  %v5251_v39 = vld [vmem:[%s13976_s23 + $0xb5] sm:$0xff] }
 0x334   : > { %12111 = vmatprep.subr.bf16.mxu0 %v13735_v42  ;;  %v15274_v35 = vpop.f32.mrb[28].mxu1  ;;  %6496 = vperm.xlu0 %13599, %v15270_v60  }
 0x335   : > { %16066 = vst [vmem:[#allocation15_spill] sm:$0xff] %v15274_v35  ;;  %v15284_v48 = vpop.f32.mrb[29].mxu1  ;;  %v5278_v35 = vpack.c.bf16 %v5252_v34, %v5251_v39  ;;  %v15307_v39 = vld [vmem:[%s16052_s7 + $0x108] sm:$0xff]  ;;  %v15312_v34 = vld [vmem:[%s16052_s7 + $0x110] sm:$0xff] }
 0x336   : > { %12076 = vmatmul.mubr.bf16.gmra.mrb[12].mxu0 %v5276_v1  ;;  %v15281_v1 = vld [vmem:[%s16048_s3 + $0x200] sm:$0xff]   ;;  %16067 = vst [vmem:[#allocation16_spill] sm:$0xff] %v15284_v48 }
 0x337   : > { %12079 = vmatprep.mubr.bf16.mxu0 %v5277_v26  ;;  %12112 = vmatpush3.bf16.msra.mxu0 %v13735_v42  ;;  %v15287_v26 = vpop.f32.mrb[30].mxu1  ;;  %v15292_v42 = vld [vmem:[%s16052_s7 + $0xf8] sm:$0xff]  ;;  %v15299_v48 = vld [vmem:[%s16052_s7 + $0x100] sm:$0xff] }
 0x338   : > { %12113 = vmatprep.subr.bf16.mxu0 %v13736_v43  ;;  %16068 = vst [vmem:[#allocation17_spill] sm:$0xff] %v15287_v26  ;;  %v15294_v7 = vpop.f32.mrb[31].mxu1  ;;  %6501 = vperm.xlu1 %13600, %v15292_v42  }
 0x339   : > { %16069 = vst [vmem:[#allocation18_spill] sm:$0xff] %v15294_v7  ;;  %6506 = vperm.xlu0 %13599, %v15299_v48   ;;  %v5257_v7 = vld [vmem:[%s13976_s23 + $0xe5] sm:$0xff] }
 0x33b   : > { %12114 = vmatpush3.bf16.msra.mxu0 %v13736_v43  ;;  %v5256_v43 = vld [vmem:[%s13976_s23 + $0xdd] sm:$0xff] }
 0x33c   : > { %12151 = vmatprep.subr.bf16.mxu0 %v15281_v1  ;;  %v15316_v30 = vpop.f32.mrb[32].mxu1  ;;  %6511 = vperm.xlu1 %13600, %v15307_v39   ;;  %v5280_v54 = vpack.c.bf16 %v5256_v43, %v5255_v9  ;;  %v5266_v43 = vld [vmem:[%s13976_s23 + $0x12d] sm:$0xff] }
 0x33d   : > { %16070 = vst [vmem:[#allocation19_spill] sm:$0xff] %v15316_v30  ;;  %v15321_v26 = vpop.f32.mrb[33].mxu1  ;;  %6516 = vperm.xlu0 %13599, %v15312_v34  }
 0x33e   : > { %12080 = vmatmul.mubr.bf16.gmra.mrb[16].mxu0 %v5278_v35  ;;  %v5258_v35 = vld [vmem:[%s13976_s23 + $0xed] sm:$0xff]  ;;  %16071 = vst [vmem:[#allocation20_spill] sm:$0xff] %v15321_v26  ;;  %v15324_v57 = vpop.f32.mrb[34].mxu1  ;;  %v5260_v26 = vld [vmem:[%s13976_s23 + $0xfd] sm:$0xff] }
 0x33f   : > { %12083 = vmatprep.mubr.bf16.mxu0 %v5279_v6  ;;  %16072 = vst [vmem:[#allocation21_spill] sm:$0xff] %v15324_v57  ;;  %v15329_v6 = vld [vmem:[%s16052_s7 + $0x118] sm:$0xff]  ;;  %v15331_v30 = vpop.f32.mrb[35].mxu1  ;;  %v5281_v36 = vpack.c.bf16 %v5258_v35, %v5257_v7  ;;  %v5283_v7 = vpack.c.bf16 %v5262_v44, %v5261_v15  ;;  %v5565_v44 = vld [vmem:[%s13906_s16 + $0x26] sm:$0xff]  ;;  %v5566_v15 = vld [vmem:[%s13906_s16 + $0x2e] sm:$0xff] }
 0x340   : > { %6521 = vperm.xlu1 %13600, %v15329_v6   ;;  %v5259_v57 = vld [vmem:[%s13976_s23 + $0xf5] sm:$0xff]  ;;  %v5572_v35 = vld [vmem:[%s13906_s16 + $0x5e] sm:$0xff] }
 0x341   : > { %9636 = vperm.xlu0 %13599, %v14981_v50   ;;  %v5282_v9 = vpack.c.bf16 %v5260_v26, %v5259_v57  ;;  %v5263_v50 = vld [vmem:[%s13976_s23 + $0x115] sm:$0xff]  ;;  %v5569_v57 = vld [vmem:[%s13906_s16 + $0x46] sm:$0xff] }
 0x342   : > { %v5570_v26 = vld [vmem:[%s13906_s16 + $0x4e] sm:$0xff] }
 0x344   : > { %9641 = vperm.xlu1 %13600, %v14998_v17  }
 0x345   : > { %9646 = vperm.xlu0 %13599, %v14993_v19  }
 0x346   : > { %12084 = vmatmul.mubr.bf16.gmra.mrb[20].mxu0 %v5280_v54  ;;  %v5265_v54 = vld [vmem:[%s13976_s23 + $0x125] sm:$0xff] }
 0x347   : > { %12087 = vmatprep.mubr.bf16.mxu0 %v5281_v36  ;;  %v5264_v36 = vld [vmem:[%s13976_s23 + $0x11d] sm:$0xff]  ;;  %v5285_v17 = vpack.c.bf16 %v5266_v43, %v5265_v54  ;;  %v13746_v43 = vld [vmem:[%s16050_s5 + $0x48] sm:$0xff]  }
 0x348   : > { %9651 = vperm.xlu1 %13600, %v15013_v2   ;;  %v5284_v19 = vpack.c.bf16 %v5264_v36, %v5263_v50  ;;  %v5267_v2 = vld [vmem:[%s13976_s23 + $0x135] sm:$0xff]  ;;  %v5576_v50 = vld [vmem:[%s13906_s16 + $0x7e] sm:$0xff] }
 0x349   : > { %9656 = vperm.xlu0 %13599, %v15020_v51   ;;  %v5268_v51 = vld [vmem:[%s13976_s23 + $0x13d] sm:$0xff]  ;;  %v5578_v36 = vld [vmem:[%s13906_s16 + $0x8e] sm:$0xff] }
 0x34c   : > { %9661 = vperm.xlu1 %13600, %v15029_v0   ;;  %v5286_v0 = vpack.c.bf16 %v5268_v51, %v5267_v2  ;;  %v5582_v2 = vld [vmem:[%s13906_s16 + $0xae] sm:$0xff] }
 0x34d   : > { %9666 = vperm.xlu0 %13599, %v15034_v52   ;;  %v5601_v52 = vpack.c.bf16 %v5566_v15, %v5565_v44  ;;  %v13743_v51 = vld [vmem:[%s16048_s3 + $0x230] sm:$0xff]   ;;  %v13748_v15 = vld [vmem:[%s16050_s5 + $0x58] sm:$0xff]  }
 0x34e   : > { %12088 = vmatmul.mubr.bf16.gmra.mrb[24].mxu0 %v5282_v9  ;;  %v13739_v9 = vld [vmem:[%s16048_s3 + $0x210] sm:$0xff]  }
 0x34f   : > { %12091 = vmatprep.mubr.bf16.mxu0 %v5283_v7  ;;  %v5575_v7 = vld [vmem:[%s13906_s16 + $0x76] sm:$0xff] }
 0x350   : > { %9671 = vperm.xlu1 %13600, %v15049_v38   ;;  %v5567_v38 = vld [vmem:[%s13906_s16 + $0x36] sm:$0xff] }
 0x351   : > { %9676 = vperm.xlu0 %13599, %v15056_v22   ;;  %v5568_v22 = vld [vmem:[%s13906_s16 + $0x3e] sm:$0xff] }
 0x354   : > { %9681 = vperm.xlu1 %13600, %v15065_v49   ;;  %v5602_v49 = vpack.c.bf16 %v5568_v22, %v5567_v38  ;;  %v5586_v38 = vld [vmem:[%s13906_s16 + $0xce] sm:$0xff]  ;;  %v5587_v22 = vld [vmem:[%s13906_s16 + $0xd6] sm:$0xff] }
 0x355   : > { %9686 = vperm.xlu0 %13599, %v15070_v25   ;;  %v5603_v25 = vpack.c.bf16 %v5570_v26, %v5569_v57  ;;  %v5588_v57 = vld [vmem:[%s13906_s16 + $0xde] sm:$0xff]  ;;  %v5589_v26 = vld [vmem:[%s13906_s16 + $0xe6] sm:$0xff] }
 0x356   : > { %12092 = vmatmul.mubr.bf16.gmra.mrb[28].mxu0 %v5284_v19  ;;  %v5580_v19 = vld [vmem:[%s13906_s16 + $0x9e] sm:$0xff] }
 0x357   : > { %12095 = vmatprep.mubr.bf16.mxu0 %v5285_v17  ;;  %v5581_v17 = vld [vmem:[%s13906_s16 + $0xa6] sm:$0xff] }
 0x358   : > { %9691 = vperm.xlu1 %13600, %v15085_v11   ;;  %v13738_v11 = vld [vmem:[%s16048_s3 + $0x208] sm:$0xff]   ;;  %v5609_v44 = vpack.c.bf16 %v5582_v2, %v5581_v17 }
 0x359   : > { %9696 = vperm.xlu0 %13599, %v15092_v62   ;;  %v5571_v62 = vld [vmem:[%s13906_s16 + $0x56] sm:$0xff]  ;;  %v5906_v17 = vld [vmem:[%s13976_s23 + $0x6e] sm:$0xff] }
 0x35c   : > { %9701 = vperm.xlu1 %13600, %v15101_v33   ;;  %v5573_v33 = vld [vmem:[%s13906_s16 + $0x66] sm:$0xff] }
 0x35d   : > { %9706 = vperm.xlu0 %13599, %v15106_v4   ;;  %v5574_v4 = vld [vmem:[%s13906_s16 + $0x6e] sm:$0xff] }
 0x35e   : > { %12096 = vmatmul.mubr.bf16.gmra.mrb[32].mxu0 %v5286_v0  ;;  %v5584_v0 = vld [vmem:[%s13906_s16 + $0xbe] sm:$0xff] }
 0x35f   : > { %12115 = vmatprep.mubr.bf16.mxu0 %v5601_v52  ;;  %v5585_v52 = vld [vmem:[%s13906_s16 + $0xc6] sm:$0xff] }
 0x360   : > { %9711 = vperm.xlu1 %13600, %v15121_v5   ;;  %v5604_v5 = vpack.c.bf16 %v5572_v35, %v5571_v62  ;;  %v5596_v35 = vld [vmem:[%s13906_s16 + $0x11e] sm:$0xff] }
 0x361   : > { %9716 = vperm.xlu0 %13599, %v15128_v37   ;;  %v5605_v37 = vpack.c.bf16 %v5574_v4, %v5573_v33  ;;  %v5597_v33 = vld [vmem:[%s13906_s16 + $0x126] sm:$0xff] }
 0x364   : > { %9721 = vperm.xlu1 %13600, %v15138_v29   ;;  %v5577_v29 = vld [vmem:[%s13906_s16 + $0x86] sm:$0xff] }
 0x365   : > { %9726 = vperm.xlu0 %13599, %v15143_v18   ;;  %v13741_v18 = vld [vmem:[%s16048_s3 + $0x220] sm:$0xff]   ;;  %v5607_v54 = vpack.c.bf16 %v5578_v36, %v5577_v29  ;;  %v5899_v36 = vld [vmem:[%s13976_s23 + $0x36] sm:$0xff] }
 0x366   : > { %12116 = vmatmul.mubr.bf16.vlgmr.msra.gmra.mrb[0].mxu0 %v5602_v49  ;;  %v5592_v49 = vld [vmem:[%s13906_s16 + $0xfe] sm:$0xff] }
 0x367   : > { %12152 = vmatpush3.bf16.msra.mxu0 %v15281_v1  ;;  %12119 = vmatprep.mubr.bf16.mxu0 %v5603_v25  ;;  %v13740_v1 = vld [vmem:[%s16048_s3 + $0x218] sm:$0xff]   ;;  %v5593_v25 = vld [vmem:[%s13906_s16 + $0x106] sm:$0xff] }
 0x368   : > { %12153 = vmatprep.subr.bf16.mxu0 %v13738_v11  ;;  %9731 = vperm.xlu1 %13600, %v15164_v8   ;;  %v13745_v8 = vld [vmem:[%s16050_s5 + $0x40] sm:$0xff]  }
 0x369   : > { %9736 = vperm.xlu0 %13599, %v15171_v13   ;;  %v5606_v13 = vpack.c.bf16 %v5576_v50, %v5575_v7  ;;  %12203 = vmatprep.subr.bf16.mxu1 %v13745_v8  ;;  %v5898_v7 = vld [vmem:[%s13976_s23 + $0x2e] sm:$0xff] }
 0x36a   : > { %12204 = vmatpush3.bf16.msra.mxu1 %v13745_v8  ;;  %v5901_v8 = vld [vmem:[%s13976_s23 + $0x46] sm:$0xff] }
 0x36b   : > { %12154 = vmatpush3.bf16.msra.mxu0 %v13738_v11  ;;  %12205 = vmatprep.subr.bf16.mxu1 %v13746_v43  ;;  %v5594_v11 = vld [vmem:[%s13906_s16 + $0x10e] sm:$0xff] }
 0x36c   : > { %12155 = vmatprep.subr.bf16.mxu0 %v13739_v9  ;;  %9741 = vperm.xlu1 %13600, %v15181_v10   ;;  %v13742_v10 = vld [vmem:[%s16048_s3 + $0x228] sm:$0xff]   ;;  %v5615_v62 = vpack.c.bf16 %v5594_v11, %v5593_v25  ;;  %v5920_v25 = vld [vmem:[%s13976_s23 + $0xde] sm:$0xff] }
 0x36d   : > { %9746 = vperm.xlu0 %13599, %v15186_v47   ;;  %v5579_v47 = vld [vmem:[%s13906_s16 + $0x96] sm:$0xff]  ;;  %v5921_v11 = vld [vmem:[%s13976_s23 + $0xe6] sm:$0xff] }
 0x36e   : > { %12120 = vmatmul.mubr.bf16.gmra.mrb[4].mxu0 %v5604_v5  ;;  %12206 = vmatpush3.bf16.msra.mxu1 %v13746_v43  ;;  %v5599_v5 = vld [vmem:[%s13906_s16 + $0x136] sm:$0xff] }
 0x36f   : > { %12123 = vmatprep.mubr.bf16.mxu0 %v5605_v37  ;;  %12156 = vmatpush3.bf16.msra.mxu0 %v13739_v9  ;;  %v5600_v37 = vld [vmem:[%s13906_s16 + $0x13e] sm:$0xff]  ;;  %v5903_v43 = vld [vmem:[%s13976_s23 + $0x56] sm:$0xff] }
 0x370   : > { %12157 = vmatprep.subr.bf16.mxu0 %v13740_v1  ;;  %9751 = vperm.xlu1 %13600, %v15206_v23   ;;  %v13747_v23 = vld [vmem:[%s16050_s5 + $0x50] sm:$0xff]   ;;  %v5618_v50 = vpack.c.bf16 %v5600_v37, %v5599_v5 }
 0x371   : > { %9756 = vperm.xlu0 %13599, %v15213_v58   ;;  %v5608_v58 = vpack.c.bf16 %v5580_v19, %v5579_v47  ;;  %12207 = vmatprep.subr.bf16.mxu1 %v13747_v23  ;;  %v5904_v47 = vld [vmem:[%s13976_s23 + $0x5e] sm:$0xff]  ;;  %v5905_v19 = vld [vmem:[%s13976_s23 + $0x66] sm:$0xff]  ;;  %v5927_v37 = vld [vmem:[%s13976_s23 + $0x116] sm:$0xff] }
 0x372   : > { %12208 = vmatpush3.bf16.msra.mxu1 %v13747_v23  ;;  %v5936_v2 = vpack.c.bf16 %v5904_v47, %v5903_v43  ;;  %v5907_v23 = vld [vmem:[%s13976_s23 + $0x76] sm:$0xff]  ;;  %v13834_v43 = vmov 0.0  }
 0x373   : > { %12158 = vmatpush3.bf16.msra.mxu0 %v13740_v1  ;;  %12209 = vmatprep.subr.bf16.mxu1 %v13748_v15  ;;  %v5897_v1 = vld [vmem:[%s13976_s23 + $0x26] sm:$0xff]  ;;  %6560 = vst [vmem:[#allocation2] sm:$0xff] %v13834_v43  ;;  %6561 = vst [vmem:[#allocation2 + $0x8] sm:$0xff] %v13834_v43  ;;  %v13751_v47 = vld [vmem:[%s16050_s5 + $0x70] sm:$0xff]  }
 0x374   : > { %12159 = vmatprep.subr.bf16.mxu0 %v13741_v18  ;;  %9761 = vperm.xlu1 %13600, %v15223_v41   ;;  %v13744_v41 = vld [vmem:[%s16048_s3 + $0x238] sm:$0xff]   ;;  %v5933_v29 = vpack.c.bf16 %v5898_v7, %v5897_v1  ;;  %v5929_v7 = vld [vmem:[%s13976_s23 + $0x126] sm:$0xff]  ;;  %6562 = vst [vmem:[#allocation2 + $0x10] sm:$0x7] %v13834_v43  ;;  %6563 = vst [vmem:[#allocation2 + $0x133] sm:$0xff] %v13834_v43 }
 0x375   : > { %9766 = vperm.xlu0 %13599, %v15228_v46   ;;  %v5583_v46 = vld [vmem:[%s13906_s16 + $0xb6] sm:$0xff]  ;;  %v5928_v1 = vld [vmem:[%s13976_s23 + $0x11e] sm:$0xff]  ;;  %6564 = vst [vmem:[#allocation2 + $0x13b] sm:$0xff] %v13834_v43  ;;  %6565 = vst [vmem:[#allocation2 + $0x143] sm:$0xff] %v13834_v43 }
 0x376   : > { %12124 = vmatmul.mubr.bf16.gmra.mrb[8].mxu0 %v5606_v13  ;;  %12210 = vmatpush3.bf16.msra.mxu1 %v13748_v15  ;;  %v5902_v13 = vld [vmem:[%s13976_s23 + $0x4e] sm:$0xff] }
 0x377   : > { %12127 = vmatprep.mubr.bf16.mxu0 %v5607_v54  ;;  %12160 = vmatpush3.bf16.msra.mxu0 %v13741_v18  ;;  %v5900_v18 = vld [vmem:[%s13976_s23 + $0x3e] sm:$0xff] }
 0x378   : > { %12161 = vmatprep.subr.bf16.mxu0 %v13742_v10  ;;  %9771 = vperm.xlu1 %13600, %v15248_v63   ;;  %v5610_v63 = vpack.c.bf16 %v5584_v0, %v5583_v46  ;;  %v5934_v54 = vpack.c.bf16 %v5900_v18, %v5899_v36  ;;  %v5911_v0 = vld [vmem:[%s13976_s23 + $0x96] sm:$0xff] }
 0x379   : > { %9776 = vperm.xlu0 %13599, %v15255_v27   ;;  %v5611_v27 = vpack.c.bf16 %v5586_v38, %v5585_v52  ;;  %v5912_v52 = vld [vmem:[%s13976_s23 + $0x9e] sm:$0xff]  ;;  %v5913_v38 = vld [vmem:[%s13976_s23 + $0xa6] sm:$0xff]  ;;  %v5931_v18 = vld [vmem:[%s13976_s23 + $0x136] sm:$0xff] }
 0x37b   : > { %12162 = vmatpush3.bf16.msra.mxu0 %v13742_v10  ;;  %v5935_v10 = vpack.c.bf16 %v5902_v13, %v5901_v8  ;;  %v5932_v8 = vld [vmem:[%s13976_s23 + $0x13e] sm:$0xff] }
 0x37c   : > { %12163 = vmatprep.subr.bf16.mxu0 %v13743_v51  ;;  %9781 = vperm.xlu1 %13600, %v15265_v24   ;;  %v5590_v24 = vld [vmem:[%s13906_s16 + $0xee] sm:$0xff]  ;;  %v5950_v13 = vpack.c.bf16 %v5932_v8, %v5931_v18 }
 0x37d   : > { %9786 = vperm.xlu0 %13599, %v15270_v60   ;;  %v5612_v60 = vpack.c.bf16 %v5588_v57, %v5587_v22  ;;  %v5915_v57 = vld [vmem:[%s13976_s23 + $0xb6] sm:$0xff] }
 0x37e   : > { %12128 = vmatmul.mubr.bf16.gmra.mrb[12].mxu0 %v5608_v58  ;;  %v5908_v58 = vld [vmem:[%s13976_s23 + $0x7e] sm:$0xff] }
 0x37f   : > { %12131 = vmatprep.mubr.bf16.mxu0 %v5609_v44  ;;  %12164 = vmatpush3.bf16.msra.mxu0 %v13743_v51  ;;  %v5937_v51 = vpack.c.bf16 %v5906_v17, %v5905_v19  ;;  %v5909_v44 = vld [vmem:[%s13976_s23 + $0x86] sm:$0xff]  ;;  %v5938_v15 = vpack.c.bf16 %v5908_v58, %v5907_v23  ;;  %v13752_v19 = vld [vmem:[%s16050_s5 + $0x78] sm:$0xff]   ;;  %v6347_v58 = vpop.permute.xlu0 %6346 }
 0x380   : > { %12165 = vmatprep.subr.bf16.mxu0 %v13744_v41  ;;  %9791 = vperm.xlu1 %13600, %v15292_v42   ;;  %v5613_v42 = vpack.c.bf16 %v5590_v24, %v5589_v26  ;;  %v5916_v26 = vld [vmem:[%s13976_s23 + $0xbe] sm:$0xff]  ;;  %v5917_v24 = vld [vmem:[%s13976_s23 + $0xc6] sm:$0xff] }
 0x381   : > { %9796 = vperm.xlu0 %13599, %v15299_v48   ;;  %v5591_v48 = vld [vmem:[%s13906_s16 + $0xf6] sm:$0xff]  ;;  %v6674_v17 = vld [vmem:[#allocation2 + $0x1] sm:$0xff] }
 0x382   : > { %v15501_v23 = vld [vmem:[%s16050_s5] sm:$0xff]  }
 0x383   : > { %12166 = vmatpush3.bf16.msra.mxu0 %v13744_v41  ;;  %v5910_v41 = vld [vmem:[%s13976_s23 + $0x8e] sm:$0xff] }
 0x384   : > { %9801 = vperm.xlu1 %13600, %v15307_v39   ;;  %v5614_v39 = vpack.c.bf16 %v5592_v49, %v5591_v48  ;;  %v5939_v46 = vpack.c.bf16 %v5910_v41, %v5909_v44  ;;  %v5919_v49 = vld [vmem:[%s13976_s23 + $0xd6] sm:$0xff]  ;;  %v6357_v44 = vpop.permute.xlu1 %6356  ;;  %v6352_v41 = vpop.permute.xlu0 %6351 }
 0x385   : > { %9806 = vperm.xlu0 %13599, %v15312_v34   ;;  %v5595_v34 = vld [vmem:[%s13906_s16 + $0x116] sm:$0xff] }
 0x386   : > { %12132 = vmatmul.mubr.bf16.gmra.mrb[16].mxu0 %v5610_v63  ;;  %v5616_v4 = vpack.c.bf16 %v5596_v35, %v5595_v34  ;;  %v5914_v63 = vld [vmem:[%s13976_s23 + $0xae] sm:$0xff]  ;;  %v5923_v35 = vld [vmem:[%s13976_s23 + $0xf6] sm:$0xff] }
 0x387   : > { %12135 = vmatprep.mubr.bf16.mxu0 %v5611_v27  ;;  %v5940_v27 = vpack.c.bf16 %v5912_v52, %v5911_v0  ;;  %v5941_v22 = vpack.c.bf16 %v5914_v63, %v5913_v38 }
 0x388   : > { %9811 = vperm.xlu1 %13600, %v15329_v6   ;;  %v5598_v6 = vld [vmem:[%s13906_s16 + $0x12e] sm:$0xff]  ;;  %s13588_s16 = smul.u32 288, %s16093_s28 }
 0x389   : > { %v5617_v9 = vpack.c.bf16 %v5598_v6, %v5597_v33  ;;  %v5924_v33 = vld [vmem:[%s13976_s23 + $0xfe] sm:$0xff]  ;;  %v5925_v6 = vld [vmem:[%s13976_s23 + $0x106] sm:$0xff] }
 0x38a   : > { %s15960_s21 = scalar_lea.vmem %s16053_s8, %s13588_s16 }
 0x38e   : > { %12136 = vmatmul.mubr.bf16.gmra.mrb[20].mxu0 %v5612_v60  ;;  %v5918_v60 = vld [vmem:[%s13976_s23 + $0xce] sm:$0xff] }
 0x38f   : > { %12139 = vmatprep.mubr.bf16.mxu0 %v5613_v42  ;;  %v5942_v42 = vpack.c.bf16 %v5916_v26, %v5915_v57  ;;  %v5943_v48 = vpack.c.bf16 %v5918_v60, %v5917_v24  ;;  %v15515_v24 = vld [vmem:[%s16049_s4] ss:$0 sm:$0xff] }
 0x396   : > { %12140 = vmatmul.mubr.bf16.gmra.mrb[24].mxu0 %v5614_v39  ;;  %v5922_v39 = vld [vmem:[%s13976_s23 + $0xee] sm:$0xff] }
 0x397   : > { %12143 = vmatprep.mubr.bf16.mxu0 %v5615_v62  ;;  %v5944_v62 = vpack.c.bf16 %v5920_v25, %v5919_v49  ;;  %v5945_v34 = vpack.c.bf16 %v5922_v39, %v5921_v11 }
 0x39e   : > { %12144 = vmatmul.mubr.bf16.gmra.mrb[28].mxu0 %v5616_v4  ;;  %v5926_v4 = vld [vmem:[%s13976_s23 + $0x10e] sm:$0xff] }
 0x39f   : > { %12147 = vmatprep.mubr.bf16.mxu0 %v5617_v9  ;;  %v5946_v9 = vpack.c.bf16 %v5924_v33, %v5923_v35  ;;  %v5947_v5 = vpack.c.bf16 %v5926_v4, %v5925_v6 }
 0x3a6   : > { %12148 = vmatmul.mubr.bf16.gmra.mrb[32].mxu0 %v5618_v50  ;;  %v5930_v50 = vld [vmem:[%s13976_s23 + $0x12e] sm:$0xff] }
 0x3a7   : > { %12167 = vmatprep.mubr.bf16.mxu0 %v5933_v29  ;;  %v5948_v29 = vpack.c.bf16 %v5928_v1, %v5927_v37  ;;  %v5949_v36 = vpack.c.bf16 %v5930_v50, %v5929_v7 }
 0x3ae   : > { %12168 = vmatmul.mubr.bf16.vlgmr.msra.gmra.mrb[0].mxu0 %v5934_v54  ;;  %v13749_v54 = vld [vmem:[%s16050_s5 + $0x60] sm:$0xff]  }
 0x3af   : > { %12171 = vmatprep.mubr.bf16.mxu0 %v5935_v10  ;;  %12211 = vmatprep.subr.bf16.mxu1 %v13749_v54  ;;  %v13750_v10 = vld [vmem:[%s16050_s5 + $0x68] sm:$0xff]  }
 0x3b0   : > { %12212 = vmatpush3.bf16.msra.mxu1 %v13749_v54 }
 0x3b1   : > { %12213 = vmatprep.subr.bf16.mxu1 %v13750_v10 }
 0x3b4   : > { %12214 = vmatpush3.bf16.msra.mxu1 %v13750_v10 }
 0x3b5   : > { %12215 = vmatprep.subr.bf16.mxu1 %v13751_v47 }
 0x3b6   : > { %12172 = vmatmul.mubr.bf16.gmra.mrb[4].mxu0 %v5936_v2  ;;  %v6675_v2 = vld [vmem:[#allocation2 + $0x9] sm:$0xff] }
 0x3b7   : > { %12175 = vmatprep.mubr.bf16.mxu0 %v5937_v51  ;;  %v6710_v51 = vpack.c.bf16 %v6675_v2, %v6674_v17 }
 0x3b8   : > { %12216 = vmatpush3.bf16.msra.mxu1 %v13751_v47 }
 0x3b9   : > { %12217 = vmatprep.subr.bf16.mxu1 %v13752_v19  ;;  %12219 = vmatprep.mubr.bf16.mxu1 %v6710_v51 }
 0x3bc   : > { %12218 = vmatpush3.bf16.msra.mxu1 %v13752_v19 }
 0x3bd   : > { %12255 = vmatprep.subr.bf16.mxu1 %v15501_v23 }
 0x3be   : > { %12176 = vmatmul.mubr.bf16.gmra.mrb[8].mxu0 %v5938_v15  ;;  %v6362_v15 = vpop.permute.xlu1 %6361 }
 0x3bf   : > { %12179 = vmatprep.mubr.bf16.mxu0 %v5939_v46  ;;  %v6367_v46 = vpop.permute.xlu0 %6366 }
 0x3c2   : > { %v6372_v0 = vpop.permute.xlu1 %6371 }
 0x3c3   : > { %v6377_v52 = vpop.permute.xlu0 %6376 }
 0x3c6   : > { %12180 = vmatmul.mubr.bf16.gmra.mrb[12].mxu0 %v5940_v27  ;;  %v6382_v38 = vpop.permute.xlu1 %6381 }
 0x3c7   : > { %12183 = vmatprep.mubr.bf16.mxu0 %v5941_v22  ;;  %v15504_v63 = vpop.permute.xlu0 %6386 }
 0x3ca   : > { %v15506_v27 = vpop.permute.xlu1 %6391 }
 0x3cb   : > { %v15508_v22 = vpop.permute.xlu0 %6396 }
 0x3ce   : > { %12184 = vmatmul.mubr.bf16.gmra.mrb[16].mxu0 %v5942_v42  ;;  %v15510_v57 = vpop.permute.xlu1 %6401 }
 0x3cf   : > { %12187 = vmatprep.mubr.bf16.mxu0 %v5943_v48 }
 0x3d2   : > { %v15526_v4 = vpop.permute.xlu1 %6411 }
 0x3d6   : > { %12188 = vmatmul.mubr.bf16.gmra.mrb[20].mxu0 %v5944_v62  ;;  %v15521_v62 = vpop.permute.xlu0 %6406  ;;  %v15535_v43 = vpop.permute.xlu1 %6421 }
 0x3d7   : > { %12191 = vmatprep.mubr.bf16.mxu0 %v5945_v34 }
 0x3de   : > { %12192 = vmatmul.mubr.bf16.gmra.mrb[24].mxu0 %v5946_v9 }
 0x3df   : > { %12195 = vmatprep.mubr.bf16.mxu0 %v5947_v5 }
 0x3e6   : > { %12196 = vmatmul.mubr.bf16.gmra.mrb[28].mxu0 %v5948_v29 }
 0x3e7   : > { %12199 = vmatprep.mubr.bf16.mxu0 %v5949_v36  ;;  %v15530_v36 = vpop.permute.xlu0 %6416 }
 0x3ee   : > { %12200 = vmatmul.mubr.bf16.gmra.mrb[32].mxu0 %v5950_v13 }
 0x481   : > { %v12169_v26 = vpop.f32.mrb[0].mxu0 }
 0x482   : > { %v12687_v60 = vadd.f32 %v12169_v26, %v14988_v45  ;;  %v6050_v42 = vpop.f32.mrb[1].mxu0 }
 0x483   : > { %v12688_v48 = vadd.f32 %v6050_v42, %v15003_v59  ;;  %v12170_v49 = vpop.f32.mrb[2].mxu0 }
 0x484   : > { %v6238_v25 = vadd.f32 %v12687_v60, %v15515_v24  ;;  %v12689_v11 = vadd.f32 %v12170_v49, %v15008_v20  ;;  %v6053_v39 = vpop.f32.mrb[3].mxu0 }
 0x485   : > { %v6236_v34 = vadd.f32 %v12688_v48, %v15515_v24  ;;  %v12690_v35 = vadd.f32 %v6053_v39, %v15015_v32  ;;  %v15544_v48 = vpop.permute.xlu1 %6431 }
 0x486   : > { %v6274_v33 = vmax.f32 %v6238_v25, 0.0  ;;  %v6239_v6 = vadd.f32 %v12689_v11, %v15515_v24 }
 0x487   : > { %v6272_v45 = vmax.f32 %v6236_v34, 0.0  ;;  %v6237_v59 = vadd.f32 %v12690_v35, %v15515_v24 }
 0x488   : > { %v6526_v9 = vmul.f32 %v6357_v44, %v6274_v33  ;;  %v6275_v5 = vmax.f32 %v6239_v6, 0.0  ;;  %v15541_v44 = vpop.permute.xlu0 %6426 }
 0x489   : > { %v6524_v37 = vmul.f32 %v6347_v58, %v6272_v45  ;;  %v6273_v1 = vmax.f32 %v6237_v59, 0.0  ;;  %v12173_v20 = vpop.f32.mrb[4].mxu0 }
 0x48a   : > { %6570 = vst [vmem:[#allocation2 + $0x23] sm:$0xff] %v6526_v9  ;;  %v6527_v7 = vmul.f32 %v6362_v15, %v6275_v5  ;;  %v12691_v50 = vadd.f32 %v12173_v20, %v15024_v56  ;;  %v6066_v29 = vpop.f32.mrb[5].mxu0 }
 0x48b   : > { %6568 = vst [vmem:[#allocation2 + $0x13] sm:$0xff] %v6524_v37  ;;  %v6525_v32 = vmul.f32 %v6352_v41, %v6273_v1  ;;  %v12692_v18 = vadd.f32 %v6066_v29, %v15039_v21  ;;  %v12174_v8 = vpop.f32.mrb[6].mxu0  ;;  %v13755_v29 = vld [vmem:[%s16050_s5 + $0x10] sm:$0xff]  }
 0x48c   : > { %6571 = vst [vmem:[#allocation2 + $0x2b] sm:$0xff] %v6527_v7  ;;  %v6242_v13 = vadd.f32 %v12691_v50, %v15515_v24  ;;  %v12693_v54 = vadd.f32 %v12174_v8, %v15044_v40  ;;  %v6069_v10 = vpop.f32.mrb[7].mxu0  ;;  %v15555_v9 = vpop.permute.xlu0 %6436 }
 0x48d   : > { %6569 = vst [vmem:[#allocation2 + $0x1b] sm:$0xff] %v6525_v32  ;;  %v6240_v47 = vadd.f32 %v12692_v18, %v15515_v24  ;;  %v12694_v56 = vadd.f32 %v6069_v10, %v15051_v14 }
 0x48e   : > { %v6278_v19 = vmax.f32 %v6242_v13, 0.0  ;;  %v6243_v17 = vadd.f32 %v12693_v54, %v15515_v24 }
 0x48f   : > { %v6276_v2 = vmax.f32 %v6240_v47, 0.0  ;;  %v6241_v21 = vadd.f32 %v12694_v56, %v15515_v24 }
 0x490   : > { %v6530_v51 = vmul.f32 %v6377_v52, %v6278_v19  ;;  %v6279_v58 = vmax.f32 %v6243_v17, 0.0 }
 0x491   : > { %v6528_v41 = vmul.f32 %v6367_v46, %v6276_v2  ;;  %v6277_v40 = vmax.f32 %v6241_v21, 0.0  ;;  %v12177_v15 = vpop.f32.mrb[8].mxu0  ;;  %v13756_v21 = vld [vmem:[%s16050_s5 + $0x18] sm:$0xff]  }
 0x492   : > { %6574 = vst [vmem:[#allocation2 + $0x43] sm:$0xff] %v6530_v51  ;;  %v6531_v26 = vmul.f32 %v6382_v38, %v6279_v58  ;;  %v12695_v60 = vadd.f32 %v12177_v15, %v15060_v16  ;;  %v6082_v42 = vpop.f32.mrb[9].mxu0  ;;  %v6676_v34 = vld [vmem:[#allocation2 + $0x11] sm:$0xff] }
 0x493   : > { %6572 = vst [vmem:[#allocation2 + $0x33] sm:$0xff] %v6528_v41  ;;  %v6529_v14 = vmul.f32 %v6372_v0, %v6277_v40  ;;  %v12696_v49 = vadd.f32 %v6082_v42, %v15075_v55  ;;  %v12178_v25 = vpop.f32.mrb[10].mxu0  ;;  %v6679_v11 = vld [vmem:[#allocation2 + $0x29] sm:$0xff] }
 0x494   : > { %6575 = vst [vmem:[#allocation2 + $0x4b] sm:$0xff] %v6531_v26  ;;  %v6246_v52 = vadd.f32 %v12695_v60, %v15515_v24  ;;  %v12697_v46 = vadd.f32 %v12178_v25, %v15080_v53  ;;  %v6085_v39 = vpop.f32.mrb[11].mxu0  ;;  %v6677_v35 = vld [vmem:[#allocation2 + $0x19] sm:$0xff]  ;;  %v6678_v38 = vld [vmem:[#allocation2 + $0x21] sm:$0xff] }
 0x495   : > { %6573 = vst [vmem:[#allocation2 + $0x3b] sm:$0xff] %v6529_v14  ;;  %v6244_v16 = vadd.f32 %v12696_v49, %v15515_v24  ;;  %v12698_v33 = vadd.f32 %v6085_v39, %v15087_v61  ;;  %v6711_v6 = vpack.c.bf16 %v6677_v35, %v6676_v34  ;;  %v6712_v0 = vpack.c.bf16 %v6679_v11, %v6678_v38  ;;  %v13754_v55 = vld [vmem:[%s16050_s5 + $0x8] sm:$0xff]   ;;  %v15560_v61 = vpop.permute.xlu1 %6441  ;;  %v13757_v14 = vld [vmem:[%s16050_s5 + $0x20] sm:$0xff]   ;;  %v16073_v25 = vld [vmem:[#allocation3_spill] sm:$0xff] }
 0x496   : > { %v6282_v45 = vmax.f32 %v6246_v52, 0.0  ;;  %v6247_v59 = vadd.f32 %v12697_v46, %v15515_v24  ;;  %v16074_v39 = vld [vmem:[#allocation4_spill] sm:$0xff] }
 0x497   : > { %v6280_v53 = vmax.f32 %v6244_v16, 0.0  ;;  %v6245_v5 = vadd.f32 %v12698_v33, %v15515_v24  ;;  %12220 = vmatmul.mubr.bf16.vlgmr.msra.gmra.mrb[36].mxu1 %v6711_v6  ;;  %v16075_v16 = vld [vmem:[#allocation5_spill] sm:$0xff] }
 0x498   : > { %v6534_v37 = vmul.f32 %v15508_v22, %v6282_v45  ;;  %v6283_v1 = vmax.f32 %v6247_v59, 0.0  ;;  %12223 = vmatprep.mubr.bf16.mxu1 %v6712_v0  ;;  %12256 = vmatpush3.bf16.msra.mxu1 %v15501_v23 }
 0x499   : > { %v6532_v20 = vmul.f32 %v15504_v63, %v6280_v53  ;;  %v6281_v7 = vmax.f32 %v6245_v5, 0.0  ;;  %v12181_v50 = vpop.f32.mrb[12].mxu0  ;;  %12257 = vmatprep.subr.bf16.mxu1 %v13754_v55  ;;  %v15580_v58 = vpop.permute.xlu1 %6451 }
 0x49a   : > { %6578 = vst [vmem:[#allocation2 + $0x63] sm:$0xff] %v6534_v37  ;;  %v6535_v32 = vmul.f32 %v15510_v57, %v6283_v1  ;;  %v12699_v22 = vadd.f32 %v12181_v50, %v15096_v3  ;;  %v6098_v18 = vpop.f32.mrb[13].mxu0  ;;  %v6680_v56 = vld [vmem:[#allocation2 + $0x31] sm:$0xff]  ;;  %v15572_v57 = vpop.permute.xlu0 %6446  ;;  %v13758_v1 = vld [vmem:[%s16050_s5 + $0x28] sm:$0xff]  }
 0x49b   : > { %6576 = vst [vmem:[#allocation2 + $0x53] sm:$0xff] %v6532_v20  ;;  %v6533_v23 = vmul.f32 %v15506_v27, %v6281_v7  ;;  %v12700_v8 = vadd.f32 %v6098_v18, %v15111_v12  ;;  %v12182_v13 = vpop.f32.mrb[14].mxu0  ;;  %v6683_v63 = vld [vmem:[#allocation2 + $0x49] sm:$0xff] }
 0x49c   : > { %6579 = vst [vmem:[#allocation2 + $0x6b] sm:$0xff] %v6535_v32  ;;  %v6250_v54 = vadd.f32 %v12699_v22, %v15515_v24  ;;  %v12701_v10 = vadd.f32 %v12182_v13, %v15116_v31  ;;  %v6101_v47 = vpop.f32.mrb[15].mxu0  ;;  %v6681_v19 = vld [vmem:[#allocation2 + $0x39] sm:$0xff]  ;;  %v6682_v17 = vld [vmem:[#allocation2 + $0x41] sm:$0xff]  ;;  %12258 = vmatpush3.bf16.msra.mxu1 %v13754_v55 }
 0x49d   : > { %6577 = vst [vmem:[#allocation2 + $0x5b] sm:$0xff] %v6533_v23  ;;  %v6248_v3 = vadd.f32 %v12700_v8, %v15515_v24  ;;  %v12702_v27 = vadd.f32 %v6101_v47, %v15123_v28  ;;  %v6713_v12 = vpack.c.bf16 %v6681_v19, %v6680_v56  ;;  %v6714_v2 = vpack.c.bf16 %v6683_v63, %v6682_v17  ;;  %v15596_v45 = vpop.permute.xlu1 %6461  ;;  %v13759_v63 = vld [vmem:[%s16050_s5 + $0x30] sm:$0xff]   ;;  %v16078_v17 = vld [vmem:[#allocation8_spill] sm:$0xff] }
 0x49e   : > { %12259 = vmatprep.subr.bf16.mxu1 %v13755_v29  ;;  %v6286_v31 = vmax.f32 %v6250_v54, 0.0  ;;  %v6251_v51 = vadd.f32 %v12701_v10, %v15515_v24  ;;  %v15590_v46 = vpop.permute.xlu0 %6456  ;;  %v16077_v10 = vld [vmem:[#allocation7_spill] sm:$0xff] }
 0x49f   : > { %v6284_v41 = vmax.f32 %v6248_v3, 0.0  ;;  %v6249_v40 = vadd.f32 %v12702_v27, %v15515_v24  ;;  %12224 = vmatmul.mubr.bf16.gmra.mrb[40].mxu1 %v6713_v12 }
 0x4a0   : > { %v6538_v15 = vmul.f32 %v15530_v36, %v6286_v31  ;;  %v6287_v26 = vmax.f32 %v6251_v51, 0.0  ;;  %12227 = vmatprep.mubr.bf16.mxu1 %v6714_v2  ;;  %12260 = vmatpush3.bf16.msra.mxu1 %v13755_v29  ;;  %v16079_v2 = vld [vmem:[#allocation9_spill] sm:$0xff] }
 0x4a1   : > { %v6536_v28 = vmul.f32 %v15521_v62, %v6284_v41  ;;  %v6285_v60 = vmax.f32 %v6249_v40, 0.0  ;;  %v12185_v42 = vpop.f32.mrb[16].mxu0  ;;  %12261 = vmatprep.subr.bf16.mxu1 %v13756_v21  ;;  %v15614_v56 = vpop.permute.xlu1 %6471 }
 0x4a2   : > { %6582 = vst [vmem:[#allocation2 + $0x83] sm:$0xff] %v6538_v15  ;;  %v6539_v49 = vmul.f32 %v15535_v43, %v6287_v26  ;;  %v12703_v11 = vadd.f32 %v12185_v42, %v16073_v25  ;;  %v6114_v52 = vpop.f32.mrb[17].mxu0  ;;  %v6684_v0 = vld [vmem:[#allocation2 + $0x51] sm:$0xff]  ;;  %v15606_v18 = vpop.permute.xlu0 %6466 }
 0x4a3   : > { %6580 = vst [vmem:[#allocation2 + $0x73] sm:$0xff] %v6536_v28  ;;  %v6537_v36 = vmul.f32 %v15526_v4, %v6285_v60  ;;  %v12704_v62 = vadd.f32 %v6114_v52, %v16074_v39  ;;  %v12186_v34 = vpop.f32.mrb[18].mxu0  ;;  %v6687_v35 = vld [vmem:[#allocation2 + $0x69] sm:$0xff]  ;;  %v13760_v60 = vld [vmem:[%s16050_s5 + $0x38] sm:$0xff]  }
 0x4a4   : > { %6583 = vst [vmem:[#allocation2 + $0x8b] sm:$0xff] %v6539_v49  ;;  %v6254_v38 = vadd.f32 %v12703_v11, %v15515_v24  ;;  %v12705_v33 = vadd.f32 %v12186_v34, %v16075_v16  ;;  %v6117_v6 = vpop.f32.mrb[19].mxu0  ;;  %v6685_v43 = vld [vmem:[#allocation2 + $0x59] sm:$0xff]  ;;  %v6686_v55 = vld [vmem:[#allocation2 + $0x61] sm:$0xff]  ;;  %12262 = vmatpush3.bf16.msra.mxu1 %v13756_v21  ;;  %v16076_v4 = vld [vmem:[#allocation6_spill] sm:$0xff] }
 0x4a5   : > { %6581 = vst [vmem:[#allocation2 + $0x7b] sm:$0xff] %v6537_v36  ;;  %v6252_v59 = vadd.f32 %v12704_v62, %v15515_v24  ;;  %v12706_v53 = vadd.f32 %v6117_v6, %v16076_v4  ;;  %v6715_v5 = vpack.c.bf16 %v6685_v43, %v6684_v0  ;;  %v6716_v37 = vpack.c.bf16 %v6687_v35, %v6686_v55  ;;  %v16080_v15 = vld [vmem:[#allocation10_spill] sm:$0xff]  ;;  %v6482_v39 = vpop.permute.xlu1 %6481  ;;  %v16082_v43 = vld [vmem:[#allocation12_spill] sm:$0xff] }
 0x4a6   : > { %12263 = vmatprep.subr.bf16.mxu1 %v13757_v14  ;;  %v6290_v20 = vmax.f32 %v6254_v38, 0.0  ;;  %v6255_v7 = vadd.f32 %v12705_v33, %v15515_v24  ;;  %v6477_v49 = vpop.permute.xlu0 %6476  ;;  %v15632_v38 = vld [vmem:[%s16050_s5 + $0x80] sm:$0xff]   ;;  %v16081_v33 = vld [vmem:[#allocation11_spill] sm:$0xff] }
 0x4a7   : > { %v6288_v50 = vmax.f32 %v6252_v59, 0.0  ;;  %v6253_v29 = vadd.f32 %v12706_v53, %v15515_v24  ;;  %12228 = vmatmul.mubr.bf16.gmra.mrb[44].mxu1 %v6715_v5  ;;  %v16083_v53 = vld [vmem:[#allocation13_spill] sm:$0xff] }
 0x4a8   : > { %v6542_v32 = vmul.f32 %v15555_v9, %v6290_v20  ;;  %v6291_v22 = vmax.f32 %v6255_v7, 0.0  ;;  %12231 = vmatprep.mubr.bf16.mxu1 %v6716_v37  ;;  %12264 = vmatpush3.bf16.msra.mxu1 %v13757_v14 }
 0x4a9   : > { %v6540_v23 = vmul.f32 %v15541_v44, %v6288_v50  ;;  %v6289_v8 = vmax.f32 %v6253_v29, 0.0  ;;  %v12189_v13 = vpop.f32.mrb[20].mxu0  ;;  %12265 = vmatprep.subr.bf16.mxu1 %v13758_v1  ;;  %v16084_v29 = vld [vmem:[#allocation14_spill] sm:$0xff] }
 0x4aa   : > { %6586 = vst [vmem:[#allocation2 + $0xa3] sm:$0xff] %v6542_v32  ;;  %v6543_v54 = vmul.f32 %v15560_v61, %v6291_v22  ;;  %v12707_v47 = vadd.f32 %v12189_v13, %v16077_v10  ;;  %v6130_v9 = vpop.f32.mrb[21].mxu0  ;;  %v6688_v51 = vld [vmem:[#allocation2 + $0x71] sm:$0xff]  ;;  %v6492_v13 = vpop.permute.xlu1 %6491 }
 0x4ab   : > { %6584 = vst [vmem:[#allocation2 + $0x93] sm:$0xff] %v6540_v23  ;;  %v6541_v19 = vmul.f32 %v15544_v48, %v6289_v8  ;;  %v12708_v44 = vadd.f32 %v6130_v9, %v16078_v17  ;;  %v12190_v3 = vpop.f32.mrb[22].mxu0  ;;  %v6691_v27 = vld [vmem:[#allocation2 + $0x89] sm:$0xff] }
 0x4ac   : > { %6587 = vst [vmem:[#allocation2 + $0xab] sm:$0xff] %v6543_v54  ;;  %v6258_v12 = vadd.f32 %v12707_v47, %v15515_v24  ;;  %v12709_v21 = vadd.f32 %v12190_v3, %v16079_v2  ;;  %v6133_v31 = vpop.f32.mrb[23].mxu0  ;;  %v6689_v61 = vld [vmem:[#allocation2 + $0x79] sm:$0xff]  ;;  %v6690_v41 = vld [vmem:[#allocation2 + $0x81] sm:$0xff]  ;;  %12266 = vmatpush3.bf16.msra.mxu1 %v13758_v1 }
 0x4ad   : > { %6585 = vst [vmem:[#allocation2 + $0x9b] sm:$0xff] %v6541_v19  ;;  %v6256_v40 = vadd.f32 %v12708_v44, %v15515_v24  ;;  %v12710_v26 = vadd.f32 %v6133_v31, %v16080_v15  ;;  %v6717_v48 = vpack.c.bf16 %v6689_v61, %v6688_v51  ;;  %v6718_v28 = vpack.c.bf16 %v6691_v27, %v6690_v41  ;;  %v16085_v3 = vld [vmem:[#allocation15_spill] sm:$0xff]  ;;  %v16086_v31 = vld [vmem:[#allocation16_spill] sm:$0xff]  ;;  %v16087_v15 = vld [vmem:[#allocation17_spill] sm:$0xff] }
 0x4ae   : > { %12267 = vmatprep.subr.bf16.mxu1 %v13759_v63  ;;  %v6294_v42 = vmax.f32 %v6258_v12, 0.0  ;;  %v6259_v14 = vadd.f32 %v12709_v21, %v15515_v24 }
 0x4af   : > { %v6292_v25 = vmax.f32 %v6256_v40, 0.0  ;;  %v6257_v11 = vadd.f32 %v12710_v26, %v15515_v24  ;;  %12232 = vmatmul.mubr.bf16.gmra.mrb[48].mxu1 %v6717_v48 }
 0x4b0   : > { %v6546_v52 = vmul.f32 %v15590_v46, %v6294_v42  ;;  %v6295_v36 = vmax.f32 %v6259_v14, 0.0  ;;  %12235 = vmatprep.mubr.bf16.mxu1 %v6718_v28  ;;  %12268 = vmatpush3.bf16.msra.mxu1 %v13759_v63  ;;  %v6502_v42 = vpop.permute.xlu1 %6501 }
 0x4b1   : > { %v6544_v62 = vmul.f32 %v15572_v57, %v6292_v25  ;;  %v6293_v34 = vmax.f32 %v6257_v11, 0.0  ;;  %v12193_v35 = vpop.f32.mrb[24].mxu0  ;;  %12269 = vmatprep.subr.bf16.mxu1 %v13760_v60 }
 0x4b2   : > { %6590 = vst [vmem:[#allocation2 + $0xc3] sm:$0xff] %v6546_v52  ;;  %v6547_v16 = vmul.f32 %v15596_v45, %v6295_v36  ;;  %v12711_v6 = vadd.f32 %v12193_v35, %v16081_v33  ;;  %v6146_v46 = vpop.f32.mrb[25].mxu0  ;;  %v6692_v1 = vld [vmem:[#allocation2 + $0x91] sm:$0xff]  ;;  %v6487_v45 = vpop.permute.xlu0 %6486 }
 0x4b3   : > { %6588 = vst [vmem:[#allocation2 + $0xb3] sm:$0xff] %v6544_v62  ;;  %v6545_v0 = vmul.f32 %v15580_v58, %v6293_v34  ;;  %v12712_v55 = vadd.f32 %v6146_v46, %v16082_v43  ;;  %v12194_v57 = vpop.f32.mrb[26].mxu0  ;;  %v6695_v59 = vld [vmem:[#allocation2 + $0xa9] sm:$0xff]  ;;  %v16089_v43 = vld [vmem:[#allocation19_spill] sm:$0xff] }
 0x4b4   : > { %6591 = vst [vmem:[#allocation2 + $0xcb] sm:$0xff] %v6547_v16  ;;  %v6262_v4 = vadd.f32 %v12711_v6, %v15515_v24  ;;  %v12713_v5 = vadd.f32 %v12194_v57, %v16083_v53  ;;  %v6149_v37 = vpop.f32.mrb[27].mxu0  ;;  %v6693_v20 = vld [vmem:[#allocation2 + $0x99] sm:$0xff]  ;;  %v6694_v7 = vld [vmem:[#allocation2 + $0xa1] sm:$0xff]  ;;  %12270 = vmatpush3.bf16.msra.mxu1 %v13760_v60 }
 0x4b5   : > { %6589 = vst [vmem:[#allocation2 + $0xbb] sm:$0xff] %v6545_v0  ;;  %v6260_v50 = vadd.f32 %v12712_v55, %v15515_v24  ;;  %v12714_v58 = vadd.f32 %v6149_v37, %v16084_v29  ;;  %v6719_v32 = vpack.c.bf16 %v6693_v20, %v6692_v1  ;;  %v6720_v22 = vpack.c.bf16 %v6695_v59, %v6694_v7  ;;  %v6512_v59 = vpop.permute.xlu1 %6511  ;;  %v16090_v53 = vld [vmem:[#allocation20_spill] sm:$0xff]  ;;  %v16091_v7 = vld [vmem:[#allocation21_spill] sm:$0xff] }
 0x4b6   : > { %12307 = vmatprep.subr.bf16.mxu1 %v15632_v38  ;;  %v6298_v23 = vmax.f32 %v6262_v4, 0.0  ;;  %v6263_v8 = vadd.f32 %v12713_v5, %v15515_v24  ;;  %v6497_v2 = vpop.permute.xlu0 %6496 }
 0x4b7   : > { %v6296_v63 = vmax.f32 %v6260_v50, 0.0  ;;  %v6261_v54 = vadd.f32 %v12714_v58, %v15515_v24  ;;  %12236 = vmatmul.mubr.bf16.gmra.mrb[52].mxu1 %v6719_v32 }
 0x4b8   : > { %v6550_v10 = vmul.f32 %v6477_v49, %v6298_v23  ;;  %v6299_v47 = vmax.f32 %v6263_v8, 0.0  ;;  %12239 = vmatprep.mubr.bf16.mxu1 %v6720_v22  ;;  %v16088_v49 = vld [vmem:[#allocation18_spill] sm:$0xff] }
 0x4b9   : > { %v6548_v9 = vmul.f32 %v15606_v18, %v6296_v63  ;;  %v6297_v19 = vmax.f32 %v6261_v54, 0.0  ;;  %v12197_v17 = vpop.f32.mrb[28].mxu0 }
 0x4ba   : > { %6594 = vst [vmem:[#allocation2 + $0xe3] sm:$0xff] %v6550_v10  ;;  %v6551_v44 = vmul.f32 %v6482_v39, %v6299_v47  ;;  %v12715_v27 = vadd.f32 %v12197_v17, %v16085_v3  ;;  %v6162_v12 = vpop.f32.mrb[29].mxu0  ;;  %v6696_v48 = vld [vmem:[#allocation2 + $0xb1] sm:$0xff]  ;;  %v6507_v16 = vpop.permute.xlu0 %6506 }
 0x4bb   : > { %6592 = vst [vmem:[#allocation2 + $0xd3] sm:$0xff] %v6548_v9  ;;  %v6549_v21 = vmul.f32 %v15614_v56, %v6297_v19  ;;  %v12716_v51 = vadd.f32 %v6162_v12, %v16086_v31  ;;  %v12198_v61 = vpop.f32.mrb[30].mxu0  ;;  %v6699_v41 = vld [vmem:[#allocation2 + $0xc9] sm:$0xff] }
 0x4bc   : > { %6595 = vst [vmem:[#allocation2 + $0xeb] sm:$0xff] %v6551_v44  ;;  %v6266_v40 = vadd.f32 %v12715_v27, %v15515_v24  ;;  %v12717_v18 = vadd.f32 %v12198_v61, %v16087_v15  ;;  %v6165_v26 = vpop.f32.mrb[31].mxu0  ;;  %v6697_v28 = vld [vmem:[#allocation2 + $0xb9] sm:$0xff]  ;;  %v6698_v60 = vld [vmem:[#allocation2 + $0xc1] sm:$0xff]  ;;  %v6522_v44 = vpop.permute.xlu1 %6521 }
 0x4bd   : > { %6593 = vst [vmem:[#allocation2 + $0xdb] sm:$0xff] %v6549_v21  ;;  %v6264_v14 = vadd.f32 %v12716_v51, %v15515_v24  ;;  %v12718_v25 = vadd.f32 %v6165_v26, %v16088_v49  ;;  %v6721_v56 = vpack.c.bf16 %v6697_v28, %v6696_v48  ;;  %v6722_v11 = vpack.c.bf16 %v6699_v41, %v6698_v60  ;;  %v6607_v60 = vld [vmem:[#allocation2 + $0x18] sm:$0xff]  ;;  %v6606_v49 = vld [vmem:[#allocation2 + $0x10] sm:$0xff] }
 0x4be   : > { %v6302_v52 = vmax.f32 %v6266_v40, 0.0  ;;  %v6267_v36 = vadd.f32 %v12717_v18, %v15515_v24  ;;  %v6517_v10 = vpop.permute.xlu0 %6516  ;;  %v13835_v28 = vmov 0.0|0.0  }
 0x4bf   : > { %v6300_v39 = vmax.f32 %v6264_v14, 0.0  ;;  %v6265_v62 = vadd.f32 %v12718_v25, %v15515_v24  ;;  %12240 = vmatmul.mubr.bf16.gmra.mrb[56].mxu1 %v6721_v56  ;;  %v6609_v14 = vld [vmem:[#allocation2 + $0x28] sm:$0xff]  ;;  %v6641_v25 = vpack.c.bf16 %v6607_v60, %v6606_v49 }
 0x4c0   : > { %v6554_v34 = vmul.f32 %v6497_v2, %v6302_v52  ;;  %v6303_v35 = vmax.f32 %v6267_v36, 0.0  ;;  %12243 = vmatprep.mubr.bf16.mxu1 %v6722_v11  ;;  %v13762_v56 = vld [vmem:[%s16050_s5 + $0x88] sm:$0xff]   ;;  %v13763_v52 = vld [vmem:[%s16050_s5 + $0x90] sm:$0xff]   ;;  %v6611_v36 = vld [vmem:[#allocation2 + $0x38] sm:$0xff] }
 0x4c1   : > { %v15655_v33 = vmul.f32 %v6487_v45, %v6300_v39  ;;  %v6301_v6 = vmax.f32 %v6265_v62, 0.0  ;;  %v12201_v46 = vpop.f32.mrb[32].mxu0  ;;  %v6612_v39 = vld [vmem:[#allocation2 + $0x40] sm:$0xff]  ;;  %v6613_v62 = vld [vmem:[#allocation2 + $0x48] sm:$0xff] }
 0x4c2   : > { %6598 = vst [vmem:[#allocation2 + $0x103] sm:$0xff] %v6554_v34  ;;  %v15657_v0 = vmul.f32 %v6502_v42, %v6303_v35  ;;  %v12719_v55 = vadd.f32 %v12201_v46, %v16089_v43  ;;  %v6178_v57 = vpop.f32.mrb[33].mxu0  ;;  %v6700_v29 = vld [vmem:[#allocation2 + $0xd1] sm:$0xff]  ;;  %v6608_v42 = vld [vmem:[#allocation2 + $0x20] sm:$0xff] }
 0x4c3   : > { %6596 = vst [vmem:[#allocation2 + $0xf3] sm:$0xff] %v15655_v33  ;;  %v15661_v4 = vmul.f32 %v6492_v13, %v6301_v6  ;;  %v12720_v5 = vadd.f32 %v6178_v57, %v16090_v53  ;;  %v12202_v37 = vpop.f32.mrb[34].mxu0  ;;  %v6703_v1 = vld [vmem:[#allocation2 + $0xe9] sm:$0xff]  ;;  %v6642_v11 = vpack.c.bf16 %v6609_v14, %v6608_v42  ;;  %v6644_v6 = vpack.c.bf16 %v6613_v62, %v6612_v39  ;;  %v6615_v46 = vld [vmem:[#allocation2 + $0x58] sm:$0xff]  ;;  %v6616_v43 = vld [vmem:[#allocation2 + $0x60] sm:$0xff] }
 0x4c4   : > { %6599 = vst [vmem:[#allocation2 + $0x10b] sm:$0xff] %v15657_v0  ;;  %v6270_v20 = vadd.f32 %v12719_v55, %v15515_v24  ;;  %v12721_v45 = vadd.f32 %v12202_v37, %v16091_v7  ;;  %v6181_v50 = vpop.f32.mrb[35].mxu0  ;;  %v6701_v58 = vld [vmem:[#allocation2 + $0xd9] sm:$0xff]  ;;  %v6702_v32 = vld [vmem:[#allocation2 + $0xe1] sm:$0xff]  ;;  %v6610_v34 = vld [vmem:[#allocation2 + $0x30] sm:$0xff] }
 0x4c5   : > { %6597 = vst [vmem:[#allocation2 + $0xfb] sm:$0xff] %v15661_v4  ;;  %v6268_v22 = vadd.f32 %v12720_v5, %v15515_v24  ;;  %v12722_v23 = vadd.f32 %v6181_v50, %v15331_v30  ;;  %v6723_v8 = vpack.c.bf16 %v6701_v58, %v6700_v29  ;;  %v6724_v13 = vpack.c.bf16 %v6703_v1, %v6702_v32  ;;  %v6617_v55 = vld [vmem:[#allocation2 + $0x68] sm:$0xff]  ;;  %v6614_v57 = vld [vmem:[#allocation2 + $0x50] sm:$0xff]  ;;  %v6619_v1 = vld [vmem:[#allocation2 + $0x78] sm:$0xff] }
 0x4c6   : > { %v6306_v63 = vmax.f32 %v6270_v20, 0.0  ;;  %v6271_v54 = vadd.f32 %v12721_v45, %v15515_v24  ;;  %v7909_v30 = vpack.c.bf16 %v15661_v4, %v15655_v33  ;;  %v6643_v35 = vpack.c.bf16 %v6611_v36, %v6610_v34  ;;  %v13766_v53 = vld [vmem:[%s16050_s5 + $0xa8] sm:$0xff]   ;;  %v13767_v37 = vld [vmem:[%s16050_s5 + $0xb0] sm:$0xff]   ;;  %v6620_v20 = vld [vmem:[#allocation2 + $0x80] sm:$0xff] }
 0x4c7   : > { %v6304_v47 = vmax.f32 %v6268_v22, 0.0  ;;  %v6269_v9 = vadd.f32 %v12722_v23, %v15515_v24  ;;  %12244 = vmatmul.mubr.bf16.gmra.mrb[60].mxu1 %v6723_v8  ;;  %v6646_v5 = vpack.c.bf16 %v6617_v55, %v6616_v43  ;;  %v6621_v7 = vld [vmem:[#allocation2 + $0x88] sm:$0xff]  ;;  %v6618_v45 = vld [vmem:[#allocation2 + $0x70] sm:$0xff]  ;;  %v13768_v29 = vld [vmem:[%s16050_s5 + $0xb8] sm:$0xff]  }
 0x4c8   : > { %v15672_v19 = vmul.f32 %v6517_v10, %v6306_v63  ;;  %v6307_v17 = vmax.f32 %v6271_v54, 0.0  ;;  %12247 = vmatprep.mubr.bf16.mxu1 %v6724_v13  ;;  %v6647_v50 = vpack.c.bf16 %v6619_v1, %v6618_v45  ;;  %v6648_v58 = vpack.c.bf16 %v6621_v7, %v6620_v20  ;;  %v13769_v32 = vld [vmem:[%s16050_s5 + $0xc0] sm:$0xff]   ;;  %v6623_v22 = vld [vmem:[#allocation2 + $0x98] sm:$0xff]  ;;  %v6625_v8 = vld [vmem:[#allocation2 + $0xa8] sm:$0xff] }
 0x4c9   : > { %v15674_v3 = vmul.f32 %v6507_v16, %v6304_v47  ;;  %v6305_v27 = vmax.f32 %v6269_v9, 0.0  ;;  %v13764_v16 = vld [vmem:[%s16050_s5 + $0x98] sm:$0xff]   ;;  %v6624_v23 = vld [vmem:[#allocation2 + $0xa0] sm:$0xff]  ;;  %v6622_v13 = vld [vmem:[#allocation2 + $0x90] sm:$0xff] }
 0x4ca   : > { %6602 = vst [vmem:[#allocation2 + $0x123] sm:$0xff] %v15672_v19  ;;  %v15679_v12 = vmul.f32 %v6522_v44, %v6307_v17  ;;  %v6704_v21 = vld [vmem:[#allocation2 + $0xf1] sm:$0xff]  ;;  %v6649_v63 = vpack.c.bf16 %v6623_v22, %v6622_v13  ;;  %v6650_v54 = vpack.c.bf16 %v6625_v8, %v6624_v23  ;;  %v6628_v47 = vld [vmem:[#allocation2 + $0xc0] sm:$0xff]  ;;  %v6629_v9 = vld [vmem:[#allocation2 + $0xc8] sm:$0xff] }
 0x4cb   : > { %6600 = vst [vmem:[#allocation2 + $0x113] sm:$0xff] %v15674_v3  ;;  %v15682_v2 = vmul.f32 %v6512_v59, %v6305_v27  ;;  %v6707_v24 = vld [vmem:[#allocation2 + $0x109] sm:$0xff]  ;;  %v6645_v59 = vpack.c.bf16 %v6615_v46, %v6614_v57  ;;  %v6627_v10 = vld [vmem:[#allocation2 + $0xb8] sm:$0xff]  ;;  %v6652_v27 = vpack.c.bf16 %v6629_v9, %v6628_v47  ;;  %v13777_v47 = vld [vmem:[%s16050_s5 + $0x100] sm:$0xff]  }
 0x4cc   : > { %6603 = vst [vmem:[#allocation2 + $0x12b] sm:$0xff] %v15679_v12  ;;  %v6705_v31 = vld [vmem:[#allocation2 + $0xf9] sm:$0xff]  ;;  %v6706_v51 = vld [vmem:[#allocation2 + $0x101] sm:$0xff]  ;;  %v7912_v61 = vpack.c.bf16 %v15679_v12, %v15672_v19  ;;  %v6626_v17 = vld [vmem:[#allocation2 + $0xb0] sm:$0xff] }
 0x4cd   : > { %6601 = vst [vmem:[#allocation2 + $0x11b] sm:$0xff] %v15682_v2  ;;  %v6725_v41 = vpack.c.bf16 %v6705_v31, %v6704_v21  ;;  %v6726_v40 = vpack.c.bf16 %v6707_v24, %v6706_v51  ;;  %v7911_v15 = vpack.c.bf16 %v15682_v2, %v15674_v3  ;;  %v6651_v44 = vpack.c.bf16 %v6627_v10, %v6626_v17  ;;  %v6631_v24 = vld [vmem:[#allocation2 + $0xd8] sm:$0xff]  ;;  %v6632_v21 = vld [vmem:[#allocation2 + $0xe0] sm:$0xff]  ;;  %v6633_v31 = vld [vmem:[#allocation2 + $0xe8] sm:$0xff] }
 0x4ce   : > { %v6630_v51 = vld [vmem:[#allocation2 + $0xd0] sm:$0xff]  ;;  %v7195_v14 = vld [vmem:[#allocation2 + $0x2] sm:$0xff]  ;;  %v7198_v36 = vld [vmem:[#allocation2 + $0x1a] sm:$0xff] }
 0x4cf   : > { %12248 = vmatmul.mubr.bf16.gmra.mrb[64].mxu1 %v6725_v41  ;;  %v6653_v41 = vpack.c.bf16 %v6631_v24, %v6630_v51  ;;  %v7196_v49 = vld [vmem:[#allocation2 + $0xa] sm:$0xff]  ;;  %v7199_v39 = vld [vmem:[#allocation2 + $0x22] sm:$0xff]  ;;  %v7197_v34 = vld [vmem:[#allocation2 + $0x12] sm:$0xff] }
 0x4d0   : > { %12251 = vmatprep.mubr.bf16.mxu1 %v6726_v40  ;;  %v6654_v40 = vpack.c.bf16 %v6633_v31, %v6632_v21  ;;  %v7200_v62 = vld [vmem:[#allocation2 + $0x2a] sm:$0xff]  ;;  %v7202_v46 = vld [vmem:[#allocation2 + $0x3a] sm:$0xff]  ;;  %v7203_v43 = vld [vmem:[#allocation2 + $0x42] sm:$0xff] }
 0x4d1   : > { %v7204_v55 = vld [vmem:[#allocation2 + $0x4a] sm:$0xff]  ;;  %v7201_v57 = vld [vmem:[#allocation2 + $0x32] sm:$0xff]  ;;  %v7206_v1 = vld [vmem:[#allocation2 + $0x5a] sm:$0xff] }
 0x4d2   : > { %v6708_v18 = vld [vmem:[#allocation2 + $0x111] sm:$0xff]  ;;  %v7207_v20 = vld [vmem:[#allocation2 + $0x62] sm:$0xff]  ;;  %v7210_v22 = vld [vmem:[#allocation2 + $0x7a] sm:$0xff] }
 0x4d3   : > { %v7208_v7 = vld [vmem:[#allocation2 + $0x6a] sm:$0xff]  ;;  %v7205_v45 = vld [vmem:[#allocation2 + $0x52] sm:$0xff]  ;;  %v7211_v23 = vld [vmem:[#allocation2 + $0x82] sm:$0xff] }
 0x4d4   : > { %v6709_v26 = vld [vmem:[#allocation2 + $0x119] sm:$0xff]  ;;  %v7212_v8 = vld [vmem:[#allocation2 + $0x8a] sm:$0xff]  ;;  %v7215_v17 = vld [vmem:[#allocation2 + $0xa2] sm:$0xff] }
 0x4d5   : > { %v6727_v48 = vpack.c.bf16 %v6709_v26, %v6708_v18  ;;  %v6635_v18 = vld [vmem:[#allocation2 + $0xf8] sm:$0xff]  ;;  %v6636_v26 = vld [vmem:[#allocation2 + $0x100] sm:$0xff]  ;;  %v15756_v10 = vpack.c.bf16 %v7212_v8, %v7211_v23  ;;  %v13787_v8 = vld [vmem:[%s16050_s5 + $0x150] sm:$0xff]  }
 0x4d6   : > { %v7209_v13 = vld [vmem:[#allocation2 + $0x72] sm:$0xff]  ;;  %v7214_v9 = vld [vmem:[#allocation2 + $0x9a] sm:$0xff]  ;;  %v7219_v51 = vld [vmem:[#allocation2 + $0xc2] sm:$0xff] }
 0x4d7   : > { %12252 = vmatmul.mubr.bf16.gmra.mrb[68].mxu1 %v6727_v48  ;;  %v6637_v48 = vld [vmem:[#allocation2 + $0x108] sm:$0xff]  ;;  %v7218_v31 = vld [vmem:[#allocation2 + $0xba] sm:$0xff]  ;;  %v13795_v19 = vld [vmem:[%s16050_s5 + $0x190] sm:$0xff]  }
 0x4d8   : > { %12271 = vmatprep.mubr.bf16.mxu1 %v13835_v28  ;;  %v6634_v28 = vld [vmem:[#allocation2 + $0xf0] sm:$0xff]  ;;  %v6656_v42 = vpack.c.bf16 %v6637_v48, %v6636_v26  ;;  %v7222_v48 = vld [vmem:[#allocation2 + $0xda] sm:$0xff]  ;;  %v8193_v4 = vld [vmem:[#allocation2 + $0x24] sm:$0xff] }
 0x4d9   : > { %v6655_v60 = vpack.c.bf16 %v6635_v18, %v6634_v28  ;;  %v7223_v28 = vld [vmem:[#allocation2 + $0xe2] sm:$0xff]  ;;  %v8198_v12 = vld [vmem:[#allocation2 + $0x4c] sm:$0xff]  ;;  %v8199_v2 = vld [vmem:[#allocation2 + $0x54] sm:$0xff] }
 0x4da   : > { %v8196_v33 = vld [vmem:[#allocation2 + $0x3c] sm:$0xff] }
 0x4df   : > { %12272 = vmatmul.mubr.bf16.vlgmr.msra.gmra.mrb[36].mxu1 %v6641_v25  ;;  %v6639_v25 = vld [vmem:[#allocation2 + $0x118] sm:$0xff] }
 0x4e0   : > { %12275 = vmatprep.mubr.bf16.mxu1 %v6642_v11  ;;  %12308 = vmatpush3.bf16.msra.mxu1 %v15632_v38  ;;  %v13765_v38 = vld [vmem:[%s16050_s5 + $0xa0] sm:$0xff]   ;;  %v7231_v11 = vpack.c.bf16 %v7196_v49, %v7195_v14 }
 0x4e1   : > { %12309 = vmatprep.subr.bf16.mxu1 %v13762_v56 }
 0x4e4   : > { %12310 = vmatpush3.bf16.msra.mxu1 %v13762_v56  ;;  %v6638_v56 = vld [vmem:[#allocation2 + $0x110] sm:$0xff] }
 0x4e5   : > { %12311 = vmatprep.subr.bf16.mxu1 %v13763_v52 }
 0x4e7   : > { %12276 = vmatmul.mubr.bf16.gmra.mrb[40].mxu1 %v6643_v35  ;;  %v15715_v35 = vpack.c.bf16 %v7198_v36, %v7197_v34  ;;  %v7229_v34 = vld [vmem:[#allocation2 + $0x112] sm:$0xff] }
 0x4e8   : > { %12279 = vmatprep.mubr.bf16.mxu1 %v6644_v6  ;;  %12312 = vmatpush3.bf16.msra.mxu1 %v13763_v52  ;;  %v6657_v52 = vpack.c.bf16 %v6639_v25, %v6638_v56  ;;  %v15720_v6 = vpack.c.bf16 %v7200_v62, %v7199_v39  ;;  %v7226_v25 = vld [vmem:[#allocation2 + $0xfa] sm:$0xff]  ;;  %v7227_v56 = vld [vmem:[#allocation2 + $0x102] sm:$0xff] }
 0x4e9   : > { %12313 = vmatprep.subr.bf16.mxu1 %v13764_v16  ;;  %v7230_v62 = vld [vmem:[#allocation2 + $0x11a] sm:$0xff] }
 0x4ec   : > { %12314 = vmatpush3.bf16.msra.mxu1 %v13764_v16  ;;  %v13770_v16 = vld [vmem:[%s16050_s5 + $0xc8] sm:$0xff]  }
 0x4ed   : > { %12315 = vmatprep.subr.bf16.mxu1 %v13765_v38 }
 0x4ef   : > { %12280 = vmatmul.mubr.bf16.gmra.mrb[44].mxu1 %v6645_v59  ;;  %v15727_v59 = vpack.c.bf16 %v7202_v46, %v7201_v57  ;;  %v13779_v46 = vld [vmem:[%s16050_s5 + $0x110] sm:$0xff]   ;;  %v13784_v57 = vld [vmem:[%s16050_s5 + $0x138] sm:$0xff]  }
 0x4f0   : > { %12283 = vmatprep.mubr.bf16.mxu1 %v6646_v5  ;;  %12316 = vmatpush3.bf16.msra.mxu1 %v13765_v38  ;;  %v13771_v38 = vld [vmem:[%s16050_s5 + $0xd0] sm:$0xff]   ;;  %v15732_v5 = vpack.c.bf16 %v7204_v55, %v7203_v43  ;;  %v13782_v43 = vld [vmem:[%s16050_s5 + $0x128] sm:$0xff]  }
 0x4f1   : > { %12317 = vmatprep.subr.bf16.mxu1 %v13766_v53  ;;  %v13783_v55 = vld [vmem:[%s16050_s5 + $0x130] sm:$0xff]  }
 0x4f4   : > { %12318 = vmatpush3.bf16.msra.mxu1 %v13766_v53  ;;  %v13772_v53 = vld [vmem:[%s16050_s5 + $0xd8] sm:$0xff]  }
 0x4f5   : > { %12319 = vmatprep.subr.bf16.mxu1 %v13767_v37 }
 0x4f7   : > { %12284 = vmatmul.mubr.bf16.gmra.mrb[48].mxu1 %v6647_v50  ;;  %v15739_v50 = vpack.c.bf16 %v7206_v1, %v7205_v45  ;;  %v7862_v45 = vld [vmem:[#allocation2 + $0x2b] sm:$0xff] }
 0x4f8   : > { %12287 = vmatprep.mubr.bf16.mxu1 %v6648_v58  ;;  %12320 = vmatpush3.bf16.msra.mxu1 %v13767_v37  ;;  %v13773_v37 = vld [vmem:[%s16050_s5 + $0xe0] sm:$0xff]   ;;  %v15744_v58 = vpack.c.bf16 %v7208_v7, %v7207_v20  ;;  %v7859_v20 = vld [vmem:[#allocation2 + $0x13] sm:$0xff] }
 0x4f9   : > { %12321 = vmatprep.subr.bf16.mxu1 %v13768_v29 }
 0x4fc   : > { %12322 = vmatpush3.bf16.msra.mxu1 %v13768_v29  ;;  %v13774_v29 = vld [vmem:[%s16050_s5 + $0xe8] sm:$0xff]  }
 0x4fd   : > { %12359 = vmatprep.subr.bf16.mxu1 %v13769_v32 }
 0x4ff   : > { %12288 = vmatmul.mubr.bf16.gmra.mrb[52].mxu1 %v6649_v63  ;;  %v15751_v63 = vpack.c.bf16 %v7210_v22, %v7209_v13  ;;  %v13786_v22 = vld [vmem:[%s16050_s5 + $0x148] sm:$0xff]  }
 0x500   : > { %12291 = vmatprep.mubr.bf16.mxu1 %v6650_v54  ;;  %v13776_v54 = vld [vmem:[%s16050_s5 + $0xf8] sm:$0xff]   ;;  %v7866_v13 = vld [vmem:[#allocation2 + $0x4b] sm:$0xff] }
 0x507   : > { %12292 = vmatmul.mubr.bf16.gmra.mrb[56].mxu1 %v6651_v44  ;;  %v7216_v44 = vld [vmem:[#allocation2 + $0xaa] sm:$0xff] }
 0x508   : > { %12295 = vmatprep.mubr.bf16.mxu1 %v6652_v27  ;;  %v7213_v27 = vld [vmem:[#allocation2 + $0x92] sm:$0xff]  ;;  %v15763_v21 = vpack.c.bf16 %v7216_v44, %v7215_v17  ;;  %v13789_v44 = vld [vmem:[%s16050_s5 + $0x160] sm:$0xff]  }
 0x509   : > { %v7240_v24 = vpack.c.bf16 %v7214_v9, %v7213_v27  ;;  %v13788_v9 = vld [vmem:[%s16050_s5 + $0x158] sm:$0xff]   ;;  %v7870_v27 = vld [vmem:[#allocation2 + $0x6b] sm:$0xff] }
 0x50f   : > { %12296 = vmatmul.mubr.bf16.gmra.mrb[60].mxu1 %v6653_v41  ;;  %v7220_v41 = vld [vmem:[#allocation2 + $0xca] sm:$0xff] }
 0x510   : > { %12299 = vmatprep.mubr.bf16.mxu1 %v6654_v40  ;;  %v7217_v40 = vld [vmem:[#allocation2 + $0xb2] sm:$0xff]  ;;  %v7243_v26 = vpack.c.bf16 %v7220_v41, %v7219_v51  ;;  %v13790_v41 = vld [vmem:[%s16050_s5 + $0x168] sm:$0xff]  }
 0x511   : > { %v7242_v18 = vpack.c.bf16 %v7218_v31, %v7217_v40  ;;  %v7871_v51 = vld [vmem:[#allocation2 + $0x73] sm:$0xff] }
 0x517   : > { %12300 = vmatmul.mubr.bf16.gmra.mrb[64].mxu1 %v6655_v60  ;;  %v7224_v60 = vld [vmem:[#allocation2 + $0xea] sm:$0xff] }
 0x518   : > { %12303 = vmatprep.mubr.bf16.mxu1 %v6656_v42  ;;  %v7221_v42 = vld [vmem:[#allocation2 + $0xd2] sm:$0xff]  ;;  %v7245_v49 = vpack.c.bf16 %v7224_v60, %v7223_v28  ;;  %v7873_v28 = vld [vmem:[#allocation2 + $0x83] sm:$0xff] }
 0x519   : > { %v7244_v14 = vpack.c.bf16 %v7222_v48, %v7221_v42  ;;  %v7876_v48 = vld [vmem:[#allocation2 + $0x9b] sm:$0xff]  ;;  %v7875_v42 = vld [vmem:[#allocation2 + $0x93] sm:$0xff] }
 0x51f   : > { %12304 = vmatmul.mubr.bf16.gmra.mrb[68].mxu1 %v6657_v52  ;;  %v7225_v52 = vld [vmem:[#allocation2 + $0xf2] sm:$0xff] }
 0x520   : > { %12323 = vmatprep.mubr.bf16.mxu1 %v7231_v11  ;;  %v7228_v11 = vld [vmem:[#allocation2 + $0x10a] sm:$0xff]  ;;  %v7246_v36 = vpack.c.bf16 %v7226_v25, %v7225_v52  ;;  %v13793_v25 = vld [vmem:[%s16050_s5 + $0x180] sm:$0xff]  }
 0x521   : > { %v7247_v39 = vpack.c.bf16 %v7228_v11, %v7227_v56  ;;  %v7878_v56 = vld [vmem:[#allocation2 + $0xab] sm:$0xff]  ;;  %v7880_v11 = vld [vmem:[#allocation2 + $0xbb] sm:$0xff]  ;;  %v7877_v52 = vld [vmem:[#allocation2 + $0xa3] sm:$0xff] }
 0x527   : > { %12324 = vmatmul.mubr.bf16.vlgmr.msra.gmra.mrb[36].mxu1 %v15715_v35 }
 0x528   : > { %12327 = vmatprep.mubr.bf16.mxu1 %v15720_v6  ;;  %12360 = vmatpush3.bf16.msra.mxu1 %v13769_v32  ;;  %v13775_v32 = vld [vmem:[%s16050_s5 + $0xf0] sm:$0xff]  }
 0x529   : > { %12361 = vmatprep.subr.bf16.mxu1 %v13770_v16 }
 0x52c   : > { %12362 = vmatpush3.bf16.msra.mxu1 %v13770_v16  ;;  %v7248_v16 = vpack.c.bf16 %v7230_v62, %v7229_v34  ;;  %v7882_v34 = vld [vmem:[#allocation2 + $0xcb] sm:$0xff] }
 0x52d   : > { %12363 = vmatprep.subr.bf16.mxu1 %v13771_v38 }
 0x52f   : > { %12328 = vmatmul.mubr.bf16.gmra.mrb[40].mxu1 %v15727_v59 }
 0x530   : > { %12331 = vmatprep.mubr.bf16.mxu1 %v15732_v5  ;;  %12364 = vmatpush3.bf16.msra.mxu1 %v13771_v38  ;;  %v13778_v38 = vld [vmem:[%s16050_s5 + $0x108] sm:$0xff]  }
 0x531   : > { %12365 = vmatprep.subr.bf16.mxu1 %v13772_v53 }
 0x534   : > { %12366 = vmatpush3.bf16.msra.mxu1 %v13772_v53  ;;  %v7561_v53 = vld [vmem:[#allocation2 + $0x122] sm:$0xff] }
 0x535   : > { %12367 = vmatprep.subr.bf16.mxu1 %v13773_v37 }
 0x537   : > { %12332 = vmatmul.mubr.bf16.gmra.mrb[44].mxu1 %v15739_v50 }
 0x538   : > { %12335 = vmatprep.mubr.bf16.mxu1 %v15744_v58  ;;  %12368 = vmatpush3.bf16.msra.mxu1 %v13773_v37  ;;  %v7860_v37 = vld [vmem:[#allocation2 + $0x1b] sm:$0xff] }
 0x539   : > { %12369 = vmatprep.subr.bf16.mxu1 %v13774_v29  ;;  %v7895_v7 = vpack.c.bf16 %v7860_v37, %v7859_v20  ;;  %v8192_v37 = vld [vmem:[#allocation2 + $0x1c] sm:$0xff]  ;;  %v8194_v20 = vld [vmem:[#allocation2 + $0x2c] sm:$0xff] }
 0x53c   : > { %12370 = vmatpush3.bf16.msra.mxu1 %v13774_v29  ;;  %v7861_v29 = vld [vmem:[#allocation2 + $0x23] sm:$0xff] }
 0x53d   : > { %12371 = vmatprep.subr.bf16.mxu1 %v13775_v32 }
 0x53f   : > { %12336 = vmatmul.mubr.bf16.gmra.mrb[48].mxu1 %v15751_v63 }
 0x540   : > { %12339 = vmatprep.mubr.bf16.mxu1 %v15756_v10  ;;  %12372 = vmatpush3.bf16.msra.mxu1 %v13775_v32  ;;  %v7863_v32 = vld [vmem:[#allocation2 + $0x33] sm:$0xff] }
 0x541   : > { %12373 = vmatprep.subr.bf16.mxu1 %v13776_v54 }
 0x544   : > { %12374 = vmatpush3.bf16.msra.mxu1 %v13776_v54  ;;  %v7865_v54 = vld [vmem:[#allocation2 + $0x43] sm:$0xff] }
 0x545   : > { %12411 = vmatprep.subr.bf16.mxu1 %v13777_v47 }
 0x547   : > { %12340 = vmatmul.mubr.bf16.gmra.mrb[52].mxu1 %v7240_v24 }
 0x548   : > { %12343 = vmatprep.mubr.bf16.mxu1 %v15763_v21 }
 0x54f   : > { %12344 = vmatmul.mubr.bf16.gmra.mrb[56].mxu1 %v7242_v18 }
 0x550   : > { %12347 = vmatprep.mubr.bf16.mxu1 %v7243_v26 }
 0x557   : > { %12348 = vmatmul.mubr.bf16.gmra.mrb[60].mxu1 %v7244_v14 }
 0x558   : > { %12351 = vmatprep.mubr.bf16.mxu1 %v7245_v49 }
 0x55f   : > { %12352 = vmatmul.mubr.bf16.gmra.mrb[64].mxu1 %v7246_v36 }
 0x560   : > { %12355 = vmatprep.mubr.bf16.mxu1 %v7247_v39 }
 0x567   : > { %12356 = vmatmul.mubr.bf16.gmra.mrb[68].mxu1 %v7248_v16 }
 0x568   : > { %12375 = vmatprep.mubr.bf16.mxu1 %v15715_v35  ;;  %v13780_v35 = vld [vmem:[%s16050_s5 + $0x118] sm:$0xff]  }
 0x56f   : > { %12376 = vmatmul.mubr.bf16.vlgmr.msra.gmra.mrb[36].mxu1 %v15720_v6  ;;  %v13781_v6 = vld [vmem:[%s16050_s5 + $0x120] sm:$0xff]  }
 0x570   : > { %12379 = vmatprep.mubr.bf16.mxu1 %v15727_v59  ;;  %12412 = vmatpush3.bf16.msra.mxu1 %v13777_v47  ;;  %v13785_v59 = vld [vmem:[%s16050_s5 + $0x140] sm:$0xff]   ;;  %v7867_v47 = vld [vmem:[#allocation2 + $0x53] sm:$0xff] }
 0x571   : > { %12413 = vmatprep.subr.bf16.mxu1 %v13778_v38 }
 0x574   : > { %12414 = vmatpush3.bf16.msra.mxu1 %v13778_v38  ;;  %v7881_v38 = vld [vmem:[#allocation2 + $0xc3] sm:$0xff] }
 0x575   : > { %12415 = vmatprep.subr.bf16.mxu1 %v13779_v46 }
 0x577   : > { %12380 = vmatmul.mubr.bf16.gmra.mrb[40].mxu1 %v15732_v5  ;;  %v7562_v5 = vld [vmem:[#allocation2 + $0x12a] sm:$0xff] }
 0x578   : > { %12383 = vmatprep.mubr.bf16.mxu1 %v15739_v50  ;;  %12416 = vmatpush3.bf16.msra.mxu1 %v13779_v46  ;;  %v7580_v1 = vpack.c.bf16 %v7562_v5, %v7561_v53  ;;  %v7864_v50 = vld [vmem:[#allocation2 + $0x3b] sm:$0xff]  ;;  %v7906_v46 = vpack.c.bf16 %v7882_v34, %v7881_v38  ;;  %v8222_v34 = vld [vmem:[#allocation2 + $0x10c] sm:$0xff] }
 0x579   : > { %12417 = vmatprep.subr.bf16.mxu1 %v13780_v35  ;;  %v7897_v23 = vpack.c.bf16 %v7864_v50, %v7863_v32  ;;  %v8191_v5 = vld [vmem:[#allocation2 + $0x14] sm:$0xff]  ;;  %v8202_v32 = vld [vmem:[#allocation2 + $0x6c] sm:$0xff]  ;;  %v8224_v38 = vld [vmem:[#allocation2 + $0x11c] sm:$0xff] }
 0x57a   : > { %v13796_v50 = vld [vmem:[%s16050_s5 + $0x198] sm:$0xff]  }
 0x57c   : > { %12418 = vmatpush3.bf16.msra.mxu1 %v13780_v35  ;;  %v7883_v35 = vld [vmem:[#allocation2 + $0xd3] sm:$0xff] }
 0x57d   : > { %12419 = vmatprep.subr.bf16.mxu1 %v13781_v6 }
 0x57f   : > { %12384 = vmatmul.mubr.bf16.gmra.mrb[44].mxu1 %v15744_v58  ;;  %v7896_v58 = vpack.c.bf16 %v7862_v45, %v7861_v29 }
 0x580   : > { %12387 = vmatprep.mubr.bf16.mxu1 %v15751_v63  ;;  %12420 = vmatpush3.bf16.msra.mxu1 %v13781_v6  ;;  %v7868_v63 = vld [vmem:[#allocation2 + $0x5b] sm:$0xff] }
 0x581   : > { %12421 = vmatprep.subr.bf16.mxu1 %v13782_v43  ;;  %v7899_v17 = vpack.c.bf16 %v7868_v63, %v7867_v47  ;;  %v13798_v63 = vld [vmem:[%s16050_s5 + $0x1a8] sm:$0xff]  }
 0x582   : > { %v8206_v47 = vld [vmem:[#allocation2 + $0x8c] sm:$0xff] }
 0x584   : > { %12422 = vmatpush3.bf16.msra.mxu1 %v13782_v43  ;;  %v7886_v43 = vld [vmem:[#allocation2 + $0xeb] sm:$0xff] }
 0x585   : > { %12423 = vmatprep.subr.bf16.mxu1 %v13783_v55 }
 0x587   : > { %12388 = vmatmul.mubr.bf16.gmra.mrb[48].mxu1 %v15756_v10  ;;  %v7898_v10 = vpack.c.bf16 %v7866_v13, %v7865_v54 }
 0x588   : > { %12391 = vmatprep.mubr.bf16.mxu1 %v7240_v24  ;;  %12424 = vmatpush3.bf16.msra.mxu1 %v13783_v55  ;;  %v7872_v24 = vld [vmem:[#allocation2 + $0x7b] sm:$0xff]  ;;  %v7885_v55 = vld [vmem:[#allocation2 + $0xe3] sm:$0xff] }
 0x589   : > { %12425 = vmatprep.subr.bf16.mxu1 %v13784_v57  ;;  %v7901_v40 = vpack.c.bf16 %v7872_v24, %v7871_v51  ;;  %v13800_v24 = vld [vmem:[%s16050_s5 + $0x1b8] sm:$0xff]   ;;  %v8210_v51 = vld [vmem:[#allocation2 + $0xac] sm:$0xff] }
 0x58c   : > { %12426 = vmatpush3.bf16.msra.mxu1 %v13784_v57  ;;  %v7908_v57 = vpack.c.bf16 %v7886_v43, %v7885_v55  ;;  %v8225_v43 = vld [vmem:[#allocation2 + $0x124] sm:$0xff]  ;;  %v8226_v55 = vld [vmem:[#allocation2 + $0x12c] sm:$0xff] }
 0x58d   : > { %12463 = vmatprep.subr.bf16.mxu1 %v13785_v59 }
 0x58f   : > { %12392 = vmatmul.mubr.bf16.gmra.mrb[52].mxu1 %v15763_v21  ;;  %v7869_v21 = vld [vmem:[#allocation2 + $0x63] sm:$0xff] }
 0x590   : > { %12395 = vmatprep.mubr.bf16.mxu1 %v7242_v18  ;;  %v7900_v31 = vpack.c.bf16 %v7870_v27, %v7869_v21  ;;  %v13791_v18 = vld [vmem:[%s16050_s5 + $0x170] sm:$0xff]  }
 0x597   : > { %12396 = vmatmul.mubr.bf16.gmra.mrb[56].mxu1 %v7243_v26  ;;  %v7874_v26 = vld [vmem:[#allocation2 + $0x8b] sm:$0xff] }
 0x598   : > { %12399 = vmatprep.mubr.bf16.mxu1 %v7244_v14  ;;  %v7902_v60 = vpack.c.bf16 %v7874_v26, %v7873_v28  ;;  %v13792_v14 = vld [vmem:[%s16050_s5 + $0x178] sm:$0xff]   ;;  %v8214_v28 = vld [vmem:[#allocation2 + $0xcc] sm:$0xff] }
 0x59f   : > { %12400 = vmatmul.mubr.bf16.gmra.mrb[60].mxu1 %v7245_v49  ;;  %v7903_v49 = vpack.c.bf16 %v7876_v48, %v7875_v42  ;;  %v8216_v42 = vld [vmem:[#allocation2 + $0xdc] sm:$0xff] }
 0x5a0   : > { %12403 = vmatprep.mubr.bf16.mxu1 %v7246_v36  ;;  %v7904_v36 = vpack.c.bf16 %v7878_v56, %v7877_v52  ;;  %v8218_v56 = vld [vmem:[#allocation2 + $0xec] sm:$0xff]  ;;  %v8220_v52 = vld [vmem:[#allocation2 + $0xfc] sm:$0xff] }
 0x5a7   : > { %12404 = vmatmul.mubr.bf16.gmra.mrb[64].mxu1 %v7247_v39  ;;  %v7879_v39 = vld [vmem:[#allocation2 + $0xb3] sm:$0xff] }
 0x5a8   : > { %12407 = vmatprep.mubr.bf16.mxu1 %v7248_v16  ;;  %v7905_v62 = vpack.c.bf16 %v7880_v11, %v7879_v39  ;;  %v7884_v16 = vld [vmem:[#allocation2 + $0xdb] sm:$0xff] }
 0x5a9   : > { %v7907_v6 = vpack.c.bf16 %v7884_v16, %v7883_v35  ;;  %v8219_v11 = vld [vmem:[#allocation2 + $0xf4] sm:$0xff] }
 0x5aa   : > { %v8223_v16 = vld [vmem:[#allocation2 + $0x114] sm:$0xff] }
 0x5af   : > { %12408 = vmatmul.mubr.bf16.gmra.mrb[68].mxu1 %v7580_v1  ;;  %v8227_v1 = vpack.c.bf16 %v8192_v37, %v8191_v5  ;;  %v13804_v5 = vld [vmem:[%s16050_s5 + $0x1d8] sm:$0xff]   ;;  %v13805_v37 = vld [vmem:[%s16050_s5 + $0x1e0] sm:$0xff]  }
 0x5b0   : > { %12427 = vmatprep.mubr.bf16.mxu1 %v7895_v7  ;;  %v8195_v7 = vld [vmem:[#allocation2 + $0x34] sm:$0xff] }
 0x5b1   : > { %v15838_v3 = vpack.c.bf16 %v8196_v33, %v8195_v7  ;;  %v13808_v7 = vld [vmem:[%s16050_s5 + $0x1f8] sm:$0xff]   ;;  %v13809_v33 = vld [vmem:[%s16050_s5 + $0x200] sm:$0xff]  }
 0x5b7   : > { %12428 = vmatmul.mubr.bf16.vlgmr.msra.gmra.mrb[36].mxu1 %v7896_v58  ;;  %v13797_v58 = vld [vmem:[%s16050_s5 + $0x1a0] sm:$0xff]  }
 0x5b8   : > { %12431 = vmatprep.mubr.bf16.mxu1 %v7897_v23  ;;  %12464 = vmatpush3.bf16.msra.mxu1 %v13785_v59  ;;  %v7889_v59 = vld [vmem:[#allocation2 + $0x103] sm:$0xff] }
 0x5b9   : > { %12465 = vmatprep.subr.bf16.mxu1 %v13786_v22  ;;  %v7910_v53 = vpack.c.bf16 %v15657_v0, %v7889_v59  ;;  %v13794_v0 = vld [vmem:[%s16050_s5 + $0x188] sm:$0xff]   ;;  %v8204_v23 = vld [vmem:[#allocation2 + $0x7c] sm:$0xff] }
 0x5ba   : > { %v13802_v59 = vld [vmem:[%s16050_s5 + $0x1c8] sm:$0xff]  }
 0x5bc   : > { %12466 = vmatpush3.bf16.msra.mxu1 %v13786_v22  ;;  %v8203_v22 = vld [vmem:[#allocation2 + $0x74] sm:$0xff] }
 0x5bd   : > { %12467 = vmatprep.subr.bf16.mxu1 %v13787_v8  ;;  %v15862_v54 = vpack.c.bf16 %v8204_v23, %v8203_v22  ;;  %v8861_v22 = vld [vmem:[#allocation2 + $0x55] sm:$0xff]  ;;  %v8862_v23 = vld [vmem:[#allocation2 + $0x5d] sm:$0xff] }
 0x5bf   : > { %12432 = vmatmul.mubr.bf16.gmra.mrb[40].mxu1 %v7898_v10  ;;  %v13799_v10 = vld [vmem:[%s16050_s5 + $0x1b0] sm:$0xff]  }
 0x5c0   : > { %12435 = vmatprep.mubr.bf16.mxu1 %v7899_v17  ;;  %12468 = vmatpush3.bf16.msra.mxu1 %v13787_v8  ;;  %v8201_v8 = vld [vmem:[#allocation2 + $0x64] sm:$0xff]  ;;  %v8208_v17 = vld [vmem:[#allocation2 + $0x9c] sm:$0xff] }
 0x5c1   : > { %12469 = vmatprep.subr.bf16.mxu1 %v13788_v9  ;;  %v15857_v13 = vpack.c.bf16 %v8202_v32, %v8201_v8  ;;  %v13811_v32 = vld [vmem:[%s16050_s5 + $0x210] sm:$0xff]  }
 0x5c2   : > { %v8864_v8 = vld [vmem:[#allocation2 + $0x6d] sm:$0xff] }
 0x5c4   : > { %12470 = vmatpush3.bf16.msra.mxu1 %v13788_v9  ;;  %v8207_v9 = vld [vmem:[#allocation2 + $0x94] sm:$0xff] }
 0x5c5   : > { %12471 = vmatprep.subr.bf16.mxu1 %v13789_v44  ;;  %v15874_v21 = vpack.c.bf16 %v8208_v17, %v8207_v9  ;;  %v8865_v9 = vld [vmem:[#allocation2 + $0x75] sm:$0xff]  ;;  %v8866_v17 = vld [vmem:[#allocation2 + $0x7d] sm:$0xff] }
 0x5c7   : > { %12436 = vmatmul.mubr.bf16.gmra.mrb[44].mxu1 %v7900_v31  ;;  %v13801_v31 = vld [vmem:[%s16050_s5 + $0x1c0] sm:$0xff]  }
 0x5c8   : > { %12439 = vmatprep.mubr.bf16.mxu1 %v7901_v40  ;;  %12472 = vmatpush3.bf16.msra.mxu1 %v13789_v44  ;;  %v8205_v44 = vld [vmem:[#allocation2 + $0x84] sm:$0xff]  ;;  %v8212_v40 = vld [vmem:[#allocation2 + $0xbc] sm:$0xff] }
 0x5c9   : > { %12473 = vmatprep.subr.bf16.mxu1 %v13790_v41  ;;  %v15869_v27 = vpack.c.bf16 %v8206_v47, %v8205_v44  ;;  %v13813_v47 = vld [vmem:[%s16050_s5 + $0x220] sm:$0xff]   ;;  %v8868_v44 = vld [vmem:[#allocation2 + $0x8d] sm:$0xff] }
 0x5cc   : > { %12474 = vmatpush3.bf16.msra.mxu1 %v13790_v41  ;;  %v8211_v41 = vld [vmem:[#allocation2 + $0xb4] sm:$0xff] }
 0x5cd   : > { %12475 = vmatprep.subr.bf16.mxu1 %v13791_v18  ;;  %v15881_v48 = vpack.c.bf16 %v8212_v40, %v8211_v41  ;;  %v8869_v41 = vld [vmem:[#allocation2 + $0x95] sm:$0xff]  ;;  %v8870_v40 = vld [vmem:[#allocation2 + $0x9d] sm:$0xff] }
 0x5cf   : > { %12440 = vmatmul.mubr.bf16.gmra.mrb[48].mxu1 %v7902_v60  ;;  %v8215_v60 = vld [vmem:[#allocation2 + $0xd4] sm:$0xff] }
 0x5d0   : > { %12443 = vmatprep.mubr.bf16.mxu1 %v7903_v49  ;;  %12476 = vmatpush3.bf16.msra.mxu1 %v13791_v18  ;;  %v8209_v18 = vld [vmem:[#allocation2 + $0xa4] sm:$0xff] }
 0x5d1   : > { %12477 = vmatprep.subr.bf16.mxu1 %v13792_v14  ;;  %v8236_v26 = vpack.c.bf16 %v8210_v51, %v8209_v18  ;;  %v13815_v51 = vld [vmem:[%s16050_s5 + $0x230] sm:$0xff]  }
 0x5d2   : > { %v8872_v18 = vld [vmem:[#allocation2 + $0xad] sm:$0xff] }
 0x5d4   : > { %12478 = vmatpush3.bf16.msra.mxu1 %v13792_v14  ;;  %v8213_v14 = vld [vmem:[#allocation2 + $0xc4] sm:$0xff] }
 0x5d5   : > { %12515 = vmatprep.subr.bf16.mxu1 %v13793_v25  ;;  %v8238_v49 = vpack.c.bf16 %v8214_v28, %v8213_v14  ;;  %v13816_v28 = vld [vmem:[%s16050_s5 + $0x238] sm:$0xff]  }
 0x5d6   : > { %v8874_v14 = vld [vmem:[#allocation2 + $0xbd] sm:$0xff] }
 0x5d7   : > { %12444 = vmatmul.mubr.bf16.gmra.mrb[52].mxu1 %v7904_v36  ;;  %v8217_v36 = vld [vmem:[#allocation2 + $0xe4] sm:$0xff] }
 0x5d8   : > { %12447 = vmatprep.mubr.bf16.mxu1 %v7905_v62  ;;  %v8240_v39 = vpack.c.bf16 %v8218_v56, %v8217_v36  ;;  %v8241_v62 = vpack.c.bf16 %v8220_v52, %v8219_v11  ;;  %v8875_v56 = vld [vmem:[#allocation2 + $0xc5] sm:$0xff]  ;;  %v8877_v52 = vld [vmem:[#allocation2 + $0xd5] sm:$0xff]  ;;  %v8878_v36 = vld [vmem:[#allocation2 + $0xdd] sm:$0xff] }
 0x5df   : > { %12448 = vmatmul.mubr.bf16.gmra.mrb[56].mxu1 %v7906_v46  ;;  %v8221_v46 = vld [vmem:[#allocation2 + $0x104] sm:$0xff] }
 0x5e0   : > { %12451 = vmatprep.mubr.bf16.mxu1 %v7907_v6  ;;  %v8242_v35 = vpack.c.bf16 %v8222_v34, %v8221_v46  ;;  %v8243_v6 = vpack.c.bf16 %v8224_v38, %v8223_v16  ;;  %v8879_v34 = vld [vmem:[#allocation2 + $0xe5] sm:$0xff]  ;;  %v8881_v38 = vld [vmem:[#allocation2 + $0xf5] sm:$0xff]  ;;  %v8882_v46 = vld [vmem:[#allocation2 + $0xfd] sm:$0xff] }
 0x5e7   : > { %12452 = vmatmul.mubr.bf16.gmra.mrb[60].mxu1 %v7908_v57  ;;  %v8244_v57 = vpack.c.bf16 %v8226_v55, %v8225_v43  ;;  %v8883_v43 = vld [vmem:[#allocation2 + $0x105] sm:$0xff] }
 0x5e8   : > { %12455 = vmatprep.mubr.bf16.mxu1 %v7909_v30  ;;  %v15833_v30 = vpack.c.bf16 %v8194_v20, %v8193_v4  ;;  %v13807_v20 = vld [vmem:[%s16050_s5 + $0x1f0] sm:$0xff]  }
 0x5e9   : > { %v8557_v4 = vld [vmem:[#allocation2 + $0x134] sm:$0xff] }
 0x5ef   : > { %12456 = vmatmul.mubr.bf16.gmra.mrb[64].mxu1 %v7910_v53  ;;  %v13803_v53 = vld [vmem:[%s16050_s5 + $0x1d0] sm:$0xff]  }
 0x5f0   : > { %12459 = vmatprep.mubr.bf16.mxu1 %v7911_v15  ;;  %v8197_v15 = vld [vmem:[#allocation2 + $0x44] sm:$0xff] }
 0x5f1   : > { %v15845_v45 = vpack.c.bf16 %v8198_v12, %v8197_v15  ;;  %v8860_v15 = vld [vmem:[#allocation2 + $0x4d] sm:$0xff] }
 0x5f7   : > { %12460 = vmatmul.mubr.bf16.gmra.mrb[68].mxu1 %v7912_v61  ;;  %v8200_v61 = vld [vmem:[#allocation2 + $0x5c] sm:$0xff] }
 0x5f8   : > { %12479 = vmatprep.mubr.bf16.mxu1 %v8227_v1  ;;  %v15850_v29 = vpack.c.bf16 %v8200_v61, %v8199_v2  ;;  %v13806_v1 = vld [vmem:[%s16050_s5 + $0x1e8] sm:$0xff]   ;;  %v8857_v2 = vld [vmem:[#allocation2 + $0x35] sm:$0xff]  ;;  %v8858_v61 = vld [vmem:[#allocation2 + $0x3d] sm:$0xff] }
 0x5ff   : > { %12480 = vmatmul.mubr.bf16.vlgmr.msra.gmra.mrb[36].mxu1 %v15833_v30 }
 0x600   : > { %12483 = vmatprep.mubr.bf16.mxu1 %v15838_v3  ;;  %12516 = vmatpush3.bf16.msra.mxu1 %v13793_v25  ;;  %v8239_v25 = vpack.c.bf16 %v8216_v42, %v8215_v60  ;;  %v8873_v42 = vld [vmem:[#allocation2 + $0xb5] sm:$0xff] }
 0x601   : > { %12517 = vmatprep.subr.bf16.mxu1 %v13794_v0 }
 0x604   : > { %12518 = vmatpush3.bf16.msra.mxu1 %v13794_v0 }
 0x605   : > { %12519 = vmatprep.subr.bf16.mxu1 %v13795_v19 }
 0x607   : > { %12484 = vmatmul.mubr.bf16.gmra.mrb[40].mxu1 %v15845_v45 }
 0x608   : > { %12487 = vmatprep.mubr.bf16.mxu1 %v15850_v29  ;;  %12520 = vmatpush3.bf16.msra.mxu1 %v13795_v19  ;;  %v8855_v19 = vld [vmem:[#allocation2 + $0x25] sm:$0xff] }
 0x609   : > { %12521 = vmatprep.subr.bf16.mxu1 %v13796_v50 }
 0x60c   : > { %12522 = vmatpush3.bf16.msra.mxu1 %v13796_v50  ;;  %v8859_v50 = vld [vmem:[#allocation2 + $0x45] sm:$0xff] }
 0x60d   : > { %12523 = vmatprep.subr.bf16.mxu1 %v13797_v58 }
 0x60f   : > { %12488 = vmatmul.mubr.bf16.gmra.mrb[44].mxu1 %v15857_v13 }
 0x610   : > { %12491 = vmatprep.mubr.bf16.mxu1 %v15862_v54  ;;  %12524 = vmatpush3.bf16.msra.mxu1 %v13797_v58  ;;  %v8893_v58 = vpack.c.bf16 %v8860_v15, %v8859_v50  ;;  %v9194_v50 = vld [vmem:[#allocation2 + $0x5e] sm:$0xff] }
 0x611   : > { %12525 = vmatprep.subr.bf16.mxu1 %v13798_v63 }
 0x614   : > { %12526 = vmatpush3.bf16.msra.mxu1 %v13798_v63  ;;  %v8863_v63 = vld [vmem:[#allocation2 + $0x65] sm:$0xff] }
 0x615   : > { %12527 = vmatprep.subr.bf16.mxu1 %v13799_v10 }
 0x617   : > { %12492 = vmatmul.mubr.bf16.gmra.mrb[48].mxu1 %v15869_v27 }
 0x618   : > { %12495 = vmatprep.mubr.bf16.mxu1 %v15874_v21  ;;  %12528 = vmatpush3.bf16.msra.mxu1 %v13799_v10  ;;  %v8895_v10 = vpack.c.bf16 %v8864_v8, %v8863_v63  ;;  %v9198_v8 = vld [vmem:[#allocation2 + $0x7e] sm:$0xff] }
 0x619   : > { %12529 = vmatprep.subr.bf16.mxu1 %v13800_v24 }
 0x61c   : > { %12530 = vmatpush3.bf16.msra.mxu1 %v13800_v24  ;;  %v8867_v24 = vld [vmem:[#allocation2 + $0x85] sm:$0xff] }
 0x61d   : > { %12567 = vmatprep.subr.bf16.mxu1 %v13801_v31 }
 0x61f   : > { %12496 = vmatmul.mubr.bf16.gmra.mrb[52].mxu1 %v8236_v26 }
 0x620   : > { %12499 = vmatprep.mubr.bf16.mxu1 %v15881_v48 }
 0x627   : > { %12500 = vmatmul.mubr.bf16.gmra.mrb[56].mxu1 %v8238_v49 }
 0x628   : > { %12503 = vmatprep.mubr.bf16.mxu1 %v8239_v25 }
 0x62f   : > { %12504 = vmatmul.mubr.bf16.gmra.mrb[60].mxu1 %v8240_v39 }
 0x630   : > { %12507 = vmatprep.mubr.bf16.mxu1 %v8241_v62 }
 0x637   : > { %12508 = vmatmul.mubr.bf16.gmra.mrb[64].mxu1 %v8242_v35 }
 0x638   : > { %12511 = vmatprep.mubr.bf16.mxu1 %v8243_v6 }
 0x63f   : > { %12512 = vmatmul.mubr.bf16.gmra.mrb[68].mxu1 %v8244_v57 }
 0x640   : > { %12531 = vmatprep.mubr.bf16.mxu1 %v15833_v30  ;;  %v8558_v30 = vld [vmem:[#allocation2 + $0x13c] sm:$0xff] }
 0x641   : > { %v8576_v0 = vpack.c.bf16 %v8558_v30, %v8557_v4  ;;  %v9188_v4 = vld [vmem:[#allocation2 + $0x2e] sm:$0xff]  ;;  %v9187_v30 = vld [vmem:[#allocation2 + $0x26] sm:$0xff] }
 0x647   : > { %12532 = vmatmul.mubr.bf16.vlgmr.msra.gmra.mrb[36].mxu1 %v15838_v3  ;;  %v8856_v3 = vld [vmem:[#allocation2 + $0x2d] sm:$0xff] }
 0x648   : > { %12535 = vmatprep.mubr.bf16.mxu1 %v15845_v45  ;;  %12568 = vmatpush3.bf16.msra.mxu1 %v13801_v31  ;;  %v8891_v12 = vpack.c.bf16 %v8856_v3, %v8855_v19  ;;  %v8892_v45 = vpack.c.bf16 %v8858_v61, %v8857_v2  ;;  %v8897_v31 = vpack.c.bf16 %v8868_v44, %v8867_v24  ;;  %v9189_v3 = vld [vmem:[#allocation2 + $0x36] sm:$0xff]  ;;  %v9190_v19 = vld [vmem:[#allocation2 + $0x3e] sm:$0xff]  ;;  %v9191_v61 = vld [vmem:[#allocation2 + $0x46] sm:$0xff] }
 0x649   : > { %12569 = vmatprep.subr.bf16.mxu1 %v13802_v59  ;;  %v9224_v2 = vpack.c.bf16 %v9190_v19, %v9189_v3 }
 0x64c   : > { %12570 = vmatpush3.bf16.msra.mxu1 %v13802_v59  ;;  %v8886_v59 = vld [vmem:[#allocation2 + $0x11d] sm:$0xff] }
 0x64d   : > { %12571 = vmatprep.subr.bf16.mxu1 %v13803_v53 }
 0x64f   : > { %12536 = vmatmul.mubr.bf16.gmra.mrb[40].mxu1 %v15850_v29  ;;  %v13810_v29 = vld [vmem:[%s16050_s5 + $0x208] sm:$0xff]  }
 0x650   : > { %12539 = vmatprep.mubr.bf16.mxu1 %v15857_v13  ;;  %12572 = vmatpush3.bf16.msra.mxu1 %v13803_v53  ;;  %v8894_v13 = vpack.c.bf16 %v8862_v23, %v8861_v22  ;;  %v8887_v53 = vld [vmem:[#allocation2 + $0x125] sm:$0xff]  ;;  %v9197_v23 = vld [vmem:[#allocation2 + $0x76] sm:$0xff] }
 0x651   : > { %12573 = vmatprep.subr.bf16.mxu1 %v13804_v5  ;;  %v9228_v63 = vpack.c.bf16 %v9198_v8, %v9197_v23 }
 0x654   : > { %12574 = vmatpush3.bf16.msra.mxu1 %v13804_v5  ;;  %v8888_v5 = vld [vmem:[#allocation2 + $0x12d] sm:$0xff] }
 0x655   : > { %12575 = vmatprep.subr.bf16.mxu1 %v13805_v37 }
 0x657   : > { %12540 = vmatmul.mubr.bf16.gmra.mrb[44].mxu1 %v15862_v54  ;;  %v13812_v54 = vld [vmem:[%s16050_s5 + $0x218] sm:$0xff]  }
 0x658   : > { %12543 = vmatprep.mubr.bf16.mxu1 %v15869_v27  ;;  %12576 = vmatpush3.bf16.msra.mxu1 %v13805_v37  ;;  %v8896_v27 = vpack.c.bf16 %v8866_v17, %v8865_v9  ;;  %v9202_v9 = vld [vmem:[#allocation2 + $0x9e] sm:$0xff]  ;;  %v9204_v17 = vld [vmem:[#allocation2 + $0xae] sm:$0xff] }
 0x659   : > { %12577 = vmatprep.subr.bf16.mxu1 %v13806_v1 }
 0x65c   : > { %12578 = vmatpush3.bf16.msra.mxu1 %v13806_v1  ;;  %v8907_v1 = vpack.c.bf16 %v8888_v5, %v8887_v53 }
 0x65d   : > { %12579 = vmatprep.subr.bf16.mxu1 %v13807_v20 }
 0x65f   : > { %12544 = vmatmul.mubr.bf16.gmra.mrb[48].mxu1 %v15874_v21  ;;  %v13814_v21 = vld [vmem:[%s16050_s5 + $0x228] sm:$0xff]  }
 0x660   : > { %12547 = vmatprep.mubr.bf16.mxu1 %v8236_v26  ;;  %12580 = vmatpush3.bf16.msra.mxu1 %v13807_v20  ;;  %v8898_v26 = vpack.c.bf16 %v8870_v40, %v8869_v41  ;;  %v8889_v20 = vld [vmem:[#allocation2 + $0x135] sm:$0xff]  ;;  %v9207_v40 = vld [vmem:[#allocation2 + $0xc6] sm:$0xff] }
 0x661   : > { %12581 = vmatprep.subr.bf16.mxu1 %v13808_v7 }
 0x664   : > { %12582 = vmatpush3.bf16.msra.mxu1 %v13808_v7  ;;  %v8890_v7 = vld [vmem:[#allocation2 + $0x13d] sm:$0xff] }
 0x665   : > { %12619 = vmatprep.subr.bf16.mxu1 %v13809_v33 }
 0x667   : > { %12548 = vmatmul.mubr.bf16.gmra.mrb[52].mxu1 %v15881_v48  ;;  %v8871_v48 = vld [vmem:[#allocation2 + $0xa5] sm:$0xff] }
 0x668   : > { %12551 = vmatprep.mubr.bf16.mxu1 %v8238_v49  ;;  %v8899_v60 = vpack.c.bf16 %v8872_v18, %v8871_v48  ;;  %v8876_v49 = vld [vmem:[#allocation2 + $0xcd] sm:$0xff]  ;;  %v9210_v48 = vld [vmem:[#allocation2 + $0xde] sm:$0xff] }
 0x669   : > { %v8901_v11 = vpack.c.bf16 %v8876_v49, %v8875_v56  ;;  %v9213_v49 = vld [vmem:[#allocation2 + $0xf6] sm:$0xff]  ;;  %v9216_v56 = vld [vmem:[#allocation2 + $0x10e] sm:$0xff] }
 0x66f   : > { %12552 = vmatmul.mubr.bf16.gmra.mrb[56].mxu1 %v8239_v25  ;;  %v8900_v25 = vpack.c.bf16 %v8874_v14, %v8873_v42  ;;  %v9211_v42 = vld [vmem:[#allocation2 + $0xe6] sm:$0xff] }
 0x670   : > { %12555 = vmatprep.mubr.bf16.mxu1 %v8240_v39  ;;  %v8880_v39 = vld [vmem:[#allocation2 + $0xed] sm:$0xff] }
 0x671   : > { %v8903_v16 = vpack.c.bf16 %v8880_v39, %v8879_v34  ;;  %v9217_v39 = vld [vmem:[#allocation2 + $0x116] sm:$0xff]  ;;  %v9219_v34 = vld [vmem:[#allocation2 + $0x126] sm:$0xff] }
 0x677   : > { %12556 = vmatmul.mubr.bf16.gmra.mrb[60].mxu1 %v8241_v62  ;;  %v8902_v62 = vpack.c.bf16 %v8878_v36, %v8877_v52  ;;  %v9215_v52 = vld [vmem:[#allocation2 + $0x106] sm:$0xff] }
 0x678   : > { %12559 = vmatprep.mubr.bf16.mxu1 %v8242_v35  ;;  %v8884_v35 = vld [vmem:[#allocation2 + $0x10d] sm:$0xff]  ;;  %v9237_v36 = vpack.c.bf16 %v9216_v56, %v9215_v52 }
 0x679   : > { %v8905_v55 = vpack.c.bf16 %v8884_v35, %v8883_v43  ;;  %v9221_v35 = vld [vmem:[#allocation2 + $0x136] sm:$0xff] }
 0x67f   : > { %12560 = vmatmul.mubr.bf16.gmra.mrb[64].mxu1 %v8243_v6  ;;  %v8904_v6 = vpack.c.bf16 %v8882_v46, %v8881_v38 }
 0x680   : > { %12563 = vmatprep.mubr.bf16.mxu1 %v8244_v57  ;;  %v8885_v57 = vld [vmem:[#allocation2 + $0x115] sm:$0xff] }
 0x681   : > { %v8906_v37 = vpack.c.bf16 %v8886_v59, %v8885_v57  ;;  %v9642_v57 = vpop.permute.xlu1 %9641 }
 0x685   : > { %v9652_v53 = vpop.permute.xlu1 %9651 }
 0x687   : > { %12564 = vmatmul.mubr.bf16.gmra.mrb[68].mxu1 %v8576_v0  ;;  %v9223_v0 = vpack.c.bf16 %v9188_v4, %v9187_v30 }
 0x688   : > { %12583 = vmatprep.mubr.bf16.mxu1 %v8891_v12  ;;  %v9192_v12 = vld [vmem:[#allocation2 + $0x4e] sm:$0xff] }
 0x689   : > { %v9225_v15 = vpack.c.bf16 %v9192_v12, %v9191_v61 }
 0x68f   : > { %12584 = vmatmul.mubr.bf16.vlgmr.msra.gmra.mrb[36].mxu1 %v8892_v45  ;;  %v9193_v45 = vld [vmem:[#allocation2 + $0x56] sm:$0xff] }
 0x690   : > { %12587 = vmatprep.mubr.bf16.mxu1 %v8893_v58  ;;  %12620 = vmatpush3.bf16.msra.mxu1 %v13809_v33  ;;  %v8908_v33 = vpack.c.bf16 %v8890_v7, %v8889_v20  ;;  %v9226_v58 = vpack.c.bf16 %v9194_v50, %v9193_v45 }
 0x691   : > { %12621 = vmatprep.subr.bf16.mxu1 %v13810_v29 }
 0x694   : > { %12622 = vmatpush3.bf16.msra.mxu1 %v13810_v29  ;;  %v9196_v29 = vld [vmem:[#allocation2 + $0x6e] sm:$0xff] }
 0x695   : > { %12623 = vmatprep.subr.bf16.mxu1 %v13811_v32 }
 0x697   : > { %12588 = vmatmul.mubr.bf16.gmra.mrb[40].mxu1 %v8894_v13  ;;  %v9200_v13 = vld [vmem:[#allocation2 + $0x8e] sm:$0xff] }
 0x698   : > { %12591 = vmatprep.mubr.bf16.mxu1 %v8895_v10  ;;  %12624 = vmatpush3.bf16.msra.mxu1 %v13811_v32  ;;  %v9195_v32 = vld [vmem:[#allocation2 + $0x66] sm:$0xff] }
 0x699   : > { %12625 = vmatprep.subr.bf16.mxu1 %v13812_v54  ;;  %v9227_v22 = vpack.c.bf16 %v9196_v29, %v9195_v32 }
 0x69c   : > { %12626 = vmatpush3.bf16.msra.mxu1 %v13812_v54  ;;  %v9199_v54 = vld [vmem:[#allocation2 + $0x86] sm:$0xff] }
 0x69d   : > { %12627 = vmatprep.subr.bf16.mxu1 %v13813_v47  ;;  %v9229_v10 = vpack.c.bf16 %v9200_v13, %v9199_v54 }
 0x69f   : > { %12592 = vmatmul.mubr.bf16.gmra.mrb[44].mxu1 %v8896_v27  ;;  %v9203_v27 = vld [vmem:[#allocation2 + $0xa6] sm:$0xff] }
 0x6a0   : > { %12595 = vmatprep.mubr.bf16.mxu1 %v8897_v31  ;;  %12628 = vmatpush3.bf16.msra.mxu1 %v13813_v47  ;;  %v9201_v47 = vld [vmem:[#allocation2 + $0x96] sm:$0xff]  ;;  %v9231_v24 = vpack.c.bf16 %v9204_v17, %v9203_v27  ;;  %v9206_v31 = vld [vmem:[#allocation2 + $0xbe] sm:$0xff] }
 0x6a1   : > { %12629 = vmatprep.subr.bf16.mxu1 %v13814_v21  ;;  %v9230_v44 = vpack.c.bf16 %v9202_v9, %v9201_v47 }
 0x6a4   : > { %12630 = vmatpush3.bf16.msra.mxu1 %v13814_v21  ;;  %v9205_v21 = vld [vmem:[#allocation2 + $0xb6] sm:$0xff] }
 0x6a5   : > { %12631 = vmatprep.subr.bf16.mxu1 %v13815_v51  ;;  %v9232_v41 = vpack.c.bf16 %v9206_v31, %v9205_v21 }
 0x6a7   : > { %12596 = vmatmul.mubr.bf16.gmra.mrb[48].mxu1 %v8898_v26  ;;  %v9209_v26 = vld [vmem:[#allocation2 + $0xd6] sm:$0xff] }
 0x6a8   : > { %12599 = vmatprep.mubr.bf16.mxu1 %v8899_v60  ;;  %12632 = vmatpush3.bf16.msra.mxu1 %v13815_v51  ;;  %v9208_v51 = vld [vmem:[#allocation2 + $0xce] sm:$0xff]  ;;  %v9234_v60 = vpack.c.bf16 %v9210_v48, %v9209_v26 }
 0x6a9   : > { %12633 = vmatprep.subr.bf16.mxu1 %v13816_v28  ;;  %v9233_v18 = vpack.c.bf16 %v9208_v51, %v9207_v40 }
 0x6ac   : > { %12634 = vmatpush3.bf16.msra.mxu1 %v13816_v28  ;;  %v9212_v28 = vld [vmem:[#allocation2 + $0xee] sm:$0xff] }
 0x6ad   : > { %v9235_v14 = vpack.c.bf16 %v9212_v28, %v9211_v42 }
 0x6af   : > { %12600 = vmatmul.mubr.bf16.gmra.mrb[52].mxu1 %v8900_v25  ;;  %v9214_v25 = vld [vmem:[#allocation2 + $0xfe] sm:$0xff] }
 0x6b0   : > { %12603 = vmatprep.mubr.bf16.mxu1 %v8901_v11  ;;  %v9236_v11 = vpack.c.bf16 %v9214_v25, %v9213_v49 }
 0x6b7   : > { %12604 = vmatmul.mubr.bf16.gmra.mrb[56].mxu1 %v8902_v62  ;;  %v9218_v62 = vld [vmem:[#allocation2 + $0x11e] sm:$0xff] }
 0x6b8   : > { %12607 = vmatprep.mubr.bf16.mxu1 %v8903_v16  ;;  %v9220_v16 = vld [vmem:[#allocation2 + $0x12e] sm:$0xff]  ;;  %v9238_v38 = vpack.c.bf16 %v9218_v62, %v9217_v39 }
 0x6b9   : > { %v9239_v46 = vpack.c.bf16 %v9220_v16, %v9219_v34 }
 0x6bf   : > { %12608 = vmatmul.mubr.bf16.gmra.mrb[60].mxu1 %v8904_v6  ;;  %v9222_v6 = vld [vmem:[#allocation2 + $0x13e] sm:$0xff] }
 0x6c0   : > { %12611 = vmatprep.mubr.bf16.mxu1 %v8905_v55  ;;  %v9240_v43 = vpack.c.bf16 %v9222_v6, %v9221_v35  ;;  %v9637_v55 = vpop.permute.xlu0 %9636 }
 0x6c4   : > { %v9647_v59 = vpop.permute.xlu0 %9646 }
 0x6c7   : > { %12612 = vmatmul.mubr.bf16.gmra.mrb[64].mxu1 %v8906_v37  ;;  %v9662_v37 = vpop.permute.xlu1 %9661 }
 0x6c8   : > { %12615 = vmatprep.mubr.bf16.mxu1 %v8907_v1  ;;  %v9657_v5 = vpop.permute.xlu0 %9656 }
 0x6cb   : > { %v9672_v20 = vpop.permute.xlu1 %9671 }
 0x6cc   : > { %v9667_v1 = vpop.permute.xlu0 %9666 }
 0x6cf   : > { %12616 = vmatmul.mubr.bf16.gmra.mrb[68].mxu1 %v8908_v33  ;;  %v15940_v33 = vpop.permute.xlu1 %9681 }
 0x6d0   : > { %12635 = vmatprep.mubr.bf16.mxu1 %v9223_v0  ;;  %v15938_v7 = vpop.permute.xlu0 %9676  ;;  %v15947_v0 = vld [vmem:[%s16051_s6] ss:$0 sm:$0xff] }
 0x6d3   : > { %v15942_v30 = vpop.permute.xlu1 %9691 }
 0x6d4   : > { %v9687_v4 = vpop.permute.xlu0 %9686 }
 0x6d7   : > { %12636 = vmatmul.mubr.bf16.vlgmr.msra.gmra.mrb[36].mxu1 %v9224_v2 }
 0x6d8   : > { %12639 = vmatprep.mubr.bf16.mxu1 %v9225_v15  ;;  %v15951_v2 = vpop.permute.xlu0 %9696 }
 0x6df   : > { %12640 = vmatmul.mubr.bf16.gmra.mrb[40].mxu1 %v9226_v58  ;;  %v15955_v58 = vpop.permute.xlu1 %9701 }
 0x6e0   : > { %12643 = vmatprep.mubr.bf16.mxu1 %v9227_v22 }
 0x6e3   : > { %v9712_v27 = vpop.permute.xlu1 %9711 }
 0x6e7   : > { %12644 = vmatmul.mubr.bf16.gmra.mrb[44].mxu1 %v9228_v63  ;;  %v15974_v49 = vpop.permute.xlu1 %9721 }
 0x6e8   : > { %12647 = vmatprep.mubr.bf16.mxu1 %v9229_v10  ;;  %v9707_v10 = vpop.permute.xlu0 %9706 }
 0x6ec   : > { %v15971_v28 = vpop.permute.xlu0 %9716 }
 0x6ef   : > { %12648 = vmatmul.mubr.bf16.gmra.mrb[48].mxu1 %v9230_v44 }
 0x6f0   : > { %12651 = vmatprep.mubr.bf16.mxu1 %v9231_v24 }
 0x6f7   : > { %12652 = vmatmul.mubr.bf16.gmra.mrb[52].mxu1 %v9232_v41 }
 0x6f8   : > { %12655 = vmatprep.mubr.bf16.mxu1 %v9233_v18 }
 0x6ff   : > { %12656 = vmatmul.mubr.bf16.gmra.mrb[56].mxu1 %v9234_v60 }
 0x700   : > { %12659 = vmatprep.mubr.bf16.mxu1 %v9235_v14 }
 0x707   : > { %12660 = vmatmul.mubr.bf16.gmra.mrb[60].mxu1 %v9236_v11 }
 0x708   : > { %12663 = vmatprep.mubr.bf16.mxu1 %v9237_v36 }
 0x70f   : > { %12664 = vmatmul.mubr.bf16.gmra.mrb[64].mxu1 %v9238_v38  ;;  %v9727_v38 = vpop.permute.xlu0 %9726 }
 0x710   : > { %12667 = vmatprep.mubr.bf16.mxu1 %v9239_v46 }
 0x717   : > { %12668 = vmatmul.mubr.bf16.gmra.mrb[68].mxu1 %v9240_v43 }
 0x7aa   : > { %v12637_v3 = vpop.f32.mrb[36].mxu1 }
 0x7ab   : > { %v9528_v19 = vadd.f32 %v12637_v3, %v15947_v0  ;;  %v9340_v12 = vpop.f32.mrb[37].mxu1  ;;  %v9737_v3 = vpop.permute.xlu0 %9736 }
 0x7ac   : > { %v9526_v61 = vadd.f32 %v15947_v0, %v9340_v12  ;;  %v12638_v15 = vpop.f32.mrb[38].mxu1 }
 0x7ad   : > { %v9564_v45 = vmax.f32 %v9528_v19, 0.0  ;;  %v9529_v50 = vadd.f32 %v12638_v15, %v15947_v0  ;;  %v9343_v29 = vpop.f32.mrb[39].mxu1 }
 0x7ae   : > { %v9562_v32 = vmax.f32 %v9526_v61, 0.0  ;;  %v9527_v22 = vadd.f32 %v15947_v0, %v9343_v29 }
 0x7af   : > { %v9816_v23 = vmul.f32 %v9647_v59, %v9564_v45  ;;  %v9565_v8 = vmax.f32 %v9529_v50, 0.0 }
 0x7b0   : > { %v9814_v13 = vmul.f32 %v9637_v55, %v9562_v32  ;;  %v9563_v63 = vmax.f32 %v9527_v22, 0.0  ;;  %v9732_v55 = vpop.permute.xlu1 %9731 }
 0x7b1   : > { %9852 = vst [vmem:[%s15960_s21 + $0x10] sm:$0xff] %v9816_v23  ;;  %v9817_v54 = vmul.f32 %v9652_v53, %v9565_v8  ;;  %v9747_v23 = vpop.permute.xlu0 %9746 }
 0x7b2   : > { %9850 = vst [vmem:[%s15960_s21] sm:$0xff] %v9814_v13  ;;  %v9815_v47 = vmul.f32 %v9642_v57, %v9563_v63  ;;  %v12641_v9 = vpop.f32.mrb[40].mxu1 }
 0x7b3   : > { %9853 = vst [vmem:[%s15960_s21 + $0x18] sm:$0xff] %v9817_v54  ;;  %v9532_v17 = vadd.f32 %v12641_v9, %v15947_v0  ;;  %v9356_v44 = vpop.f32.mrb[41].mxu1 }
 0x7b4   : > { %9851 = vst [vmem:[%s15960_s21 + $0x8] sm:$0xff] %v9815_v47  ;;  %v9530_v24 = vadd.f32 %v15947_v0, %v9356_v44  ;;  %v12642_v21 = vpop.f32.mrb[42].mxu1  ;;  %v9742_v61 = vpop.permute.xlu1 %9741 }
 0x7b5   : > { %v9568_v31 = vmax.f32 %v9532_v17, 0.0  ;;  %v9533_v51 = vadd.f32 %v12642_v21, %v15947_v0  ;;  %v9359_v41 = vpop.f32.mrb[43].mxu1 }
 0x7b6   : > { %v9566_v40 = vmax.f32 %v9530_v24, 0.0  ;;  %v9531_v18 = vadd.f32 %v15947_v0, %v9359_v41 }
 0x7b7   : > { %v9820_v26 = vmul.f32 %v9667_v1, %v9568_v31  ;;  %v9569_v48 = vmax.f32 %v9533_v51, 0.0  ;;  %v9757_v31 = vpop.permute.xlu0 %9756 }
 0x7b8   : > { %v9818_v60 = vmul.f32 %v9657_v5, %v9566_v40  ;;  %v9567_v42 = vmax.f32 %v9531_v18, 0.0  ;;  %v9752_v47 = vpop.permute.xlu1 %9751 }
 0x7b9   : > { %9856 = vst [vmem:[%s15960_s21 + $0x30] sm:$0xff] %v9820_v26  ;;  %v9821_v14 = vmul.f32 %v9672_v20, %v9569_v48 }
 0x7ba   : > { %9854 = vst [vmem:[%s15960_s21 + $0x20] sm:$0xff] %v9818_v60  ;;  %v9819_v25 = vmul.f32 %v9662_v37, %v9567_v42  ;;  %v12645_v56 = vpop.f32.mrb[44].mxu1 }
 0x7bb   : > { %9857 = vst [vmem:[%s15960_s21 + $0x38] sm:$0xff] %v9821_v14  ;;  %v9536_v11 = vadd.f32 %v12645_v56, %v15947_v0  ;;  %v9372_v52 = vpop.f32.mrb[45].mxu1 }
 0x7bc   : > { %9855 = vst [vmem:[%s15960_s21 + $0x28] sm:$0xff] %v9819_v25  ;;  %v9534_v36 = vadd.f32 %v15947_v0, %v9372_v52  ;;  %v12646_v39 = vpop.f32.mrb[46].mxu1  ;;  %v9762_v18 = vpop.permute.xlu1 %9761 }
 0x7bd   : > { %v9572_v62 = vmax.f32 %v9536_v11, 0.0  ;;  %v9537_v34 = vadd.f32 %v12646_v39, %v15947_v0  ;;  %v9375_v16 = vpop.f32.mrb[47].mxu1  ;;  %v9767_v52 = vpop.permute.xlu0 %9766 }
 0x7be   : > { %v9570_v46 = vmax.f32 %v9534_v36, 0.0  ;;  %v9535_v35 = vadd.f32 %v15947_v0, %v9375_v16 }
 0x7bf   : > { %v9824_v6 = vmul.f32 %v9687_v4, %v9572_v62  ;;  %v9573_v43 = vmax.f32 %v9537_v34, 0.0 }
 0x7c0   : > { %v9822_v57 = vmul.f32 %v15938_v7, %v9570_v46  ;;  %v9571_v59 = vmax.f32 %v9535_v35, 0.0  ;;  %v9772_v34 = vpop.permute.xlu1 %9771 }
 0x7c1   : > { %9860 = vst [vmem:[%s15960_s21 + $0x50] sm:$0xff] %v9824_v6  ;;  %v9825_v53 = vmul.f32 %v15942_v30, %v9573_v43 }
 0x7c2   : > { %9858 = vst [vmem:[%s15960_s21 + $0x40] sm:$0xff] %v9822_v57  ;;  %v9823_v5 = vmul.f32 %v15940_v33, %v9571_v59  ;;  %v12649_v37 = vpop.f32.mrb[48].mxu1  ;;  %v9777_v57 = vpop.permute.xlu0 %9776 }
 0x7c3   : > { %9861 = vst [vmem:[%s15960_s21 + $0x58] sm:$0xff] %v9825_v53  ;;  %v9540_v1 = vadd.f32 %v12649_v37, %v15947_v0  ;;  %v9388_v20 = vpop.f32.mrb[49].mxu1 }
 0x7c4   : > { %9859 = vst [vmem:[%s15960_s21 + $0x48] sm:$0xff] %v9823_v5  ;;  %v9538_v4 = vadd.f32 %v15947_v0, %v9388_v20  ;;  %v12650_v19 = vpop.f32.mrb[50].mxu1  ;;  %v9782_v20 = vpop.permute.xlu1 %9781 }
 0x7c5   : > { %v9576_v7 = vmax.f32 %v9540_v1, 0.0  ;;  %v9541_v12 = vadd.f32 %v12650_v19, %v15947_v0  ;;  %v9391_v30 = vpop.f32.mrb[51].mxu1 }
 0x7c6   : > { %v9574_v15 = vmax.f32 %v9538_v4, 0.0  ;;  %v9539_v33 = vadd.f32 %v15947_v0, %v9391_v30 }
 0x7c7   : > { %v9828_v45 = vmul.f32 %v9707_v10, %v9576_v7  ;;  %v9577_v50 = vmax.f32 %v9541_v12, 0.0 }
 0x7c8   : > { %v9826_v29 = vmul.f32 %v15951_v2, %v9574_v15  ;;  %v9575_v32 = vmax.f32 %v9539_v33, 0.0  ;;  %v9787_v15 = vpop.permute.xlu0 %9786 }
 0x7c9   : > { %9864 = vst [vmem:[%s15960_s21 + $0x70] sm:$0xff] %v9828_v45  ;;  %v9829_v22 = vmul.f32 %v9712_v27, %v9577_v50 }
 0x7ca   : > { %9862 = vst [vmem:[%s15960_s21 + $0x60] sm:$0xff] %v9826_v29  ;;  %v9827_v8 = vmul.f32 %v15955_v58, %v9575_v32  ;;  %v12653_v13 = vpop.f32.mrb[52].mxu1  ;;  %v9792_v32 = vpop.permute.xlu1 %9791 }
 0x7cb   : > { %9865 = vst [vmem:[%s15960_s21 + $0x78] sm:$0xff] %v9829_v22  ;;  %v9544_v63 = vadd.f32 %v12653_v13, %v15947_v0  ;;  %v9404_v54 = vpop.f32.mrb[53].mxu1 }
 0x7cc   : > { %9863 = vst [vmem:[%s15960_s21 + $0x68] sm:$0xff] %v9827_v8  ;;  %v9542_v10 = vadd.f32 %v15947_v0, %v9404_v54  ;;  %v12654_v9 = vpop.f32.mrb[54].mxu1 }
 0x7cd   : > { %v9580_v2 = vmax.f32 %v9544_v63, 0.0  ;;  %v9545_v17 = vadd.f32 %v12654_v9, %v15947_v0  ;;  %v9407_v44 = vpop.f32.mrb[55].mxu1 }
 0x7ce   : > { %v9578_v27 = vmax.f32 %v9542_v10, 0.0  ;;  %v9543_v58 = vadd.f32 %v15947_v0, %v9407_v44 }
 0x7cf   : > { %v9832_v24 = vmul.f32 %v9727_v38, %v9580_v2  ;;  %v9581_v21 = vmax.f32 %v9545_v17, 0.0  ;;  %v9797_v2 = vpop.permute.xlu0 %9796 }
 0x7d0   : > { %v9830_v51 = vmul.f32 %v15971_v28, %v9578_v27  ;;  %v9579_v41 = vmax.f32 %v9543_v58, 0.0  ;;  %v9802_v58 = vpop.permute.xlu1 %9801 }
 0x7d1   : > { %9868 = vst [vmem:[%s15960_s21 + $0x90] sm:$0xff] %v9832_v24  ;;  %v9833_v40 = vmul.f32 %v9732_v55, %v9581_v21 }
 0x7d2   : > { %9866 = vst [vmem:[%s15960_s21 + $0x80] sm:$0xff] %v9830_v51  ;;  %v9831_v26 = vmul.f32 %v15974_v49, %v9579_v41  ;;  %v12657_v48 = vpop.f32.mrb[56].mxu1 }
 0x7d3   : > { %9869 = vst [vmem:[%s15960_s21 + $0x98] sm:$0xff] %v9833_v40  ;;  %v9548_v60 = vadd.f32 %v12657_v48, %v15947_v0  ;;  %v9420_v42 = vpop.f32.mrb[57].mxu1 }
 0x7d4   : > { %9867 = vst [vmem:[%s15960_s21 + $0x88] sm:$0xff] %v9831_v26  ;;  %v9546_v14 = vadd.f32 %v15947_v0, %v9420_v42  ;;  %v12658_v25 = vpop.f32.mrb[58].mxu1 }
 0x7d5   : > { %v9584_v56 = vmax.f32 %v9548_v60, 0.0  ;;  %v9549_v28 = vadd.f32 %v12658_v25, %v15947_v0  ;;  %v9423_v11 = vpop.f32.mrb[59].mxu1  ;;  %v9807_v60 = vpop.permute.xlu0 %9806 }
 0x7d6   : > { %v9582_v36 = vmax.f32 %v9546_v14, 0.0  ;;  %v9547_v49 = vadd.f32 %v15947_v0, %v9423_v11 }
 0x7d7   : > { %v9836_v39 = vmul.f32 %v9747_v23, %v9584_v56  ;;  %v9585_v62 = vmax.f32 %v9549_v28, 0.0  ;;  %v9812_v28 = vpop.permute.xlu1 %9811 }
 0x7d8   : > { %v9834_v16 = vmul.f32 %v9737_v3, %v9582_v36  ;;  %v9583_v38 = vmax.f32 %v9547_v49, 0.0 }
 0x7d9   : > { %9872 = vst [vmem:[%s15960_s21 + $0xb0] sm:$0xff] %v9836_v39  ;;  %v9837_v46 = vmul.f32 %v9752_v47, %v9585_v62 }
 0x7da   : > { %9870 = vst [vmem:[%s15960_s21 + $0xa0] sm:$0xff] %v9834_v16  ;;  %v9835_v35 = vmul.f32 %v9742_v61, %v9583_v38  ;;  %v12661_v6 = vpop.f32.mrb[60].mxu1 }
 0x7db   : > { %9873 = vst [vmem:[%s15960_s21 + $0xb8] sm:$0xff] %v9837_v46  ;;  %v9552_v43 = vadd.f32 %v12661_v6, %v15947_v0  ;;  %v9436_v55 = vpop.f32.mrb[61].mxu1 }
 0x7dc   : > { %9871 = vst [vmem:[%s15960_s21 + $0xa8] sm:$0xff] %v9835_v35  ;;  %v9550_v59 = vadd.f32 %v15947_v0, %v9436_v55  ;;  %v12662_v53 = vpop.f32.mrb[62].mxu1 }
 0x7dd   : > { %v9588_v5 = vmax.f32 %v9552_v43, 0.0  ;;  %v9553_v37 = vadd.f32 %v12662_v53, %v15947_v0  ;;  %v9439_v1 = vpop.f32.mrb[63].mxu1 }
 0x7de   : > { %v9586_v3 = vmax.f32 %v9550_v59, 0.0  ;;  %v9551_v4 = vadd.f32 %v15947_v0, %v9439_v1 }
 0x7df   : > { %v9840_v19 = vmul.f32 %v9767_v52, %v9588_v5  ;;  %v9589_v7 = vmax.f32 %v9553_v37, 0.0 }
 0x7e0   : > { %v9838_v12 = vmul.f32 %v9757_v31, %v9586_v3  ;;  %v9587_v30 = vmax.f32 %v9551_v4, 0.0 }
 0x7e1   : > { %9876 = vst [vmem:[%s15960_s21 + $0xd0] sm:$0xff] %v9840_v19  ;;  %v9841_v61 = vmul.f32 %v9772_v34, %v9589_v7 }
 0x7e2   : > { %9874 = vst [vmem:[%s15960_s21 + $0xc0] sm:$0xff] %v9838_v12  ;;  %v9839_v33 = vmul.f32 %v9762_v18, %v9587_v30  ;;  %v12665_v45 = vpop.f32.mrb[64].mxu1 }
 0x7e3   : > { %9877 = vst [vmem:[%s15960_s21 + $0xd8] sm:$0xff] %v9841_v61  ;;  %v9556_v50 = vadd.f32 %v12665_v45, %v15947_v0  ;;  %v9452_v29 = vpop.f32.mrb[65].mxu1 }
 0x7e4   : > { %9875 = vst [vmem:[%s15960_s21 + $0xc8] sm:$0xff] %v9839_v33  ;;  %v9554_v22 = vadd.f32 %v15947_v0, %v9452_v29  ;;  %v12666_v23 = vpop.f32.mrb[66].mxu1 }
 0x7e5   : > { %v9592_v8 = vmax.f32 %v9556_v50, 0.0  ;;  %v9557_v13 = vadd.f32 %v12666_v23, %v15947_v0  ;;  %v9455_v63 = vpop.f32.mrb[67].mxu1 }
 0x7e6   : > { %v9590_v54 = vmax.f32 %v9554_v22, 0.0  ;;  %v9555_v47 = vadd.f32 %v15947_v0, %v9455_v63 }
 0x7e7   : > { %v9844_v10 = vmul.f32 %v9787_v15, %v9592_v8  ;;  %v9593_v9 = vmax.f32 %v9557_v13, 0.0 }
 0x7e8   : > { %v9842_v17 = vmul.f32 %v9777_v57, %v9590_v54  ;;  %v9591_v44 = vmax.f32 %v9555_v47, 0.0 }
 0x7e9   : > { %9880 = vst [vmem:[%s15960_s21 + $0xf0] sm:$0xff] %v9844_v10  ;;  %v9845_v27 = vmul.f32 %v9792_v32, %v9593_v9 }
 0x7ea   : > { %9878 = vst [vmem:[%s15960_s21 + $0xe0] sm:$0xff] %v9842_v17  ;;  %v9843_v24 = vmul.f32 %v9782_v20, %v9591_v44  ;;  %v12669_v21 = vpop.f32.mrb[68].mxu1 }
 0x7eb   : > { %9881 = vst [vmem:[%s15960_s21 + $0xf8] sm:$0xff] %v9845_v27  ;;  %v9560_v31 = vadd.f32 %v12669_v21, %v15947_v0  ;;  %v9468_v51 = vpop.f32.mrb[69].mxu1 }
 0x7ec   : > { %9879 = vst [vmem:[%s15960_s21 + $0xe8] sm:$0xff] %v9843_v24  ;;  %v9558_v41 = vadd.f32 %v15947_v0, %v9468_v51  ;;  %v12670_v40 = vpop.f32.mrb[70].mxu1 }
 0x7ed   : > { %v9596_v18 = vmax.f32 %v9560_v31, 0.0  ;;  %v9561_v26 = vadd.f32 %v12670_v40, %v15947_v0  ;;  %v9471_v48 = vpop.f32.mrb[71].mxu1 }
 0x7ee   : > { %v9594_v42 = vmax.f32 %v9558_v41, 0.0  ;;  %v9559_v14 = vadd.f32 %v15947_v0, %v9471_v48 }
 0x7ef   : > { %v9848_v25 = vmul.f32 %v9807_v60, %v9596_v18  ;;  %v9597_v56 = vmax.f32 %v9561_v26, 0.0 }
 0x7f0   : > { %v9846_v11 = vmul.f32 %v9797_v2, %v9594_v42  ;;  %v9595_v52 = vmax.f32 %v9559_v14, 0.0 }
 0x7f1   : > { %9884 = vst [vmem:[%s15960_s21 + $0x110] sm:$0xff] %v9848_v25  ;;  %v9849_v36 = vmul.f32 %v9812_v28, %v9597_v56 }
 0x7f2   : > { %9882 = vst [vmem:[%s15960_s21 + $0x100] sm:$0xff] %v9846_v11  ;;  %v9847_v49 = vmul.f32 %v9802_v58, %v9595_v52 }
 0x7f3   : > { %9885 = vst [vmem:[%s15960_s21 + $0x118] sm:$0xff] %v9849_v36 }
 0x7f4   : > { %9883 = vst [vmem:[%s15960_s21 + $0x108] sm:$0xff] %v9847_v49 }
 0x7f5 PF: > { %s18_s27 = sadd.s32 1, %s13831_s27  }
 0x7f6   : > { %p15_p4 = scmp.ge.s32.totalorder %s18_s27, 4  }
 0x7f8   :  { %17 = sbr.rel (!%p15_p4) target bundleno = 1 (0x1), region = 109 }

</bundles_post_ra>
